<compile_context>
chip_gen: v5e
topology: v5e:2x2
jax: 0.10.0
libtpu: 0.0.40
codegen_flags: <defaults>
</compile_context>

<pallas_src>
from functools import partial
import math

import jax
import jax.numpy as jnp
from jax import lax
from jax.experimental import pallas as pl
from jax.experimental.pallas import tpu as pltpu


_RAD2DEG = 180.0 / math.pi


def _full_spec(shape):
    n = len(shape)
    return pl.BlockSpec(shape, lambda *_: (0,) * n)


# ---------------------------- in-kernel math helpers ----------------------------

def _atan2(y, x):
    """Quadrant-corrected polynomial atan2 in radians (VPU ops only)."""
    ax = jnp.abs(x)
    ay = jnp.abs(y)
    mx = jnp.maximum(ax, ay)
    mn = jnp.minimum(ax, ay)
    z = mn / (mx + 1e-30)
    z2 = z * z
    # minimax polynomial for atan on [0, 1]  (max err ~1e-5 rad)
    p = 0.0208351
    p = p * z2 - 0.0851330
    p = p * z2 + 0.1801410
    p = p * z2 - 0.3302995
    p = p * z2 + 0.9998660
    a = p * z
    a = jnp.where(ay > ax, (math.pi / 2.0) - a, a)
    a = jnp.where(x < 0.0, math.pi - a, a)
    return jnp.where(y < 0.0, -a, a)


def _fmod360(x):
    return x - 360.0 * jnp.floor(x * (1.0 / 360.0))


# ---------------------------- the fused Pallas kernel ----------------------------

def _fused_kernel(xg_ref, wbig_ref, whhE_ref, pos0_ref, wfD_ref, bD_ref,
                  whhD_ref, wo_ref, bo_ref, dom_ref, mask_ref, out_ref,
                  *, T, P, F, H, nh, nb, inv_dh, inv_db):
    """Whole forward pass: T encoder steps + P decoder steps in one grid step."""
    BN = pos0_ref.shape[0]
    NHB = nh * nb

    def lstm_step(gates, c_prev):
        i_g = jax.nn.sigmoid(gates[:, 0 * H:1 * H])
        f_g = jax.nn.sigmoid(gates[:, 1 * H:2 * H])
        g_g = jnp.tanh(gates[:, 2 * H:3 * H])
        o_g = jax.nn.sigmoid(gates[:, 3 * H:4 * H])
        c_new = f_g * c_prev + i_g * g_g
        h_new = o_g * jnp.tanh(c_new)
        return h_new, c_new

    # ---------------- encoder: T timesteps, h/c carried as values ----------------
    whhE = whhE_ref[...]

    def enc_step(t, carry):
        h, c = carry
        # spatial attention (block-diagonal weights) applied to previous hidden
        weighted = jnp.dot(wbig_ref[t], h, preferred_element_type=jnp.float32)
        # folded-embedding x-gate contribution (precomputed, bias included)
        gates = xg_ref[t] + jnp.dot(weighted, whhE,
                                    preferred_element_type=jnp.float32)
        return lstm_step(gates, c)

    z = jnp.zeros((BN, H), jnp.float32)
    h, _ = lax.fori_loop(0, T, enc_step, (z, z), unroll=True)

    # ---------------- decoder: P prediction steps, fully fused ----------------
    wfD = wfD_ref[...]
    bD = bD_ref[...]
    whhD = whhD_ref[...]
    wo = wo_ref[...]
    bo = bo_ref[...]
    dom_vec = dom_ref[...].reshape(1, 1, NHB)      # flattened (nh*nb) domain table
    blkmask = mask_ref[...]                        # (BN, BN) block-diag pair mask

    c = jnp.zeros((BN, H), jnp.float32)
    prev = pos0_ref[...]                           # (BN, F) last observed positions
    w2d = wbig_ref[T - 1]                          # last-frame attention weights

    for p in range(P):
        # attention weighted-sum + folded embedding + LSTMCell
        weighted = jnp.dot(w2d, h, preferred_element_type=jnp.float32)
        gates = (jnp.dot(prev, wfD, preferred_element_type=jnp.float32) + bD
                 + jnp.dot(weighted, whhD, preferred_element_type=jnp.float32))
        h, c = lstm_step(gates, c)

        # output projection (MXU) + tanh
        pred = jnp.tanh(jnp.dot(h, wo, preferred_element_type=jnp.float32) + bo)
        out_ref[:, p * F:(p + 1) * F] = pred       # lane-packed resident output

        if p + 1 < P:
            # --- in-kernel feature extraction for the next attention weights ---
            x_i = pred[:, 0:1]
            y_i = pred[:, 1:2]
            head = _fmod360(_RAD2DEG * _atan2(y_i - prev[:, 1:2],
                                              x_i - prev[:, 0:1]))   # (BN, 1)
            predT = jnp.transpose(pred)            # (F, BN)
            headT = jnp.transpose(head)            # (1, BN)
            rx = predT[0:1, :] - x_i               # (BN, BN): x_j - x_i
            ry = predT[1:2, :] - y_i
            dist = jnp.sqrt(rx * rx + ry * ry + 1e-12)
            ang = _fmod360(_RAD2DEG * _atan2(ry, rx))
            bear = _fmod360(ang - head)
            hrel = _fmod360(headT - head)

            # domain-table lookup via one-hot (iota compare) + lane reduction
            ihh = jnp.clip(jnp.floor(hrel * inv_dh), 0.0, float(nh - 1))
            ibb = jnp.clip(jnp.floor(bear * inv_db), 0.0, float(nb - 1))
            flat = (ihh * float(nb) + ibb).astype(jnp.int32)          # (BN, BN)
            iota = lax.broadcasted_iota(jnp.int32, (BN, BN, NHB), 2)
            sel = iota == flat[:, :, None]
            dom = jnp.sum(jnp.where(sel, dom_vec, 0.0), axis=-1)      # (BN, BN)

            wr = jnp.maximum(dom - dist, 0.0) * blkmask
            w2d = wr / (jnp.sum(wr, axis=-1, keepdims=True) + 1e-9)

        prev = pred


def _run_fused(xg_all, wbig_enc, whh_e, pos0, wf_d, b_d, whh_d, w_out, b_out,
               dom_tab, blkmask, *, T, P, F, H, nh, nb, dh, db):
    BN = pos0.shape[0]
    kernel = partial(_fused_kernel, T=T, P=P, F=F, H=H, nh=nh, nb=nb,
                     inv_dh=1.0 / dh, inv_db=1.0 / db)
    args = (xg_all, wbig_enc, whh_e, pos0, wf_d, b_d, whh_d, w_out, b_out,
            dom_tab, blkmask)
    return pl.pallas_call(
        kernel,
        grid=(1,),
        in_specs=[_full_spec(a.shape) for a in args],
        out_specs=_full_spec((BN, P * F)),
        out_shape=jax.ShapeDtypeStruct((BN, P * F), jnp.float32),
        compiler_params=pltpu.CompilerParams(
            dimension_semantics=("arbitrary",)),
    )(*args)


# ---------------------------- glue (plain JAX, jitted once) ----------------------------

def _attn_weights(dom, dist, mask_i, mask_j):
    w = jnp.maximum(dom - dist, 0.0) * mask_i * mask_j
    denom = jnp.sum(w, axis=-1, keepdims=True) + 1e-9
    return w / denom


def _block_diag(w):
    # w: (..., B, N, N) -> (..., B*N, B*N) block-diagonal
    *lead, Bd, N, _ = w.shape
    eye = jnp.eye(Bd, dtype=w.dtype)
    out = w[..., :, :, None, :] * eye[:, None, :, None]
    return out.reshape(*lead, Bd * N, Bd * N)


def init_params(key, feature_size, embedding_dim, enc_dim, dec_dim,
                delta_bearing, delta_heading, domain_parameter):
    ks = jax.random.split(key, 5)

    def lin(k, i, o):
        kw, kb = jax.random.split(k)
        lim = 1.0 / jnp.sqrt(float(i))
        return {'w': jax.random.uniform(kw, (i, o), jnp.float32, minval=-lim, maxval=lim),
                'b': jax.random.uniform(kb, (o,), jnp.float32, minval=-lim, maxval=lim)}

    def lstm(k, i, h):
        k1, k2, k3, k4 = jax.random.split(k, 4)
        lim = 1.0 / jnp.sqrt(float(h))
        b_ih = jax.random.uniform(k3, (4 * h,), jnp.float32, minval=-lim, maxval=lim)
        b_hh = jax.random.uniform(k4, (4 * h,), jnp.float32, minval=-lim, maxval=lim)
        return {'w_ih_t': jax.random.uniform(k1, (i, 4 * h), jnp.float32,
                                             minval=-lim, maxval=lim),
                'w_hh_t': jax.random.uniform(k2, (h, 4 * h), jnp.float32,
                                             minval=-lim, maxval=lim),
                'b': b_ih + b_hh}

    return {
        'enc_emb': lin(ks[0], feature_size, embedding_dim),
        'dec_emb': lin(ks[1], feature_size, embedding_dim),
        'encoder': lstm(ks[2], embedding_dim, enc_dim),
        'decoder': lstm(ks[3], embedding_dim, dec_dim),
        'out':     lin(ks[4], dec_dim, feature_size),
        'attn': {'domain': jnp.full((int(360 // delta_heading),
                                     int(360 // delta_bearing)),
                                    float(domain_parameter), jnp.float32)},
    }


@partial(jax.jit,
         static_argnames=("prediction_length", "delta_bearing", "delta_heading"))
def spatial_model_forward(params, sequence, dist_matrix, bearing_matrix,
                          heading_matrix, seq_mask, op_mask, *,
                          prediction_length, delta_bearing, delta_heading):
    del op_mask  # unused (matches reference: prediction_mask is never applied)
    B, N, T, F = sequence.shape
    BN = B * N
    H = params['encoder']['w_hh_t'].shape[0]
    D = params['decoder']['w_hh_t'].shape[0]
    assert H == D, "enc_dim != dec_dim would require projection layers"
    P = prediction_length

    domain = params['attn']['domain']
    nh, nb = domain.shape
    dh = float(delta_heading)
    db = float(delta_bearing)

    # ---- encoder spatial-attention weights for ALL timesteps (hoisted) ----
    idx_h = jnp.floor(heading_matrix / dh).astype(jnp.int32) % nh      # (B,N,T,N)
    idx_b = jnp.floor(bearing_matrix / db).astype(jnp.int32) % nb
    dom_enc = domain[idx_h, idx_b]                                     # (B,N,T,N)
    m_i = seq_mask[:, :, :, None]
    m_j = jnp.transpose(seq_mask, (0, 2, 1))[:, None, :, :]
    w_enc = _attn_weights(dom_enc, dist_matrix, m_i, m_j)              # (B,N,T,N)
    wbig_enc = _block_diag(jnp.transpose(w_enc, (2, 0, 1, 3)))         # (T,BN,BN)

    # ---- folded embeddings (affine emb folded into LSTM input weights) ----
    wf_e = params['enc_emb']['w'] @ params['encoder']['w_ih_t']                  # (F,4H)
    b_e = params['enc_emb']['b'] @ params['encoder']['w_ih_t'] + params['encoder']['b']
    xg_all = (jnp.einsum('bntf,fg->tbng', sequence, wf_e).reshape(T, BN, 4 * H)
              + b_e[None, None, :])

    wf_d = params['dec_emb']['w'] @ params['decoder']['w_ih_t']                  # (F,4D)
    b_d = (params['dec_emb']['b'] @ params['decoder']['w_ih_t']
           + params['decoder']['b']).reshape(1, 4 * D)
    w_out = params['out']['w']                                                   # (D,F)
    b_out = params['out']['b'].reshape(1, F)

    mask_last = seq_mask[:, :, -1]                                               # (B,N)
    blkmask = _block_diag(mask_last[:, :, None] * mask_last[:, None, :])         # (BN,BN)
    pos0 = sequence[:, :, -1, :].reshape(BN, F)
    dom_tab = domain.reshape(1, nh * nb)

    out_flat = _run_fused(xg_all, wbig_enc, params['encoder']['w_hh_t'],
                          pos0, wf_d, b_d, params['decoder']['w_hh_t'],
                          w_out, b_out, dom_tab, blkmask,
                          T=T, P=P, F=F, H=H, nh=nh, nb=nb, dh=dh, db=db)

    output = out_flat.reshape(B, N, P, F)          # (B, N, prediction_length, F)
    alignment_vector = {}
    return output, alignment_vector


if __name__ == "__main__":
    # small shapes consistent with the module
    B, N = 2, 4                    # batch, num_pedestrians
    T, P = 8, 4                    # sequence_length, prediction_length
    F = 2                          # feature_size (x, y)
    EMB, ENC, DEC = 16, 32, 32     # enc_dim == att_dim == dec_dim (no extra proj layers)
    DB, DH, DOMAIN = 30, 30, 2.0

    key = jax.random.PRNGKey(0)
    kp, k1, k2, k3, k4 = jax.random.split(key, 5)

    params = init_params(kp, F, EMB, ENC, DEC, DB, DH, DOMAIN)

    sequence = jax.random.normal(k1, (B, N, T, F), jnp.float32)
    dist_matrix = jax.random.uniform(k2, (B, N, T, N), jnp.float32, minval=0.0, maxval=4.0)
    bearing_matrix = jax.random.uniform(k3, (B, N, T, N), jnp.float32, minval=0.0, maxval=360.0)
    heading_matrix = jax.random.uniform(k4, (B, N, T, N), jnp.float32, minval=0.0, maxval=360.0)
    seq_mask = jnp.ones((B, N, T), jnp.float32)
    op_mask = jnp.ones((B, N), jnp.float32)

    output, align = spatial_model_forward(
        params, sequence, dist_matrix, bearing_matrix, heading_matrix,
        seq_mask, op_mask,
        prediction_length=P, delta_bearing=DB, delta_heading=DH)
    output = jax.block_until_ready(output)
    assert output.shape == (B, N, P, F), output.shape
    assert bool(jnp.all(jnp.isfinite(output)))
    print("KERNEL_OK")
</pallas_src>

<mosaic_0001>
module attributes {stable_mosaic.version = 11 : i64} {
  func.func @_fused_kernel(%arg0: i32, %arg1: memref<8x8x128xf32, #tpu.memory_space<vmem>>, %arg2: memref<8x8x8xf32, #tpu.memory_space<vmem>>, %arg3: memref<32x128xf32, #tpu.memory_space<vmem>>, %arg4: memref<8x2xf32, #tpu.memory_space<vmem>>, %arg5: memref<2x128xf32, #tpu.memory_space<vmem>>, %arg6: memref<1x128xf32, #tpu.memory_space<vmem>>, %arg7: memref<32x128xf32, #tpu.memory_space<vmem>>, %arg8: memref<32x2xf32, #tpu.memory_space<vmem>>, %arg9: memref<1x2xf32, #tpu.memory_space<vmem>>, %arg10: memref<1x144xf32, #tpu.memory_space<vmem>>, %arg11: memref<8x8xf32, #tpu.memory_space<vmem>>, %arg12: memref<8x8xf32, #tpu.memory_space<vmem>>) attributes {dimension_semantics = [#tpu.dimension_semantics<arbitrary>], iteration_bounds = array<i64: 1>, scalar_prefetch = 0 : i64, scratch_operands = 0 : i64, tpu.core_type = #tpu.core_type<tc>, window_params = [{pipeline_mode = #tpu.pipeline_mode<synchronous>, transform_indices = @transform_0, window_bounds = array<i64: 8, 8, 128>}, {pipeline_mode = #tpu.pipeline_mode<synchronous>, transform_indices = @transform_1, window_bounds = array<i64: 8, 8, 8>}, {pipeline_mode = #tpu.pipeline_mode<synchronous>, transform_indices = @transform_2, window_bounds = array<i64: 32, 128>}, {pipeline_mode = #tpu.pipeline_mode<synchronous>, transform_indices = @transform_3, window_bounds = array<i64: 8, 2>}, {pipeline_mode = #tpu.pipeline_mode<synchronous>, transform_indices = @transform_4, window_bounds = array<i64: 2, 128>}, {pipeline_mode = #tpu.pipeline_mode<synchronous>, transform_indices = @transform_5, window_bounds = array<i64: 1, 128>}, {pipeline_mode = #tpu.pipeline_mode<synchronous>, transform_indices = @transform_6, window_bounds = array<i64: 32, 128>}, {pipeline_mode = #tpu.pipeline_mode<synchronous>, transform_indices = @transform_7, window_bounds = array<i64: 32, 2>}, {pipeline_mode = #tpu.pipeline_mode<synchronous>, transform_indices = @transform_8, window_bounds = array<i64: 1, 2>}, {pipeline_mode = #tpu.pipeline_mode<synchronous>, transform_indices = @transform_9, window_bounds = array<i64: 1, 144>}, {pipeline_mode = #tpu.pipeline_mode<synchronous>, transform_indices = @transform_10, window_bounds = array<i64: 8, 8>}, {pipeline_mode = #tpu.pipeline_mode<synchronous>, transform_indices = @transform_11, window_bounds = array<i64: 8, 8>}]} {
    %c0 = arith.constant 0 : index
    %c0_0 = arith.constant 0 : index
    %0 = vector.load %arg3[%c0, %c0_0] : memref<32x128xf32, #tpu.memory_space<vmem>>, vector<32x128xf32>
    %cst = arith.constant 0.000000e+00 : f32
    %1 = vector.broadcast %cst : f32 to vector<8x32xf32>
    %c0_i32 = arith.constant 0 : i32
    %2 = arith.index_cast %c0_i32 : i32 to index
    %c0_1 = arith.constant 0 : index
    %c0_2 = arith.constant 0 : index
    %3 = vector.load %arg2[%2, %c0_1, %c0_2] : memref<8x8x8xf32, #tpu.memory_space<vmem>>, vector<1x8x8xf32>
    %4 = vector.shape_cast %3 : vector<1x8x8xf32> to vector<8x8xf32>
    %cst_3 = arith.constant dense<0.000000e+00> : vector<8x32xf32>
    %5 = tpu.matmul %4, %1, %cst_3 {dimension_numbers = #tpu.dot_dimension_numbers<[1], [0], [0], [1], [0, 0, 1, 1], [], []>} : vector<8x8xf32>, vector<8x32xf32>, vector<8x32xf32> -> vector<8x32xf32>
    %6 = arith.index_cast %c0_i32 : i32 to index
    %c0_4 = arith.constant 0 : index
    %c0_5 = arith.constant 0 : index
    %7 = vector.load %arg1[%6, %c0_4, %c0_5] : memref<8x8x128xf32, #tpu.memory_space<vmem>>, vector<1x8x128xf32>
    %8 = vector.shape_cast %7 : vector<1x8x128xf32> to vector<8x128xf32>
    %cst_6 = arith.constant dense<0.000000e+00> : vector<8x128xf32>
    %9 = tpu.matmul %5, %0, %cst_6 {dimension_numbers = #tpu.dot_dimension_numbers<[1], [0], [0], [1], [0, 0, 1, 1], [], []>} : vector<8x32xf32>, vector<32x128xf32>, vector<8x128xf32> -> vector<8x128xf32>
    %10 = arith.addf %8, %9 : vector<8x128xf32>
    %11 = vector.extract_strided_slice %10 {offsets = [0, 0], sizes = [8, 32], strides = [1, 1]} : vector<8x128xf32> to vector<8x32xf32>
    %12 = arith.negf %11 : vector<8x32xf32>
    %13 = math.exp %12 : vector<8x32xf32>
    %cst_7 = arith.constant 1.000000e+00 : f32
    %14 = vector.broadcast %cst_7 : f32 to vector<8x32xf32>
    %15 = arith.addf %14, %13 : vector<8x32xf32>
    %16 = arith.divf %14, %15 : vector<8x32xf32>
    %17 = vector.extract_strided_slice %10 {offsets = [0, 32], sizes = [8, 32], strides = [1, 1]} : vector<8x128xf32> to vector<8x32xf32>
    %18 = arith.negf %17 : vector<8x32xf32>
    %19 = math.exp %18 : vector<8x32xf32>
    %cst_8 = arith.constant 1.000000e+00 : f32
    %20 = vector.broadcast %cst_8 : f32 to vector<8x32xf32>
    %21 = arith.addf %20, %19 : vector<8x32xf32>
    %22 = arith.divf %20, %21 : vector<8x32xf32>
    %23 = vector.extract_strided_slice %10 {offsets = [0, 64], sizes = [8, 32], strides = [1, 1]} : vector<8x128xf32> to vector<8x32xf32>
    %24 = math.tanh %23 : vector<8x32xf32>
    %25 = vector.extract_strided_slice %10 {offsets = [0, 96], sizes = [8, 32], strides = [1, 1]} : vector<8x128xf32> to vector<8x32xf32>
    %26 = arith.negf %25 : vector<8x32xf32>
    %27 = math.exp %26 : vector<8x32xf32>
    %cst_9 = arith.constant 1.000000e+00 : f32
    %28 = vector.broadcast %cst_9 : f32 to vector<8x32xf32>
    %29 = arith.addf %28, %27 : vector<8x32xf32>
    %30 = arith.divf %28, %29 : vector<8x32xf32>
    %31 = arith.mulf %22, %1 : vector<8x32xf32>
    %32 = arith.mulf %16, %24 : vector<8x32xf32>
    %33 = arith.addf %31, %32 : vector<8x32xf32>
    %34 = math.tanh %33 : vector<8x32xf32>
    %35 = arith.mulf %30, %34 : vector<8x32xf32>
    %c1_i32 = arith.constant 1 : i32
    %36 = arith.index_cast %c1_i32 : i32 to index
    %c0_10 = arith.constant 0 : index
    %c0_11 = arith.constant 0 : index
    %37 = vector.load %arg2[%36, %c0_10, %c0_11] : memref<8x8x8xf32, #tpu.memory_space<vmem>>, vector<1x8x8xf32>
    %38 = vector.shape_cast %37 : vector<1x8x8xf32> to vector<8x8xf32>
    %cst_12 = arith.constant dense<0.000000e+00> : vector<8x32xf32>
    %39 = tpu.matmul %38, %35, %cst_12 {dimension_numbers = #tpu.dot_dimension_numbers<[1], [0], [0], [1], [0, 0, 1, 1], [], []>} : vector<8x8xf32>, vector<8x32xf32>, vector<8x32xf32> -> vector<8x32xf32>
    %40 = arith.index_cast %c1_i32 : i32 to index
    %c0_13 = arith.constant 0 : index
    %c0_14 = arith.constant 0 : index
    %41 = vector.load %arg1[%40, %c0_13, %c0_14] : memref<8x8x128xf32, #tpu.memory_space<vmem>>, vector<1x8x128xf32>
    %42 = vector.shape_cast %41 : vector<1x8x128xf32> to vector<8x128xf32>
    %cst_15 = arith.constant dense<0.000000e+00> : vector<8x128xf32>
    %43 = tpu.matmul %39, %0, %cst_15 {dimension_numbers = #tpu.dot_dimension_numbers<[1], [0], [0], [1], [0, 0, 1, 1], [], []>} : vector<8x32xf32>, vector<32x128xf32>, vector<8x128xf32> -> vector<8x128xf32>
    %44 = arith.addf %42, %43 : vector<8x128xf32>
    %45 = vector.extract_strided_slice %44 {offsets = [0, 0], sizes = [8, 32], strides = [1, 1]} : vector<8x128xf32> to vector<8x32xf32>
    %46 = arith.negf %45 : vector<8x32xf32>
    %47 = math.exp %46 : vector<8x32xf32>
    %cst_16 = arith.constant 1.000000e+00 : f32
    %48 = vector.broadcast %cst_16 : f32 to vector<8x32xf32>
    %49 = arith.addf %48, %47 : vector<8x32xf32>
    %50 = arith.divf %48, %49 : vector<8x32xf32>
    %51 = vector.extract_strided_slice %44 {offsets = [0, 32], sizes = [8, 32], strides = [1, 1]} : vector<8x128xf32> to vector<8x32xf32>
    %52 = arith.negf %51 : vector<8x32xf32>
    %53 = math.exp %52 : vector<8x32xf32>
    %cst_17 = arith.constant 1.000000e+00 : f32
    %54 = vector.broadcast %cst_17 : f32 to vector<8x32xf32>
    %55 = arith.addf %54, %53 : vector<8x32xf32>
    %56 = arith.divf %54, %55 : vector<8x32xf32>
    %57 = vector.extract_strided_slice %44 {offsets = [0, 64], sizes = [8, 32], strides = [1, 1]} : vector<8x128xf32> to vector<8x32xf32>
    %58 = math.tanh %57 : vector<8x32xf32>
    %59 = vector.extract_strided_slice %44 {offsets = [0, 96], sizes = [8, 32], strides = [1, 1]} : vector<8x128xf32> to vector<8x32xf32>
    %60 = arith.negf %59 : vector<8x32xf32>
    %61 = math.exp %60 : vector<8x32xf32>
    %cst_18 = arith.constant 1.000000e+00 : f32
    %62 = vector.broadcast %cst_18 : f32 to vector<8x32xf32>
    %63 = arith.addf %62, %61 : vector<8x32xf32>
    %64 = arith.divf %62, %63 : vector<8x32xf32>
    %65 = arith.mulf %56, %33 : vector<8x32xf32>
    %66 = arith.mulf %50, %58 : vector<8x32xf32>
    %67 = arith.addf %65, %66 : vector<8x32xf32>
    %68 = math.tanh %67 : vector<8x32xf32>
    %69 = arith.mulf %64, %68 : vector<8x32xf32>
    %c2_i32 = arith.constant 2 : i32
    %70 = arith.index_cast %c2_i32 : i32 to index
    %c0_19 = arith.constant 0 : index
    %c0_20 = arith.constant 0 : index
    %71 = vector.load %arg2[%70, %c0_19, %c0_20] : memref<8x8x8xf32, #tpu.memory_space<vmem>>, vector<1x8x8xf32>
    %72 = vector.shape_cast %71 : vector<1x8x8xf32> to vector<8x8xf32>
    %cst_21 = arith.constant dense<0.000000e+00> : vector<8x32xf32>
    %73 = tpu.matmul %72, %69, %cst_21 {dimension_numbers = #tpu.dot_dimension_numbers<[1], [0], [0], [1], [0, 0, 1, 1], [], []>} : vector<8x8xf32>, vector<8x32xf32>, vector<8x32xf32> -> vector<8x32xf32>
    %74 = arith.index_cast %c2_i32 : i32 to index
    %c0_22 = arith.constant 0 : index
    %c0_23 = arith.constant 0 : index
    %75 = vector.load %arg1[%74, %c0_22, %c0_23] : memref<8x8x128xf32, #tpu.memory_space<vmem>>, vector<1x8x128xf32>
    %76 = vector.shape_cast %75 : vector<1x8x128xf32> to vector<8x128xf32>
    %cst_24 = arith.constant dense<0.000000e+00> : vector<8x128xf32>
    %77 = tpu.matmul %73, %0, %cst_24 {dimension_numbers = #tpu.dot_dimension_numbers<[1], [0], [0], [1], [0, 0, 1, 1], [], []>} : vector<8x32xf32>, vector<32x128xf32>, vector<8x128xf32> -> vector<8x128xf32>
    %78 = arith.addf %76, %77 : vector<8x128xf32>
    %79 = vector.extract_strided_slice %78 {offsets = [0, 0], sizes = [8, 32], strides = [1, 1]} : vector<8x128xf32> to vector<8x32xf32>
    %80 = arith.negf %79 : vector<8x32xf32>
    %81 = math.exp %80 : vector<8x32xf32>
    %cst_25 = arith.constant 1.000000e+00 : f32
    %82 = vector.broadcast %cst_25 : f32 to vector<8x32xf32>
    %83 = arith.addf %82, %81 : vector<8x32xf32>
    %84 = arith.divf %82, %83 : vector<8x32xf32>
    %85 = vector.extract_strided_slice %78 {offsets = [0, 32], sizes = [8, 32], strides = [1, 1]} : vector<8x128xf32> to vector<8x32xf32>
    %86 = arith.negf %85 : vector<8x32xf32>
    %87 = math.exp %86 : vector<8x32xf32>
    %cst_26 = arith.constant 1.000000e+00 : f32
    %88 = vector.broadcast %cst_26 : f32 to vector<8x32xf32>
    %89 = arith.addf %88, %87 : vector<8x32xf32>
    %90 = arith.divf %88, %89 : vector<8x32xf32>
    %91 = vector.extract_strided_slice %78 {offsets = [0, 64], sizes = [8, 32], strides = [1, 1]} : vector<8x128xf32> to vector<8x32xf32>
    %92 = math.tanh %91 : vector<8x32xf32>
    %93 = vector.extract_strided_slice %78 {offsets = [0, 96], sizes = [8, 32], strides = [1, 1]} : vector<8x128xf32> to vector<8x32xf32>
    %94 = arith.negf %93 : vector<8x32xf32>
    %95 = math.exp %94 : vector<8x32xf32>
    %cst_27 = arith.constant 1.000000e+00 : f32
    %96 = vector.broadcast %cst_27 : f32 to vector<8x32xf32>
    %97 = arith.addf %96, %95 : vector<8x32xf32>
    %98 = arith.divf %96, %97 : vector<8x32xf32>
    %99 = arith.mulf %90, %67 : vector<8x32xf32>
    %100 = arith.mulf %84, %92 : vector<8x32xf32>
    %101 = arith.addf %99, %100 : vector<8x32xf32>
    %102 = math.tanh %101 : vector<8x32xf32>
    %103 = arith.mulf %98, %102 : vector<8x32xf32>
    %c3_i32 = arith.constant 3 : i32
    %104 = arith.index_cast %c3_i32 : i32 to index
    %c0_28 = arith.constant 0 : index
    %c0_29 = arith.constant 0 : index
    %105 = vector.load %arg2[%104, %c0_28, %c0_29] : memref<8x8x8xf32, #tpu.memory_space<vmem>>, vector<1x8x8xf32>
    %106 = vector.shape_cast %105 : vector<1x8x8xf32> to vector<8x8xf32>
    %cst_30 = arith.constant dense<0.000000e+00> : vector<8x32xf32>
    %107 = tpu.matmul %106, %103, %cst_30 {dimension_numbers = #tpu.dot_dimension_numbers<[1], [0], [0], [1], [0, 0, 1, 1], [], []>} : vector<8x8xf32>, vector<8x32xf32>, vector<8x32xf32> -> vector<8x32xf32>
    %108 = arith.index_cast %c3_i32 : i32 to index
    %c0_31 = arith.constant 0 : index
    %c0_32 = arith.constant 0 : index
    %109 = vector.load %arg1[%108, %c0_31, %c0_32] : memref<8x8x128xf32, #tpu.memory_space<vmem>>, vector<1x8x128xf32>
    %110 = vector.shape_cast %109 : vector<1x8x128xf32> to vector<8x128xf32>
    %cst_33 = arith.constant dense<0.000000e+00> : vector<8x128xf32>
    %111 = tpu.matmul %107, %0, %cst_33 {dimension_numbers = #tpu.dot_dimension_numbers<[1], [0], [0], [1], [0, 0, 1, 1], [], []>} : vector<8x32xf32>, vector<32x128xf32>, vector<8x128xf32> -> vector<8x128xf32>
    %112 = arith.addf %110, %111 : vector<8x128xf32>
    %113 = vector.extract_strided_slice %112 {offsets = [0, 0], sizes = [8, 32], strides = [1, 1]} : vector<8x128xf32> to vector<8x32xf32>
    %114 = arith.negf %113 : vector<8x32xf32>
    %115 = math.exp %114 : vector<8x32xf32>
    %cst_34 = arith.constant 1.000000e+00 : f32
    %116 = vector.broadcast %cst_34 : f32 to vector<8x32xf32>
    %117 = arith.addf %116, %115 : vector<8x32xf32>
    %118 = arith.divf %116, %117 : vector<8x32xf32>
    %119 = vector.extract_strided_slice %112 {offsets = [0, 32], sizes = [8, 32], strides = [1, 1]} : vector<8x128xf32> to vector<8x32xf32>
    %120 = arith.negf %119 : vector<8x32xf32>
    %121 = math.exp %120 : vector<8x32xf32>
    %cst_35 = arith.constant 1.000000e+00 : f32
    %122 = vector.broadcast %cst_35 : f32 to vector<8x32xf32>
    %123 = arith.addf %122, %121 : vector<8x32xf32>
    %124 = arith.divf %122, %123 : vector<8x32xf32>
    %125 = vector.extract_strided_slice %112 {offsets = [0, 64], sizes = [8, 32], strides = [1, 1]} : vector<8x128xf32> to vector<8x32xf32>
    %126 = math.tanh %125 : vector<8x32xf32>
    %127 = vector.extract_strided_slice %112 {offsets = [0, 96], sizes = [8, 32], strides = [1, 1]} : vector<8x128xf32> to vector<8x32xf32>
    %128 = arith.negf %127 : vector<8x32xf32>
    %129 = math.exp %128 : vector<8x32xf32>
    %cst_36 = arith.constant 1.000000e+00 : f32
    %130 = vector.broadcast %cst_36 : f32 to vector<8x32xf32>
    %131 = arith.addf %130, %129 : vector<8x32xf32>
    %132 = arith.divf %130, %131 : vector<8x32xf32>
    %133 = arith.mulf %124, %101 : vector<8x32xf32>
    %134 = arith.mulf %118, %126 : vector<8x32xf32>
    %135 = arith.addf %133, %134 : vector<8x32xf32>
    %136 = math.tanh %135 : vector<8x32xf32>
    %137 = arith.mulf %132, %136 : vector<8x32xf32>
    %c4_i32 = arith.constant 4 : i32
    %138 = arith.index_cast %c4_i32 : i32 to index
    %c0_37 = arith.constant 0 : index
    %c0_38 = arith.constant 0 : index
    %139 = vector.load %arg2[%138, %c0_37, %c0_38] : memref<8x8x8xf32, #tpu.memory_space<vmem>>, vector<1x8x8xf32>
    %140 = vector.shape_cast %139 : vector<1x8x8xf32> to vector<8x8xf32>
    %cst_39 = arith.constant dense<0.000000e+00> : vector<8x32xf32>
    %141 = tpu.matmul %140, %137, %cst_39 {dimension_numbers = #tpu.dot_dimension_numbers<[1], [0], [0], [1], [0, 0, 1, 1], [], []>} : vector<8x8xf32>, vector<8x32xf32>, vector<8x32xf32> -> vector<8x32xf32>
    %142 = arith.index_cast %c4_i32 : i32 to index
    %c0_40 = arith.constant 0 : index
    %c0_41 = arith.constant 0 : index
    %143 = vector.load %arg1[%142, %c0_40, %c0_41] : memref<8x8x128xf32, #tpu.memory_space<vmem>>, vector<1x8x128xf32>
    %144 = vector.shape_cast %143 : vector<1x8x128xf32> to vector<8x128xf32>
    %cst_42 = arith.constant dense<0.000000e+00> : vector<8x128xf32>
    %145 = tpu.matmul %141, %0, %cst_42 {dimension_numbers = #tpu.dot_dimension_numbers<[1], [0], [0], [1], [0, 0, 1, 1], [], []>} : vector<8x32xf32>, vector<32x128xf32>, vector<8x128xf32> -> vector<8x128xf32>
    %146 = arith.addf %144, %145 : vector<8x128xf32>
    %147 = vector.extract_strided_slice %146 {offsets = [0, 0], sizes = [8, 32], strides = [1, 1]} : vector<8x128xf32> to vector<8x32xf32>
    %148 = arith.negf %147 : vector<8x32xf32>
    %149 = math.exp %148 : vector<8x32xf32>
    %cst_43 = arith.constant 1.000000e+00 : f32
    %150 = vector.broadcast %cst_43 : f32 to vector<8x32xf32>
    %151 = arith.addf %150, %149 : vector<8x32xf32>
    %152 = arith.divf %150, %151 : vector<8x32xf32>
    %153 = vector.extract_strided_slice %146 {offsets = [0, 32], sizes = [8, 32], strides = [1, 1]} : vector<8x128xf32> to vector<8x32xf32>
    %154 = arith.negf %153 : vector<8x32xf32>
    %155 = math.exp %154 : vector<8x32xf32>
    %cst_44 = arith.constant 1.000000e+00 : f32
    %156 = vector.broadcast %cst_44 : f32 to vector<8x32xf32>
    %157 = arith.addf %156, %155 : vector<8x32xf32>
    %158 = arith.divf %156, %157 : vector<8x32xf32>
    %159 = vector.extract_strided_slice %146 {offsets = [0, 64], sizes = [8, 32], strides = [1, 1]} : vector<8x128xf32> to vector<8x32xf32>
    %160 = math.tanh %159 : vector<8x32xf32>
    %161 = vector.extract_strided_slice %146 {offsets = [0, 96], sizes = [8, 32], strides = [1, 1]} : vector<8x128xf32> to vector<8x32xf32>
    %162 = arith.negf %161 : vector<8x32xf32>
    %163 = math.exp %162 : vector<8x32xf32>
    %cst_45 = arith.constant 1.000000e+00 : f32
    %164 = vector.broadcast %cst_45 : f32 to vector<8x32xf32>
    %165 = arith.addf %164, %163 : vector<8x32xf32>
    %166 = arith.divf %164, %165 : vector<8x32xf32>
    %167 = arith.mulf %158, %135 : vector<8x32xf32>
    %168 = arith.mulf %152, %160 : vector<8x32xf32>
    %169 = arith.addf %167, %168 : vector<8x32xf32>
    %170 = math.tanh %169 : vector<8x32xf32>
    %171 = arith.mulf %166, %170 : vector<8x32xf32>
    %c5_i32 = arith.constant 5 : i32
    %172 = arith.index_cast %c5_i32 : i32 to index
    %c0_46 = arith.constant 0 : index
    %c0_47 = arith.constant 0 : index
    %173 = vector.load %arg2[%172, %c0_46, %c0_47] : memref<8x8x8xf32, #tpu.memory_space<vmem>>, vector<1x8x8xf32>
    %174 = vector.shape_cast %173 : vector<1x8x8xf32> to vector<8x8xf32>
    %cst_48 = arith.constant dense<0.000000e+00> : vector<8x32xf32>
    %175 = tpu.matmul %174, %171, %cst_48 {dimension_numbers = #tpu.dot_dimension_numbers<[1], [0], [0], [1], [0, 0, 1, 1], [], []>} : vector<8x8xf32>, vector<8x32xf32>, vector<8x32xf32> -> vector<8x32xf32>
    %176 = arith.index_cast %c5_i32 : i32 to index
    %c0_49 = arith.constant 0 : index
    %c0_50 = arith.constant 0 : index
    %177 = vector.load %arg1[%176, %c0_49, %c0_50] : memref<8x8x128xf32, #tpu.memory_space<vmem>>, vector<1x8x128xf32>
    %178 = vector.shape_cast %177 : vector<1x8x128xf32> to vector<8x128xf32>
    %cst_51 = arith.constant dense<0.000000e+00> : vector<8x128xf32>
    %179 = tpu.matmul %175, %0, %cst_51 {dimension_numbers = #tpu.dot_dimension_numbers<[1], [0], [0], [1], [0, 0, 1, 1], [], []>} : vector<8x32xf32>, vector<32x128xf32>, vector<8x128xf32> -> vector<8x128xf32>
    %180 = arith.addf %178, %179 : vector<8x128xf32>
    %181 = vector.extract_strided_slice %180 {offsets = [0, 0], sizes = [8, 32], strides = [1, 1]} : vector<8x128xf32> to vector<8x32xf32>
    %182 = arith.negf %181 : vector<8x32xf32>
    %183 = math.exp %182 : vector<8x32xf32>
    %cst_52 = arith.constant 1.000000e+00 : f32
    %184 = vector.broadcast %cst_52 : f32 to vector<8x32xf32>
    %185 = arith.addf %184, %183 : vector<8x32xf32>
    %186 = arith.divf %184, %185 : vector<8x32xf32>
    %187 = vector.extract_strided_slice %180 {offsets = [0, 32], sizes = [8, 32], strides = [1, 1]} : vector<8x128xf32> to vector<8x32xf32>
    %188 = arith.negf %187 : vector<8x32xf32>
    %189 = math.exp %188 : vector<8x32xf32>
    %cst_53 = arith.constant 1.000000e+00 : f32
    %190 = vector.broadcast %cst_53 : f32 to vector<8x32xf32>
    %191 = arith.addf %190, %189 : vector<8x32xf32>
    %192 = arith.divf %190, %191 : vector<8x32xf32>
    %193 = vector.extract_strided_slice %180 {offsets = [0, 64], sizes = [8, 32], strides = [1, 1]} : vector<8x128xf32> to vector<8x32xf32>
    %194 = math.tanh %193 : vector<8x32xf32>
    %195 = vector.extract_strided_slice %180 {offsets = [0, 96], sizes = [8, 32], strides = [1, 1]} : vector<8x128xf32> to vector<8x32xf32>
    %196 = arith.negf %195 : vector<8x32xf32>
    %197 = math.exp %196 : vector<8x32xf32>
    %cst_54 = arith.constant 1.000000e+00 : f32
    %198 = vector.broadcast %cst_54 : f32 to vector<8x32xf32>
    %199 = arith.addf %198, %197 : vector<8x32xf32>
    %200 = arith.divf %198, %199 : vector<8x32xf32>
    %201 = arith.mulf %192, %169 : vector<8x32xf32>
    %202 = arith.mulf %186, %194 : vector<8x32xf32>
    %203 = arith.addf %201, %202 : vector<8x32xf32>
    %204 = math.tanh %203 : vector<8x32xf32>
    %205 = arith.mulf %200, %204 : vector<8x32xf32>
    %c6_i32 = arith.constant 6 : i32
    %206 = arith.index_cast %c6_i32 : i32 to index
    %c0_55 = arith.constant 0 : index
    %c0_56 = arith.constant 0 : index
    %207 = vector.load %arg2[%206, %c0_55, %c0_56] : memref<8x8x8xf32, #tpu.memory_space<vmem>>, vector<1x8x8xf32>
    %208 = vector.shape_cast %207 : vector<1x8x8xf32> to vector<8x8xf32>
    %cst_57 = arith.constant dense<0.000000e+00> : vector<8x32xf32>
    %209 = tpu.matmul %208, %205, %cst_57 {dimension_numbers = #tpu.dot_dimension_numbers<[1], [0], [0], [1], [0, 0, 1, 1], [], []>} : vector<8x8xf32>, vector<8x32xf32>, vector<8x32xf32> -> vector<8x32xf32>
    %210 = arith.index_cast %c6_i32 : i32 to index
    %c0_58 = arith.constant 0 : index
    %c0_59 = arith.constant 0 : index
    %211 = vector.load %arg1[%210, %c0_58, %c0_59] : memref<8x8x128xf32, #tpu.memory_space<vmem>>, vector<1x8x128xf32>
    %212 = vector.shape_cast %211 : vector<1x8x128xf32> to vector<8x128xf32>
    %cst_60 = arith.constant dense<0.000000e+00> : vector<8x128xf32>
    %213 = tpu.matmul %209, %0, %cst_60 {dimension_numbers = #tpu.dot_dimension_numbers<[1], [0], [0], [1], [0, 0, 1, 1], [], []>} : vector<8x32xf32>, vector<32x128xf32>, vector<8x128xf32> -> vector<8x128xf32>
    %214 = arith.addf %212, %213 : vector<8x128xf32>
    %215 = vector.extract_strided_slice %214 {offsets = [0, 0], sizes = [8, 32], strides = [1, 1]} : vector<8x128xf32> to vector<8x32xf32>
    %216 = arith.negf %215 : vector<8x32xf32>
    %217 = math.exp %216 : vector<8x32xf32>
    %cst_61 = arith.constant 1.000000e+00 : f32
    %218 = vector.broadcast %cst_61 : f32 to vector<8x32xf32>
    %219 = arith.addf %218, %217 : vector<8x32xf32>
    %220 = arith.divf %218, %219 : vector<8x32xf32>
    %221 = vector.extract_strided_slice %214 {offsets = [0, 32], sizes = [8, 32], strides = [1, 1]} : vector<8x128xf32> to vector<8x32xf32>
    %222 = arith.negf %221 : vector<8x32xf32>
    %223 = math.exp %222 : vector<8x32xf32>
    %cst_62 = arith.constant 1.000000e+00 : f32
    %224 = vector.broadcast %cst_62 : f32 to vector<8x32xf32>
    %225 = arith.addf %224, %223 : vector<8x32xf32>
    %226 = arith.divf %224, %225 : vector<8x32xf32>
    %227 = vector.extract_strided_slice %214 {offsets = [0, 64], sizes = [8, 32], strides = [1, 1]} : vector<8x128xf32> to vector<8x32xf32>
    %228 = math.tanh %227 : vector<8x32xf32>
    %229 = vector.extract_strided_slice %214 {offsets = [0, 96], sizes = [8, 32], strides = [1, 1]} : vector<8x128xf32> to vector<8x32xf32>
    %230 = arith.negf %229 : vector<8x32xf32>
    %231 = math.exp %230 : vector<8x32xf32>
    %cst_63 = arith.constant 1.000000e+00 : f32
    %232 = vector.broadcast %cst_63 : f32 to vector<8x32xf32>
    %233 = arith.addf %232, %231 : vector<8x32xf32>
    %234 = arith.divf %232, %233 : vector<8x32xf32>
    %235 = arith.mulf %226, %203 : vector<8x32xf32>
    %236 = arith.mulf %220, %228 : vector<8x32xf32>
    %237 = arith.addf %235, %236 : vector<8x32xf32>
    %238 = math.tanh %237 : vector<8x32xf32>
    %239 = arith.mulf %234, %238 : vector<8x32xf32>
    %c7_i32 = arith.constant 7 : i32
    %240 = arith.index_cast %c7_i32 : i32 to index
    %c0_64 = arith.constant 0 : index
    %c0_65 = arith.constant 0 : index
    %241 = vector.load %arg2[%240, %c0_64, %c0_65] : memref<8x8x8xf32, #tpu.memory_space<vmem>>, vector<1x8x8xf32>
    %242 = vector.shape_cast %241 : vector<1x8x8xf32> to vector<8x8xf32>
    %cst_66 = arith.constant dense<0.000000e+00> : vector<8x32xf32>
    %243 = tpu.matmul %242, %239, %cst_66 {dimension_numbers = #tpu.dot_dimension_numbers<[1], [0], [0], [1], [0, 0, 1, 1], [], []>} : vector<8x8xf32>, vector<8x32xf32>, vector<8x32xf32> -> vector<8x32xf32>
    %244 = arith.index_cast %c7_i32 : i32 to index
    %c0_67 = arith.constant 0 : index
    %c0_68 = arith.constant 0 : index
    %245 = vector.load %arg1[%244, %c0_67, %c0_68] : memref<8x8x128xf32, #tpu.memory_space<vmem>>, vector<1x8x128xf32>
    %246 = vector.shape_cast %245 : vector<1x8x128xf32> to vector<8x128xf32>
    %cst_69 = arith.constant dense<0.000000e+00> : vector<8x128xf32>
    %247 = tpu.matmul %243, %0, %cst_69 {dimension_numbers = #tpu.dot_dimension_numbers<[1], [0], [0], [1], [0, 0, 1, 1], [], []>} : vector<8x32xf32>, vector<32x128xf32>, vector<8x128xf32> -> vector<8x128xf32>
    %248 = arith.addf %246, %247 : vector<8x128xf32>
    %249 = vector.extract_strided_slice %248 {offsets = [0, 0], sizes = [8, 32], strides = [1, 1]} : vector<8x128xf32> to vector<8x32xf32>
    %250 = arith.negf %249 : vector<8x32xf32>
    %251 = math.exp %250 : vector<8x32xf32>
    %cst_70 = arith.constant 1.000000e+00 : f32
    %252 = vector.broadcast %cst_70 : f32 to vector<8x32xf32>
    %253 = arith.addf %252, %251 : vector<8x32xf32>
    %254 = arith.divf %252, %253 : vector<8x32xf32>
    %255 = vector.extract_strided_slice %248 {offsets = [0, 32], sizes = [8, 32], strides = [1, 1]} : vector<8x128xf32> to vector<8x32xf32>
    %256 = arith.negf %255 : vector<8x32xf32>
    %257 = math.exp %256 : vector<8x32xf32>
    %cst_71 = arith.constant 1.000000e+00 : f32
    %258 = vector.broadcast %cst_71 : f32 to vector<8x32xf32>
    %259 = arith.addf %258, %257 : vector<8x32xf32>
    %260 = arith.divf %258, %259 : vector<8x32xf32>
    %261 = vector.extract_strided_slice %248 {offsets = [0, 64], sizes = [8, 32], strides = [1, 1]} : vector<8x128xf32> to vector<8x32xf32>
    %262 = math.tanh %261 : vector<8x32xf32>
    %263 = vector.extract_strided_slice %248 {offsets = [0, 96], sizes = [8, 32], strides = [1, 1]} : vector<8x128xf32> to vector<8x32xf32>
    %264 = arith.negf %263 : vector<8x32xf32>
    %265 = math.exp %264 : vector<8x32xf32>
    %cst_72 = arith.constant 1.000000e+00 : f32
    %266 = vector.broadcast %cst_72 : f32 to vector<8x32xf32>
    %267 = arith.addf %266, %265 : vector<8x32xf32>
    %268 = arith.divf %266, %267 : vector<8x32xf32>
    %269 = arith.mulf %260, %237 : vector<8x32xf32>
    %270 = arith.mulf %254, %262 : vector<8x32xf32>
    %271 = arith.addf %269, %270 : vector<8x32xf32>
    %272 = math.tanh %271 : vector<8x32xf32>
    %273 = arith.mulf %268, %272 : vector<8x32xf32>
    %c8_i32 = arith.constant 8 : i32
    %c0_73 = arith.constant 0 : index
    %c0_74 = arith.constant 0 : index
    %274 = vector.load %arg5[%c0_73, %c0_74] : memref<2x128xf32, #tpu.memory_space<vmem>>, vector<2x128xf32>
    %c0_75 = arith.constant 0 : index
    %c0_76 = arith.constant 0 : index
    %275 = vector.load %arg6[%c0_75, %c0_76] : memref<1x128xf32, #tpu.memory_space<vmem>>, vector<1x128xf32>
    %c0_77 = arith.constant 0 : index
    %c0_78 = arith.constant 0 : index
    %276 = vector.load %arg7[%c0_77, %c0_78] : memref<32x128xf32, #tpu.memory_space<vmem>>, vector<32x128xf32>
    %c0_79 = arith.constant 0 : index
    %c0_80 = arith.constant 0 : index
    %277 = vector.load %arg8[%c0_79, %c0_80] : memref<32x2xf32, #tpu.memory_space<vmem>>, vector<32x2xf32>
    %c0_81 = arith.constant 0 : index
    %c0_82 = arith.constant 0 : index
    %278 = vector.load %arg9[%c0_81, %c0_82] : memref<1x2xf32, #tpu.memory_space<vmem>>, vector<1x2xf32>
    %c0_83 = arith.constant 0 : index
    %c0_84 = arith.constant 0 : index
    %279 = vector.load %arg10[%c0_83, %c0_84] : memref<1x144xf32, #tpu.memory_space<vmem>>, vector<1x144xf32>
    %280 = vector.shape_cast %279 : vector<1x144xf32> to vector<1x1x144xf32>
    %c0_85 = arith.constant 0 : index
    %c0_86 = arith.constant 0 : index
    %281 = vector.load %arg11[%c0_85, %c0_86] : memref<8x8xf32, #tpu.memory_space<vmem>>, vector<8x8xf32>
    %cst_87 = arith.constant 0.000000e+00 : f32
    %282 = vector.broadcast %cst_87 : f32 to vector<8x32xf32>
    %c0_88 = arith.constant 0 : index
    %c0_89 = arith.constant 0 : index
    %283 = vector.load %arg4[%c0_88, %c0_89] : memref<8x2xf32, #tpu.memory_space<vmem>>, vector<8x2xf32>
    %c7 = arith.constant 7 : index
    %c0_90 = arith.constant 0 : index
    %c0_91 = arith.constant 0 : index
    %284 = vector.load %arg2[%c7, %c0_90, %c0_91] : memref<8x8x8xf32, #tpu.memory_space<vmem>>, vector<1x8x8xf32>
    %285 = vector.shape_cast %284 : vector<1x8x8xf32> to vector<8x8xf32>
    %cst_92 = arith.constant dense<0.000000e+00> : vector<8x32xf32>
    %286 = tpu.matmul %285, %273, %cst_92 {dimension_numbers = #tpu.dot_dimension_numbers<[1], [0], [0], [1], [0, 0, 1, 1], [], []>} : vector<8x8xf32>, vector<8x32xf32>, vector<8x32xf32> -> vector<8x32xf32>
    %cst_93 = arith.constant dense<0.000000e+00> : vector<8x128xf32>
    %287 = tpu.matmul %283, %274, %cst_93 {dimension_numbers = #tpu.dot_dimension_numbers<[1], [0], [0], [1], [0, 0, 1, 1], [], []>} : vector<8x2xf32>, vector<2x128xf32>, vector<8x128xf32> -> vector<8x128xf32>
    %288 = vector.broadcast %275 : vector<1x128xf32> to vector<8x128xf32>
    %289 = arith.addf %287, %288 : vector<8x128xf32>
    %cst_94 = arith.constant dense<0.000000e+00> : vector<8x128xf32>
    %290 = tpu.matmul %286, %276, %cst_94 {dimension_numbers = #tpu.dot_dimension_numbers<[1], [0], [0], [1], [0, 0, 1, 1], [], []>} : vector<8x32xf32>, vector<32x128xf32>, vector<8x128xf32> -> vector<8x128xf32>
    %291 = arith.addf %289, %290 : vector<8x128xf32>
    %292 = vector.extract_strided_slice %291 {offsets = [0, 0], sizes = [8, 32], strides = [1, 1]} : vector<8x128xf32> to vector<8x32xf32>
    %293 = arith.negf %292 : vector<8x32xf32>
    %294 = math.exp %293 : vector<8x32xf32>
    %cst_95 = arith.constant 1.000000e+00 : f32
    %295 = vector.broadcast %cst_95 : f32 to vector<8x32xf32>
    %296 = arith.addf %295, %294 : vector<8x32xf32>
    %297 = arith.divf %295, %296 : vector<8x32xf32>
    %298 = vector.extract_strided_slice %291 {offsets = [0, 32], sizes = [8, 32], strides = [1, 1]} : vector<8x128xf32> to vector<8x32xf32>
    %299 = arith.negf %298 : vector<8x32xf32>
    %300 = math.exp %299 : vector<8x32xf32>
    %cst_96 = arith.constant 1.000000e+00 : f32
    %301 = vector.broadcast %cst_96 : f32 to vector<8x32xf32>
    %302 = arith.addf %301, %300 : vector<8x32xf32>
    %303 = arith.divf %301, %302 : vector<8x32xf32>
    %304 = vector.extract_strided_slice %291 {offsets = [0, 64], sizes = [8, 32], strides = [1, 1]} : vector<8x128xf32> to vector<8x32xf32>
    %305 = math.tanh %304 : vector<8x32xf32>
    %306 = vector.extract_strided_slice %291 {offsets = [0, 96], sizes = [8, 32], strides = [1, 1]} : vector<8x128xf32> to vector<8x32xf32>
    %307 = arith.negf %306 : vector<8x32xf32>
    %308 = math.exp %307 : vector<8x32xf32>
    %cst_97 = arith.constant 1.000000e+00 : f32
    %309 = vector.broadcast %cst_97 : f32 to vector<8x32xf32>
    %310 = arith.addf %309, %308 : vector<8x32xf32>
    %311 = arith.divf %309, %310 : vector<8x32xf32>
    %312 = arith.mulf %303, %282 : vector<8x32xf32>
    %313 = arith.mulf %297, %305 : vector<8x32xf32>
    %314 = arith.addf %312, %313 : vector<8x32xf32>
    %315 = math.tanh %314 : vector<8x32xf32>
    %316 = arith.mulf %311, %315 : vector<8x32xf32>
    %cst_98 = arith.constant dense<0.000000e+00> : vector<8x2xf32>
    %317 = tpu.matmul %316, %277, %cst_98 {dimension_numbers = #tpu.dot_dimension_numbers<[1], [0], [0], [1], [0, 0, 1, 1], [], []>} : vector<8x32xf32>, vector<32x2xf32>, vector<8x2xf32> -> vector<8x2xf32>
    %318 = vector.broadcast %278 : vector<1x2xf32> to vector<8x2xf32>
    %319 = arith.addf %317, %318 : vector<8x2xf32>
    %320 = math.tanh %319 : vector<8x2xf32>
    %c0_99 = arith.constant 0 : index
    %c0_100 = arith.constant 0 : index
    %321 = vector.load %arg12[%c0_99, %c0_100] : memref<8x8xf32, #tpu.memory_space<vmem>>, vector<8x2xf32>
    tpu.vector_store %arg12[%c0_99, %c0_100], %320 {strides = array<i32>} : memref<8x8xf32, #tpu.memory_space<vmem>>, vector<8x2xf32>,
    %322 = vector.extract_strided_slice %320 {offsets = [0, 0], sizes = [8, 1], strides = [1, 1]} : vector<8x2xf32> to vector<8x1xf32>
    %323 = vector.extract_strided_slice %320 {offsets = [0, 1], sizes = [8, 1], strides = [1, 1]} : vector<8x2xf32> to vector<8x1xf32>
    %324 = vector.extract_strided_slice %283 {offsets = [0, 1], sizes = [8, 1], strides = [1, 1]} : vector<8x2xf32> to vector<8x1xf32>
    %325 = arith.subf %323, %324 : vector<8x1xf32>
    %326 = vector.extract_strided_slice %283 {offsets = [0, 0], sizes = [8, 1], strides = [1, 1]} : vector<8x2xf32> to vector<8x1xf32>
    %327 = arith.subf %322, %326 : vector<8x1xf32>
    %328 = math.absf %327 : vector<8x1xf32>
    %329 = math.absf %325 : vector<8x1xf32>
    %330 = arith.maximumf %328, %329 : vector<8x1xf32>
    %331 = arith.minimumf %328, %329 : vector<8x1xf32>
    %cst_101 = arith.constant 1.000000e-30 : f32
    %332 = vector.broadcast %cst_101 : f32 to vector<8x1xf32>
    %333 = arith.addf %330, %332 : vector<8x1xf32>
    %334 = arith.divf %331, %333 : vector<8x1xf32>
    %335 = arith.mulf %334, %334 : vector<8x1xf32>
    %cst_102 = arith.constant 2.083510e-02 : f32
    %336 = vector.broadcast %cst_102 : f32 to vector<8x1xf32>
    %337 = arith.mulf %336, %335 : vector<8x1xf32>
    %cst_103 = arith.constant 8.513300e-02 : f32
    %338 = vector.broadcast %cst_103 : f32 to vector<8x1xf32>
    %339 = arith.subf %337, %338 : vector<8x1xf32>
    %340 = arith.mulf %339, %335 : vector<8x1xf32>
    %cst_104 = arith.constant 1.801410e-01 : f32
    %341 = vector.broadcast %cst_104 : f32 to vector<8x1xf32>
    %342 = arith.addf %340, %341 : vector<8x1xf32>
    %343 = arith.mulf %342, %335 : vector<8x1xf32>
    %cst_105 = arith.constant 0.330299497 : f32
    %344 = vector.broadcast %cst_105 : f32 to vector<8x1xf32>
    %345 = arith.subf %343, %344 : vector<8x1xf32>
    %346 = arith.mulf %345, %335 : vector<8x1xf32>
    %cst_106 = arith.constant 9.998660e-01 : f32
    %347 = vector.broadcast %cst_106 : f32 to vector<8x1xf32>
    %348 = arith.addf %346, %347 : vector<8x1xf32>
    %349 = arith.mulf %348, %334 : vector<8x1xf32>
    %350 = arith.cmpf ogt, %329, %328 : vector<8x1xf32>
    %cst_107 = arith.constant 1.57079637 : f32
    %351 = vector.broadcast %cst_107 : f32 to vector<8x1xf32>
    %352 = arith.subf %351, %349 : vector<8x1xf32>
    %353 = arith.select %350, %352, %349 : vector<8x1xi1>, vector<8x1xf32>
    %cst_108 = arith.constant 0.000000e+00 : f32
    %354 = vector.broadcast %cst_108 : f32 to vector<8x1xf32>
    %355 = arith.cmpf olt, %327, %354 : vector<8x1xf32>
    %cst_109 = arith.constant 3.14159274 : f32
    %356 = vector.broadcast %cst_109 : f32 to vector<8x1xf32>
    %357 = arith.subf %356, %353 : vector<8x1xf32>
    %358 = arith.select %355, %357, %353 : vector<8x1xi1>, vector<8x1xf32>
    %cst_110 = arith.constant 0.000000e+00 : f32
    %359 = vector.broadcast %cst_110 : f32 to vector<8x1xf32>
    %360 = arith.cmpf olt, %325, %359 : vector<8x1xf32>
    %cst_111 = arith.constant 0.000000e+00 : f32
    %361 = vector.broadcast %cst_111 : f32 to vector<8x1xf32>
    %362 = arith.subf %361, %358 : vector<8x1xf32>
    %363 = arith.select %360, %362, %358 : vector<8x1xi1>, vector<8x1xf32>
    %cst_112 = arith.constant 57.2957802 : f32
    %364 = vector.broadcast %cst_112 : f32 to vector<8x1xf32>
    %365 = arith.mulf %364, %363 : vector<8x1xf32>
    %cst_113 = arith.constant 0.00277777785 : f32
    %366 = vector.broadcast %cst_113 : f32 to vector<8x1xf32>
    %367 = arith.mulf %365, %366 : vector<8x1xf32>
    %368 = math.floor %367 : vector<8x1xf32>
    %cst_114 = arith.constant 3.600000e+02 : f32
    %369 = vector.broadcast %cst_114 : f32 to vector<8x1xf32>
    %370 = arith.mulf %369, %368 : vector<8x1xf32>
    %371 = arith.subf %365, %370 : vector<8x1xf32>
    %372 = tpu.transpose %320, [1, 0] : vector<8x2xf32> -> vector<2x8xf32>
    %373 = tpu.transpose %371, [1, 0] : vector<8x1xf32> -> vector<1x8xf32>
    %374 = vector.extract_strided_slice %372 {offsets = [0, 0], sizes = [1, 8], strides = [1, 1]} : vector<2x8xf32> to vector<1x8xf32>
    %375 = vector.broadcast %374 : vector<1x8xf32> to vector<8x8xf32>
    %376 = vector.broadcast %322 : vector<8x1xf32> to vector<8x8xf32>
    %377 = arith.subf %375, %376 : vector<8x8xf32>
    %378 = vector.extract_strided_slice %372 {offsets = [1, 0], sizes = [1, 8], strides = [1, 1]} : vector<2x8xf32> to vector<1x8xf32>
    %379 = vector.broadcast %378 : vector<1x8xf32> to vector<8x8xf32>
    %380 = vector.broadcast %323 : vector<8x1xf32> to vector<8x8xf32>
    %381 = arith.subf %379, %380 : vector<8x8xf32>
    %382 = arith.mulf %377, %377 : vector<8x8xf32>
    %383 = arith.mulf %381, %381 : vector<8x8xf32>
    %384 = arith.addf %382, %383 : vector<8x8xf32>
    %cst_115 = arith.constant 9.99999996E-13 : f32
    %385 = vector.broadcast %cst_115 : f32 to vector<8x8xf32>
    %386 = arith.addf %384, %385 : vector<8x8xf32>
    %387 = math.sqrt %386 : vector<8x8xf32>
    %388 = math.absf %377 : vector<8x8xf32>
    %389 = math.absf %381 : vector<8x8xf32>
    %390 = arith.maximumf %388, %389 : vector<8x8xf32>
    %391 = arith.minimumf %388, %389 : vector<8x8xf32>
    %cst_116 = arith.constant 1.000000e-30 : f32
    %392 = vector.broadcast %cst_116 : f32 to vector<8x8xf32>
    %393 = arith.addf %390, %392 : vector<8x8xf32>
    %394 = arith.divf %391, %393 : vector<8x8xf32>
    %395 = arith.mulf %394, %394 : vector<8x8xf32>
    %cst_117 = arith.constant 2.083510e-02 : f32
    %396 = vector.broadcast %cst_117 : f32 to vector<8x8xf32>
    %397 = arith.mulf %396, %395 : vector<8x8xf32>
    %cst_118 = arith.constant 8.513300e-02 : f32
    %398 = vector.broadcast %cst_118 : f32 to vector<8x8xf32>
    %399 = arith.subf %397, %398 : vector<8x8xf32>
    %400 = arith.mulf %399, %395 : vector<8x8xf32>
    %cst_119 = arith.constant 1.801410e-01 : f32
    %401 = vector.broadcast %cst_119 : f32 to vector<8x8xf32>
    %402 = arith.addf %400, %401 : vector<8x8xf32>
    %403 = arith.mulf %402, %395 : vector<8x8xf32>
    %cst_120 = arith.constant 0.330299497 : f32
    %404 = vector.broadcast %cst_120 : f32 to vector<8x8xf32>
    %405 = arith.subf %403, %404 : vector<8x8xf32>
    %406 = arith.mulf %405, %395 : vector<8x8xf32>
    %cst_121 = arith.constant 9.998660e-01 : f32
    %407 = vector.broadcast %cst_121 : f32 to vector<8x8xf32>
    %408 = arith.addf %406, %407 : vector<8x8xf32>
    %409 = arith.mulf %408, %394 : vector<8x8xf32>
    %410 = arith.cmpf ogt, %389, %388 : vector<8x8xf32>
    %cst_122 = arith.constant 1.57079637 : f32
    %411 = vector.broadcast %cst_122 : f32 to vector<8x8xf32>
    %412 = arith.subf %411, %409 : vector<8x8xf32>
    %413 = arith.select %410, %412, %409 : vector<8x8xi1>, vector<8x8xf32>
    %cst_123 = arith.constant 0.000000e+00 : f32
    %414 = vector.broadcast %cst_123 : f32 to vector<8x8xf32>
    %415 = arith.cmpf olt, %377, %414 : vector<8x8xf32>
    %cst_124 = arith.constant 3.14159274 : f32
    %416 = vector.broadcast %cst_124 : f32 to vector<8x8xf32>
    %417 = arith.subf %416, %413 : vector<8x8xf32>
    %418 = arith.select %415, %417, %413 : vector<8x8xi1>, vector<8x8xf32>
    %cst_125 = arith.constant 0.000000e+00 : f32
    %419 = vector.broadcast %cst_125 : f32 to vector<8x8xf32>
    %420 = arith.cmpf olt, %381, %419 : vector<8x8xf32>
    %cst_126 = arith.constant 0.000000e+00 : f32
    %421 = vector.broadcast %cst_126 : f32 to vector<8x8xf32>
    %422 = arith.subf %421, %418 : vector<8x8xf32>
    %423 = arith.select %420, %422, %418 : vector<8x8xi1>, vector<8x8xf32>
    %cst_127 = arith.constant 57.2957802 : f32
    %424 = vector.broadcast %cst_127 : f32 to vector<8x8xf32>
    %425 = arith.mulf %424, %423 : vector<8x8xf32>
    %cst_128 = arith.constant 0.00277777785 : f32
    %426 = vector.broadcast %cst_128 : f32 to vector<8x8xf32>
    %427 = arith.mulf %425, %426 : vector<8x8xf32>
    %428 = math.floor %427 : vector<8x8xf32>
    %cst_129 = arith.constant 3.600000e+02 : f32
    %429 = vector.broadcast %cst_129 : f32 to vector<8x8xf32>
    %430 = arith.mulf %429, %428 : vector<8x8xf32>
    %431 = arith.subf %425, %430 : vector<8x8xf32>
    %432 = vector.broadcast %371 : vector<8x1xf32> to vector<8x8xf32>
    %433 = arith.subf %431, %432 : vector<8x8xf32>
    %cst_130 = arith.constant 0.00277777785 : f32
    %434 = vector.broadcast %cst_130 : f32 to vector<8x8xf32>
    %435 = arith.mulf %433, %434 : vector<8x8xf32>
    %436 = math.floor %435 : vector<8x8xf32>
    %cst_131 = arith.constant 3.600000e+02 : f32
    %437 = vector.broadcast %cst_131 : f32 to vector<8x8xf32>
    %438 = arith.mulf %437, %436 : vector<8x8xf32>
    %439 = arith.subf %433, %438 : vector<8x8xf32>
    %440 = vector.broadcast %373 : vector<1x8xf32> to vector<8x8xf32>
    %441 = vector.broadcast %371 : vector<8x1xf32> to vector<8x8xf32>
    %442 = arith.subf %440, %441 : vector<8x8xf32>
    %cst_132 = arith.constant 0.00277777785 : f32
    %443 = vector.broadcast %cst_132 : f32 to vector<8x8xf32>
    %444 = arith.mulf %442, %443 : vector<8x8xf32>
    %445 = math.floor %444 : vector<8x8xf32>
    %cst_133 = arith.constant 3.600000e+02 : f32
    %446 = vector.broadcast %cst_133 : f32 to vector<8x8xf32>
    %447 = arith.mulf %446, %445 : vector<8x8xf32>
    %448 = arith.subf %442, %447 : vector<8x8xf32>
    %cst_134 = arith.constant 0.0333333351 : f32
    %449 = vector.broadcast %cst_134 : f32 to vector<8x8xf32>
    %450 = arith.mulf %448, %449 : vector<8x8xf32>
    %451 = math.floor %450 : vector<8x8xf32>
    %cst_135 = arith.constant 0.000000e+00 : f32
    %cst_136 = arith.constant 1.100000e+01 : f32
    %452 = vector.broadcast %cst_135 : f32 to vector<8x8xf32>
    %453 = arith.maximumf %452, %451 : vector<8x8xf32>
    %454 = vector.broadcast %cst_136 : f32 to vector<8x8xf32>
    %455 = arith.minimumf %454, %453 : vector<8x8xf32>
    %cst_137 = arith.constant 0.0333333351 : f32
    %456 = vector.broadcast %cst_137 : f32 to vector<8x8xf32>
    %457 = arith.mulf %439, %456 : vector<8x8xf32>
    %458 = math.floor %457 : vector<8x8xf32>
    %cst_138 = arith.constant 0.000000e+00 : f32
    %cst_139 = arith.constant 1.100000e+01 : f32
    %459 = vector.broadcast %cst_138 : f32 to vector<8x8xf32>
    %460 = arith.maximumf %459, %458 : vector<8x8xf32>
    %461 = vector.broadcast %cst_139 : f32 to vector<8x8xf32>
    %462 = arith.minimumf %461, %460 : vector<8x8xf32>
    %cst_140 = arith.constant 1.200000e+01 : f32
    %463 = vector.broadcast %cst_140 : f32 to vector<8x8xf32>
    %464 = arith.mulf %455, %463 : vector<8x8xf32>
    %465 = arith.addf %464, %462 : vector<8x8xf32>
    %466 = arith.fptosi %465 : vector<8x8xf32> to vector<8x8xi32>
    %467 = tpu.iota {dimensions = array<i32: 2>} : vector<8x8x144xi32>
    %468 = vector.shape_cast %466 : vector<8x8xi32> to vector<8x8x1xi32>
    %469 = vector.broadcast %468 : vector<8x8x1xi32> to vector<8x8x144xi32>
    %470 = arith.cmpi eq, %467, %469 : vector<8x8x144xi32>
    %cst_141 = arith.constant 0.000000e+00 : f32
    %471 = vector.shape_cast %280 : vector<1x1x144xf32> to vector<1x1x144xf32>
    %472 = vector.broadcast %471 : vector<1x1x144xf32> to vector<8x8x144xf32>
    %473 = vector.broadcast %cst_141 : f32 to vector<8x8x144xf32>
    %474 = arith.select %470, %472, %473 : vector<8x8x144xi1>, vector<8x8x144xf32>
    %cst_142 = arith.constant dense<0.000000e+00> : vector<8x8xf32>
    %475 = vector.multi_reduction <add>, %474, %cst_142 [2] : vector<8x8x144xf32> to vector<8x8xf32>
    %476 = arith.subf %475, %387 : vector<8x8xf32>
    %cst_143 = arith.constant 0.000000e+00 : f32
    %477 = vector.broadcast %cst_143 : f32 to vector<8x8xf32>
    %478 = arith.maximumf %476, %477 : vector<8x8xf32>
    %479 = arith.mulf %478, %281 : vector<8x8xf32>
    %cst_144 = arith.constant dense<0.000000e+00> : vector<8xf32>
    %480 = vector.multi_reduction <add>, %479, %cst_144 [1] : vector<8x8xf32> to vector<8xf32>
    %481 = vector.shape_cast %480 : vector<8xf32> to vector<8x1xf32>
    %cst_145 = arith.constant 9.99999971E-10 : f32
    %482 = vector.broadcast %cst_145 : f32 to vector<8x1xf32>
    %483 = arith.addf %481, %482 : vector<8x1xf32>
    %484 = vector.broadcast %483 : vector<8x1xf32> to vector<8x8xf32>
    %485 = arith.divf %479, %484 : vector<8x8xf32>
    %cst_146 = arith.constant dense<0.000000e+00> : vector<8x32xf32>
    %486 = tpu.matmul %485, %316, %cst_146 {dimension_numbers = #tpu.dot_dimension_numbers<[1], [0], [0], [1], [0, 0, 1, 1], [], []>} : vector<8x8xf32>, vector<8x32xf32>, vector<8x32xf32> -> vector<8x32xf32>
    %cst_147 = arith.constant dense<0.000000e+00> : vector<8x128xf32>
    %487 = tpu.matmul %320, %274, %cst_147 {dimension_numbers = #tpu.dot_dimension_numbers<[1], [0], [0], [1], [0, 0, 1, 1], [], []>} : vector<8x2xf32>, vector<2x128xf32>, vector<8x128xf32> -> vector<8x128xf32>
    %488 = vector.broadcast %275 : vector<1x128xf32> to vector<8x128xf32>
    %489 = arith.addf %487, %488 : vector<8x128xf32>
    %cst_148 = arith.constant dense<0.000000e+00> : vector<8x128xf32>
    %490 = tpu.matmul %486, %276, %cst_148 {dimension_numbers = #tpu.dot_dimension_numbers<[1], [0], [0], [1], [0, 0, 1, 1], [], []>} : vector<8x32xf32>, vector<32x128xf32>, vector<8x128xf32> -> vector<8x128xf32>
    %491 = arith.addf %489, %490 : vector<8x128xf32>
    %492 = vector.extract_strided_slice %491 {offsets = [0, 0], sizes = [8, 32], strides = [1, 1]} : vector<8x128xf32> to vector<8x32xf32>
    %493 = arith.negf %492 : vector<8x32xf32>
    %494 = math.exp %493 : vector<8x32xf32>
    %cst_149 = arith.constant 1.000000e+00 : f32
    %495 = vector.broadcast %cst_149 : f32 to vector<8x32xf32>
    %496 = arith.addf %495, %494 : vector<8x32xf32>
    %497 = arith.divf %495, %496 : vector<8x32xf32>
    %498 = vector.extract_strided_slice %491 {offsets = [0, 32], sizes = [8, 32], strides = [1, 1]} : vector<8x128xf32> to vector<8x32xf32>
    %499 = arith.negf %498 : vector<8x32xf32>
    %500 = math.exp %499 : vector<8x32xf32>
    %cst_150 = arith.constant 1.000000e+00 : f32
    %501 = vector.broadcast %cst_150 : f32 to vector<8x32xf32>
    %502 = arith.addf %501, %500 : vector<8x32xf32>
    %503 = arith.divf %501, %502 : vector<8x32xf32>
    %504 = vector.extract_strided_slice %491 {offsets = [0, 64], sizes = [8, 32], strides = [1, 1]} : vector<8x128xf32> to vector<8x32xf32>
    %505 = math.tanh %504 : vector<8x32xf32>
    %506 = vector.extract_strided_slice %491 {offsets = [0, 96], sizes = [8, 32], strides = [1, 1]} : vector<8x128xf32> to vector<8x32xf32>
    %507 = arith.negf %506 : vector<8x32xf32>
    %508 = math.exp %507 : vector<8x32xf32>
    %cst_151 = arith.constant 1.000000e+00 : f32
    %509 = vector.broadcast %cst_151 : f32 to vector<8x32xf32>
    %510 = arith.addf %509, %508 : vector<8x32xf32>
    %511 = arith.divf %509, %510 : vector<8x32xf32>
    %512 = arith.mulf %503, %314 : vector<8x32xf32>
    %513 = arith.mulf %497, %505 : vector<8x32xf32>
    %514 = arith.addf %512, %513 : vector<8x32xf32>
    %515 = math.tanh %514 : vector<8x32xf32>
    %516 = arith.mulf %511, %515 : vector<8x32xf32>
    %cst_152 = arith.constant dense<0.000000e+00> : vector<8x2xf32>
    %517 = tpu.matmul %516, %277, %cst_152 {dimension_numbers = #tpu.dot_dimension_numbers<[1], [0], [0], [1], [0, 0, 1, 1], [], []>} : vector<8x32xf32>, vector<32x2xf32>, vector<8x2xf32> -> vector<8x2xf32>
    %518 = vector.broadcast %278 : vector<1x2xf32> to vector<8x2xf32>
    %519 = arith.addf %517, %518 : vector<8x2xf32>
    %520 = math.tanh %519 : vector<8x2xf32>
    %c0_153 = arith.constant 0 : index
    %c2 = arith.constant 2 : index
    %521 = vector.load %arg12[%c0_153, %c2] : memref<8x8xf32, #tpu.memory_space<vmem>>, vector<8x2xf32>
    tpu.vector_store %arg12[%c0_153, %c2], %520 {strides = array<i32>} : memref<8x8xf32, #tpu.memory_space<vmem>>, vector<8x2xf32>,
    %522 = vector.extract_strided_slice %520 {offsets = [0, 0], sizes = [8, 1], strides = [1, 1]} : vector<8x2xf32> to vector<8x1xf32>
    %523 = vector.extract_strided_slice %520 {offsets = [0, 1], sizes = [8, 1], strides = [1, 1]} : vector<8x2xf32> to vector<8x1xf32>
    %524 = vector.extract_strided_slice %320 {offsets = [0, 1], sizes = [8, 1], strides = [1, 1]} : vector<8x2xf32> to vector<8x1xf32>
    %525 = arith.subf %523, %524 : vector<8x1xf32>
    %526 = vector.extract_strided_slice %320 {offsets = [0, 0], sizes = [8, 1], strides = [1, 1]} : vector<8x2xf32> to vector<8x1xf32>
    %527 = arith.subf %522, %526 : vector<8x1xf32>
    %528 = math.absf %527 : vector<8x1xf32>
    %529 = math.absf %525 : vector<8x1xf32>
    %530 = arith.maximumf %528, %529 : vector<8x1xf32>
    %531 = arith.minimumf %528, %529 : vector<8x1xf32>
    %cst_154 = arith.constant 1.000000e-30 : f32
    %532 = vector.broadcast %cst_154 : f32 to vector<8x1xf32>
    %533 = arith.addf %530, %532 : vector<8x1xf32>
    %534 = arith.divf %531, %533 : vector<8x1xf32>
    %535 = arith.mulf %534, %534 : vector<8x1xf32>
    %cst_155 = arith.constant 2.083510e-02 : f32
    %536 = vector.broadcast %cst_155 : f32 to vector<8x1xf32>
    %537 = arith.mulf %536, %535 : vector<8x1xf32>
    %cst_156 = arith.constant 8.513300e-02 : f32
    %538 = vector.broadcast %cst_156 : f32 to vector<8x1xf32>
    %539 = arith.subf %537, %538 : vector<8x1xf32>
    %540 = arith.mulf %539, %535 : vector<8x1xf32>
    %cst_157 = arith.constant 1.801410e-01 : f32
    %541 = vector.broadcast %cst_157 : f32 to vector<8x1xf32>
    %542 = arith.addf %540, %541 : vector<8x1xf32>
    %543 = arith.mulf %542, %535 : vector<8x1xf32>
    %cst_158 = arith.constant 0.330299497 : f32
    %544 = vector.broadcast %cst_158 : f32 to vector<8x1xf32>
    %545 = arith.subf %543, %544 : vector<8x1xf32>
    %546 = arith.mulf %545, %535 : vector<8x1xf32>
    %cst_159 = arith.constant 9.998660e-01 : f32
    %547 = vector.broadcast %cst_159 : f32 to vector<8x1xf32>
    %548 = arith.addf %546, %547 : vector<8x1xf32>
    %549 = arith.mulf %548, %534 : vector<8x1xf32>
    %550 = arith.cmpf ogt, %529, %528 : vector<8x1xf32>
    %cst_160 = arith.constant 1.57079637 : f32
    %551 = vector.broadcast %cst_160 : f32 to vector<8x1xf32>
    %552 = arith.subf %551, %549 : vector<8x1xf32>
    %553 = arith.select %550, %552, %549 : vector<8x1xi1>, vector<8x1xf32>
    %cst_161 = arith.constant 0.000000e+00 : f32
    %554 = vector.broadcast %cst_161 : f32 to vector<8x1xf32>
    %555 = arith.cmpf olt, %527, %554 : vector<8x1xf32>
    %cst_162 = arith.constant 3.14159274 : f32
    %556 = vector.broadcast %cst_162 : f32 to vector<8x1xf32>
    %557 = arith.subf %556, %553 : vector<8x1xf32>
    %558 = arith.select %555, %557, %553 : vector<8x1xi1>, vector<8x1xf32>
    %cst_163 = arith.constant 0.000000e+00 : f32
    %559 = vector.broadcast %cst_163 : f32 to vector<8x1xf32>
    %560 = arith.cmpf olt, %525, %559 : vector<8x1xf32>
    %cst_164 = arith.constant 0.000000e+00 : f32
    %561 = vector.broadcast %cst_164 : f32 to vector<8x1xf32>
    %562 = arith.subf %561, %558 : vector<8x1xf32>
    %563 = arith.select %560, %562, %558 : vector<8x1xi1>, vector<8x1xf32>
    %cst_165 = arith.constant 57.2957802 : f32
    %564 = vector.broadcast %cst_165 : f32 to vector<8x1xf32>
    %565 = arith.mulf %564, %563 : vector<8x1xf32>
    %cst_166 = arith.constant 0.00277777785 : f32
    %566 = vector.broadcast %cst_166 : f32 to vector<8x1xf32>
    %567 = arith.mulf %565, %566 : vector<8x1xf32>
    %568 = math.floor %567 : vector<8x1xf32>
    %cst_167 = arith.constant 3.600000e+02 : f32
    %569 = vector.broadcast %cst_167 : f32 to vector<8x1xf32>
    %570 = arith.mulf %569, %568 : vector<8x1xf32>
    %571 = arith.subf %565, %570 : vector<8x1xf32>
    %572 = tpu.transpose %520, [1, 0] : vector<8x2xf32> -> vector<2x8xf32>
    %573 = tpu.transpose %571, [1, 0] : vector<8x1xf32> -> vector<1x8xf32>
    %574 = vector.extract_strided_slice %572 {offsets = [0, 0], sizes = [1, 8], strides = [1, 1]} : vector<2x8xf32> to vector<1x8xf32>
    %575 = vector.broadcast %574 : vector<1x8xf32> to vector<8x8xf32>
    %576 = vector.broadcast %522 : vector<8x1xf32> to vector<8x8xf32>
    %577 = arith.subf %575, %576 : vector<8x8xf32>
    %578 = vector.extract_strided_slice %572 {offsets = [1, 0], sizes = [1, 8], strides = [1, 1]} : vector<2x8xf32> to vector<1x8xf32>
    %579 = vector.broadcast %578 : vector<1x8xf32> to vector<8x8xf32>
    %580 = vector.broadcast %523 : vector<8x1xf32> to vector<8x8xf32>
    %581 = arith.subf %579, %580 : vector<8x8xf32>
    %582 = arith.mulf %577, %577 : vector<8x8xf32>
    %583 = arith.mulf %581, %581 : vector<8x8xf32>
    %584 = arith.addf %582, %583 : vector<8x8xf32>
    %cst_168 = arith.constant 9.99999996E-13 : f32
    %585 = vector.broadcast %cst_168 : f32 to vector<8x8xf32>
    %586 = arith.addf %584, %585 : vector<8x8xf32>
    %587 = math.sqrt %586 : vector<8x8xf32>
    %588 = math.absf %577 : vector<8x8xf32>
    %589 = math.absf %581 : vector<8x8xf32>
    %590 = arith.maximumf %588, %589 : vector<8x8xf32>
    %591 = arith.minimumf %588, %589 : vector<8x8xf32>
    %cst_169 = arith.constant 1.000000e-30 : f32
    %592 = vector.broadcast %cst_169 : f32 to vector<8x8xf32>
    %593 = arith.addf %590, %592 : vector<8x8xf32>
    %594 = arith.divf %591, %593 : vector<8x8xf32>
    %595 = arith.mulf %594, %594 : vector<8x8xf32>
    %cst_170 = arith.constant 2.083510e-02 : f32
    %596 = vector.broadcast %cst_170 : f32 to vector<8x8xf32>
    %597 = arith.mulf %596, %595 : vector<8x8xf32>
    %cst_171 = arith.constant 8.513300e-02 : f32
    %598 = vector.broadcast %cst_171 : f32 to vector<8x8xf32>
    %599 = arith.subf %597, %598 : vector<8x8xf32>
    %600 = arith.mulf %599, %595 : vector<8x8xf32>
    %cst_172 = arith.constant 1.801410e-01 : f32
    %601 = vector.broadcast %cst_172 : f32 to vector<8x8xf32>
    %602 = arith.addf %600, %601 : vector<8x8xf32>
    %603 = arith.mulf %602, %595 : vector<8x8xf32>
    %cst_173 = arith.constant 0.330299497 : f32
    %604 = vector.broadcast %cst_173 : f32 to vector<8x8xf32>
    %605 = arith.subf %603, %604 : vector<8x8xf32>
    %606 = arith.mulf %605, %595 : vector<8x8xf32>
    %cst_174 = arith.constant 9.998660e-01 : f32
    %607 = vector.broadcast %cst_174 : f32 to vector<8x8xf32>
    %608 = arith.addf %606, %607 : vector<8x8xf32>
    %609 = arith.mulf %608, %594 : vector<8x8xf32>
    %610 = arith.cmpf ogt, %589, %588 : vector<8x8xf32>
    %cst_175 = arith.constant 1.57079637 : f32
    %611 = vector.broadcast %cst_175 : f32 to vector<8x8xf32>
    %612 = arith.subf %611, %609 : vector<8x8xf32>
    %613 = arith.select %610, %612, %609 : vector<8x8xi1>, vector<8x8xf32>
    %cst_176 = arith.constant 0.000000e+00 : f32
    %614 = vector.broadcast %cst_176 : f32 to vector<8x8xf32>
    %615 = arith.cmpf olt, %577, %614 : vector<8x8xf32>
    %cst_177 = arith.constant 3.14159274 : f32
    %616 = vector.broadcast %cst_177 : f32 to vector<8x8xf32>
    %617 = arith.subf %616, %613 : vector<8x8xf32>
    %618 = arith.select %615, %617, %613 : vector<8x8xi1>, vector<8x8xf32>
    %cst_178 = arith.constant 0.000000e+00 : f32
    %619 = vector.broadcast %cst_178 : f32 to vector<8x8xf32>
    %620 = arith.cmpf olt, %581, %619 : vector<8x8xf32>
    %cst_179 = arith.constant 0.000000e+00 : f32
    %621 = vector.broadcast %cst_179 : f32 to vector<8x8xf32>
    %622 = arith.subf %621, %618 : vector<8x8xf32>
    %623 = arith.select %620, %622, %618 : vector<8x8xi1>, vector<8x8xf32>
    %cst_180 = arith.constant 57.2957802 : f32
    %624 = vector.broadcast %cst_180 : f32 to vector<8x8xf32>
    %625 = arith.mulf %624, %623 : vector<8x8xf32>
    %cst_181 = arith.constant 0.00277777785 : f32
    %626 = vector.broadcast %cst_181 : f32 to vector<8x8xf32>
    %627 = arith.mulf %625, %626 : vector<8x8xf32>
    %628 = math.floor %627 : vector<8x8xf32>
    %cst_182 = arith.constant 3.600000e+02 : f32
    %629 = vector.broadcast %cst_182 : f32 to vector<8x8xf32>
    %630 = arith.mulf %629, %628 : vector<8x8xf32>
    %631 = arith.subf %625, %630 : vector<8x8xf32>
    %632 = vector.broadcast %571 : vector<8x1xf32> to vector<8x8xf32>
    %633 = arith.subf %631, %632 : vector<8x8xf32>
    %cst_183 = arith.constant 0.00277777785 : f32
    %634 = vector.broadcast %cst_183 : f32 to vector<8x8xf32>
    %635 = arith.mulf %633, %634 : vector<8x8xf32>
    %636 = math.floor %635 : vector<8x8xf32>
    %cst_184 = arith.constant 3.600000e+02 : f32
    %637 = vector.broadcast %cst_184 : f32 to vector<8x8xf32>
    %638 = arith.mulf %637, %636 : vector<8x8xf32>
    %639 = arith.subf %633, %638 : vector<8x8xf32>
    %640 = vector.broadcast %573 : vector<1x8xf32> to vector<8x8xf32>
    %641 = vector.broadcast %571 : vector<8x1xf32> to vector<8x8xf32>
    %642 = arith.subf %640, %641 : vector<8x8xf32>
    %cst_185 = arith.constant 0.00277777785 : f32
    %643 = vector.broadcast %cst_185 : f32 to vector<8x8xf32>
    %644 = arith.mulf %642, %643 : vector<8x8xf32>
    %645 = math.floor %644 : vector<8x8xf32>
    %cst_186 = arith.constant 3.600000e+02 : f32
    %646 = vector.broadcast %cst_186 : f32 to vector<8x8xf32>
    %647 = arith.mulf %646, %645 : vector<8x8xf32>
    %648 = arith.subf %642, %647 : vector<8x8xf32>
    %cst_187 = arith.constant 0.0333333351 : f32
    %649 = vector.broadcast %cst_187 : f32 to vector<8x8xf32>
    %650 = arith.mulf %648, %649 : vector<8x8xf32>
    %651 = math.floor %650 : vector<8x8xf32>
    %cst_188 = arith.constant 0.000000e+00 : f32
    %cst_189 = arith.constant 1.100000e+01 : f32
    %652 = vector.broadcast %cst_188 : f32 to vector<8x8xf32>
    %653 = arith.maximumf %652, %651 : vector<8x8xf32>
    %654 = vector.broadcast %cst_189 : f32 to vector<8x8xf32>
    %655 = arith.minimumf %654, %653 : vector<8x8xf32>
    %cst_190 = arith.constant 0.0333333351 : f32
    %656 = vector.broadcast %cst_190 : f32 to vector<8x8xf32>
    %657 = arith.mulf %639, %656 : vector<8x8xf32>
    %658 = math.floor %657 : vector<8x8xf32>
    %cst_191 = arith.constant 0.000000e+00 : f32
    %cst_192 = arith.constant 1.100000e+01 : f32
    %659 = vector.broadcast %cst_191 : f32 to vector<8x8xf32>
    %660 = arith.maximumf %659, %658 : vector<8x8xf32>
    %661 = vector.broadcast %cst_192 : f32 to vector<8x8xf32>
    %662 = arith.minimumf %661, %660 : vector<8x8xf32>
    %cst_193 = arith.constant 1.200000e+01 : f32
    %663 = vector.broadcast %cst_193 : f32 to vector<8x8xf32>
    %664 = arith.mulf %655, %663 : vector<8x8xf32>
    %665 = arith.addf %664, %662 : vector<8x8xf32>
    %666 = arith.fptosi %665 : vector<8x8xf32> to vector<8x8xi32>
    %667 = tpu.iota {dimensions = array<i32: 2>} : vector<8x8x144xi32>
    %668 = vector.shape_cast %666 : vector<8x8xi32> to vector<8x8x1xi32>
    %669 = vector.broadcast %668 : vector<8x8x1xi32> to vector<8x8x144xi32>
    %670 = arith.cmpi eq, %667, %669 : vector<8x8x144xi32>
    %cst_194 = arith.constant 0.000000e+00 : f32
    %671 = vector.shape_cast %280 : vector<1x1x144xf32> to vector<1x1x144xf32>
    %672 = vector.broadcast %671 : vector<1x1x144xf32> to vector<8x8x144xf32>
    %673 = vector.broadcast %cst_194 : f32 to vector<8x8x144xf32>
    %674 = arith.select %670, %672, %673 : vector<8x8x144xi1>, vector<8x8x144xf32>
    %cst_195 = arith.constant dense<0.000000e+00> : vector<8x8xf32>
    %675 = vector.multi_reduction <add>, %674, %cst_195 [2] : vector<8x8x144xf32> to vector<8x8xf32>
    %676 = arith.subf %675, %587 : vector<8x8xf32>
    %cst_196 = arith.constant 0.000000e+00 : f32
    %677 = vector.broadcast %cst_196 : f32 to vector<8x8xf32>
    %678 = arith.maximumf %676, %677 : vector<8x8xf32>
    %679 = arith.mulf %678, %281 : vector<8x8xf32>
    %cst_197 = arith.constant dense<0.000000e+00> : vector<8xf32>
    %680 = vector.multi_reduction <add>, %679, %cst_197 [1] : vector<8x8xf32> to vector<8xf32>
    %681 = vector.shape_cast %680 : vector<8xf32> to vector<8x1xf32>
    %cst_198 = arith.constant 9.99999971E-10 : f32
    %682 = vector.broadcast %cst_198 : f32 to vector<8x1xf32>
    %683 = arith.addf %681, %682 : vector<8x1xf32>
    %684 = vector.broadcast %683 : vector<8x1xf32> to vector<8x8xf32>
    %685 = arith.divf %679, %684 : vector<8x8xf32>
    %cst_199 = arith.constant dense<0.000000e+00> : vector<8x32xf32>
    %686 = tpu.matmul %685, %516, %cst_199 {dimension_numbers = #tpu.dot_dimension_numbers<[1], [0], [0], [1], [0, 0, 1, 1], [], []>} : vector<8x8xf32>, vector<8x32xf32>, vector<8x32xf32> -> vector<8x32xf32>
    %cst_200 = arith.constant dense<0.000000e+00> : vector<8x128xf32>
    %687 = tpu.matmul %520, %274, %cst_200 {dimension_numbers = #tpu.dot_dimension_numbers<[1], [0], [0], [1], [0, 0, 1, 1], [], []>} : vector<8x2xf32>, vector<2x128xf32>, vector<8x128xf32> -> vector<8x128xf32>
    %688 = vector.broadcast %275 : vector<1x128xf32> to vector<8x128xf32>
    %689 = arith.addf %687, %688 : vector<8x128xf32>
    %cst_201 = arith.constant dense<0.000000e+00> : vector<8x128xf32>
    %690 = tpu.matmul %686, %276, %cst_201 {dimension_numbers = #tpu.dot_dimension_numbers<[1], [0], [0], [1], [0, 0, 1, 1], [], []>} : vector<8x32xf32>, vector<32x128xf32>, vector<8x128xf32> -> vector<8x128xf32>
    %691 = arith.addf %689, %690 : vector<8x128xf32>
    %692 = vector.extract_strided_slice %691 {offsets = [0, 0], sizes = [8, 32], strides = [1, 1]} : vector<8x128xf32> to vector<8x32xf32>
    %693 = arith.negf %692 : vector<8x32xf32>
    %694 = math.exp %693 : vector<8x32xf32>
    %cst_202 = arith.constant 1.000000e+00 : f32
    %695 = vector.broadcast %cst_202 : f32 to vector<8x32xf32>
    %696 = arith.addf %695, %694 : vector<8x32xf32>
    %697 = arith.divf %695, %696 : vector<8x32xf32>
    %698 = vector.extract_strided_slice %691 {offsets = [0, 32], sizes = [8, 32], strides = [1, 1]} : vector<8x128xf32> to vector<8x32xf32>
    %699 = arith.negf %698 : vector<8x32xf32>
    %700 = math.exp %699 : vector<8x32xf32>
    %cst_203 = arith.constant 1.000000e+00 : f32
    %701 = vector.broadcast %cst_203 : f32 to vector<8x32xf32>
    %702 = arith.addf %701, %700 : vector<8x32xf32>
    %703 = arith.divf %701, %702 : vector<8x32xf32>
    %704 = vector.extract_strided_slice %691 {offsets = [0, 64], sizes = [8, 32], strides = [1, 1]} : vector<8x128xf32> to vector<8x32xf32>
    %705 = math.tanh %704 : vector<8x32xf32>
    %706 = vector.extract_strided_slice %691 {offsets = [0, 96], sizes = [8, 32], strides = [1, 1]} : vector<8x128xf32> to vector<8x32xf32>
    %707 = arith.negf %706 : vector<8x32xf32>
    %708 = math.exp %707 : vector<8x32xf32>
    %cst_204 = arith.constant 1.000000e+00 : f32
    %709 = vector.broadcast %cst_204 : f32 to vector<8x32xf32>
    %710 = arith.addf %709, %708 : vector<8x32xf32>
    %711 = arith.divf %709, %710 : vector<8x32xf32>
    %712 = arith.mulf %703, %514 : vector<8x32xf32>
    %713 = arith.mulf %697, %705 : vector<8x32xf32>
    %714 = arith.addf %712, %713 : vector<8x32xf32>
    %715 = math.tanh %714 : vector<8x32xf32>
    %716 = arith.mulf %711, %715 : vector<8x32xf32>
    %cst_205 = arith.constant dense<0.000000e+00> : vector<8x2xf32>
    %717 = tpu.matmul %716, %277, %cst_205 {dimension_numbers = #tpu.dot_dimension_numbers<[1], [0], [0], [1], [0, 0, 1, 1], [], []>} : vector<8x32xf32>, vector<32x2xf32>, vector<8x2xf32> -> vector<8x2xf32>
    %718 = vector.broadcast %278 : vector<1x2xf32> to vector<8x2xf32>
    %719 = arith.addf %717, %718 : vector<8x2xf32>
    %720 = math.tanh %719 : vector<8x2xf32>
    %c0_206 = arith.constant 0 : index
    %c4 = arith.constant 4 : index
    %721 = vector.load %arg12[%c0_206, %c4] : memref<8x8xf32, #tpu.memory_space<vmem>>, vector<8x2xf32>
    tpu.vector_store %arg12[%c0_206, %c4], %720 {strides = array<i32>} : memref<8x8xf32, #tpu.memory_space<vmem>>, vector<8x2xf32>,
    %722 = vector.extract_strided_slice %720 {offsets = [0, 0], sizes = [8, 1], strides = [1, 1]} : vector<8x2xf32> to vector<8x1xf32>
    %723 = vector.extract_strided_slice %720 {offsets = [0, 1], sizes = [8, 1], strides = [1, 1]} : vector<8x2xf32> to vector<8x1xf32>
    %724 = vector.extract_strided_slice %520 {offsets = [0, 1], sizes = [8, 1], strides = [1, 1]} : vector<8x2xf32> to vector<8x1xf32>
    %725 = arith.subf %723, %724 : vector<8x1xf32>
    %726 = vector.extract_strided_slice %520 {offsets = [0, 0], sizes = [8, 1], strides = [1, 1]} : vector<8x2xf32> to vector<8x1xf32>
    %727 = arith.subf %722, %726 : vector<8x1xf32>
    %728 = math.absf %727 : vector<8x1xf32>
    %729 = math.absf %725 : vector<8x1xf32>
    %730 = arith.maximumf %728, %729 : vector<8x1xf32>
    %731 = arith.minimumf %728, %729 : vector<8x1xf32>
    %cst_207 = arith.constant 1.000000e-30 : f32
    %732 = vector.broadcast %cst_207 : f32 to vector<8x1xf32>
    %733 = arith.addf %730, %732 : vector<8x1xf32>
    %734 = arith.divf %731, %733 : vector<8x1xf32>
    %735 = arith.mulf %734, %734 : vector<8x1xf32>
    %cst_208 = arith.constant 2.083510e-02 : f32
    %736 = vector.broadcast %cst_208 : f32 to vector<8x1xf32>
    %737 = arith.mulf %736, %735 : vector<8x1xf32>
    %cst_209 = arith.constant 8.513300e-02 : f32
    %738 = vector.broadcast %cst_209 : f32 to vector<8x1xf32>
    %739 = arith.subf %737, %738 : vector<8x1xf32>
    %740 = arith.mulf %739, %735 : vector<8x1xf32>
    %cst_210 = arith.constant 1.801410e-01 : f32
    %741 = vector.broadcast %cst_210 : f32 to vector<8x1xf32>
    %742 = arith.addf %740, %741 : vector<8x1xf32>
    %743 = arith.mulf %742, %735 : vector<8x1xf32>
    %cst_211 = arith.constant 0.330299497 : f32
    %744 = vector.broadcast %cst_211 : f32 to vector<8x1xf32>
    %745 = arith.subf %743, %744 : vector<8x1xf32>
    %746 = arith.mulf %745, %735 : vector<8x1xf32>
    %cst_212 = arith.constant 9.998660e-01 : f32
    %747 = vector.broadcast %cst_212 : f32 to vector<8x1xf32>
    %748 = arith.addf %746, %747 : vector<8x1xf32>
    %749 = arith.mulf %748, %734 : vector<8x1xf32>
    %750 = arith.cmpf ogt, %729, %728 : vector<8x1xf32>
    %cst_213 = arith.constant 1.57079637 : f32
    %751 = vector.broadcast %cst_213 : f32 to vector<8x1xf32>
    %752 = arith.subf %751, %749 : vector<8x1xf32>
    %753 = arith.select %750, %752, %749 : vector<8x1xi1>, vector<8x1xf32>
    %cst_214 = arith.constant 0.000000e+00 : f32
    %754 = vector.broadcast %cst_214 : f32 to vector<8x1xf32>
    %755 = arith.cmpf olt, %727, %754 : vector<8x1xf32>
    %cst_215 = arith.constant 3.14159274 : f32
    %756 = vector.broadcast %cst_215 : f32 to vector<8x1xf32>
    %757 = arith.subf %756, %753 : vector<8x1xf32>
    %758 = arith.select %755, %757, %753 : vector<8x1xi1>, vector<8x1xf32>
    %cst_216 = arith.constant 0.000000e+00 : f32
    %759 = vector.broadcast %cst_216 : f32 to vector<8x1xf32>
    %760 = arith.cmpf olt, %725, %759 : vector<8x1xf32>
    %cst_217 = arith.constant 0.000000e+00 : f32
    %761 = vector.broadcast %cst_217 : f32 to vector<8x1xf32>
    %762 = arith.subf %761, %758 : vector<8x1xf32>
    %763 = arith.select %760, %762, %758 : vector<8x1xi1>, vector<8x1xf32>
    %cst_218 = arith.constant 57.2957802 : f32
    %764 = vector.broadcast %cst_218 : f32 to vector<8x1xf32>
    %765 = arith.mulf %764, %763 : vector<8x1xf32>
    %cst_219 = arith.constant 0.00277777785 : f32
    %766 = vector.broadcast %cst_219 : f32 to vector<8x1xf32>
    %767 = arith.mulf %765, %766 : vector<8x1xf32>
    %768 = math.floor %767 : vector<8x1xf32>
    %cst_220 = arith.constant 3.600000e+02 : f32
    %769 = vector.broadcast %cst_220 : f32 to vector<8x1xf32>
    %770 = arith.mulf %769, %768 : vector<8x1xf32>
    %771 = arith.subf %765, %770 : vector<8x1xf32>
    %772 = tpu.transpose %720, [1, 0] : vector<8x2xf32> -> vector<2x8xf32>
    %773 = tpu.transpose %771, [1, 0] : vector<8x1xf32> -> vector<1x8xf32>
    %774 = vector.extract_strided_slice %772 {offsets = [0, 0], sizes = [1, 8], strides = [1, 1]} : vector<2x8xf32> to vector<1x8xf32>
    %775 = vector.broadcast %774 : vector<1x8xf32> to vector<8x8xf32>
    %776 = vector.broadcast %722 : vector<8x1xf32> to vector<8x8xf32>
    %777 = arith.subf %775, %776 : vector<8x8xf32>
    %778 = vector.extract_strided_slice %772 {offsets = [1, 0], sizes = [1, 8], strides = [1, 1]} : vector<2x8xf32> to vector<1x8xf32>
    %779 = vector.broadcast %778 : vector<1x8xf32> to vector<8x8xf32>
    %780 = vector.broadcast %723 : vector<8x1xf32> to vector<8x8xf32>
    %781 = arith.subf %779, %780 : vector<8x8xf32>
    %782 = arith.mulf %777, %777 : vector<8x8xf32>
    %783 = arith.mulf %781, %781 : vector<8x8xf32>
    %784 = arith.addf %782, %783 : vector<8x8xf32>
    %cst_221 = arith.constant 9.99999996E-13 : f32
    %785 = vector.broadcast %cst_221 : f32 to vector<8x8xf32>
    %786 = arith.addf %784, %785 : vector<8x8xf32>
    %787 = math.sqrt %786 : vector<8x8xf32>
    %788 = math.absf %777 : vector<8x8xf32>
    %789 = math.absf %781 : vector<8x8xf32>
    %790 = arith.maximumf %788, %789 : vector<8x8xf32>
    %791 = arith.minimumf %788, %789 : vector<8x8xf32>
    %cst_222 = arith.constant 1.000000e-30 : f32
    %792 = vector.broadcast %cst_222 : f32 to vector<8x8xf32>
    %793 = arith.addf %790, %792 : vector<8x8xf32>
    %794 = arith.divf %791, %793 : vector<8x8xf32>
    %795 = arith.mulf %794, %794 : vector<8x8xf32>
    %cst_223 = arith.constant 2.083510e-02 : f32
    %796 = vector.broadcast %cst_223 : f32 to vector<8x8xf32>
    %797 = arith.mulf %796, %795 : vector<8x8xf32>
    %cst_224 = arith.constant 8.513300e-02 : f32
    %798 = vector.broadcast %cst_224 : f32 to vector<8x8xf32>
    %799 = arith.subf %797, %798 : vector<8x8xf32>
    %800 = arith.mulf %799, %795 : vector<8x8xf32>
    %cst_225 = arith.constant 1.801410e-01 : f32
    %801 = vector.broadcast %cst_225 : f32 to vector<8x8xf32>
    %802 = arith.addf %800, %801 : vector<8x8xf32>
    %803 = arith.mulf %802, %795 : vector<8x8xf32>
    %cst_226 = arith.constant 0.330299497 : f32
    %804 = vector.broadcast %cst_226 : f32 to vector<8x8xf32>
    %805 = arith.subf %803, %804 : vector<8x8xf32>
    %806 = arith.mulf %805, %795 : vector<8x8xf32>
    %cst_227 = arith.constant 9.998660e-01 : f32
    %807 = vector.broadcast %cst_227 : f32 to vector<8x8xf32>
    %808 = arith.addf %806, %807 : vector<8x8xf32>
    %809 = arith.mulf %808, %794 : vector<8x8xf32>
    %810 = arith.cmpf ogt, %789, %788 : vector<8x8xf32>
    %cst_228 = arith.constant 1.57079637 : f32
    %811 = vector.broadcast %cst_228 : f32 to vector<8x8xf32>
    %812 = arith.subf %811, %809 : vector<8x8xf32>
    %813 = arith.select %810, %812, %809 : vector<8x8xi1>, vector<8x8xf32>
    %cst_229 = arith.constant 0.000000e+00 : f32
    %814 = vector.broadcast %cst_229 : f32 to vector<8x8xf32>
    %815 = arith.cmpf olt, %777, %814 : vector<8x8xf32>
    %cst_230 = arith.constant 3.14159274 : f32
    %816 = vector.broadcast %cst_230 : f32 to vector<8x8xf32>
    %817 = arith.subf %816, %813 : vector<8x8xf32>
    %818 = arith.select %815, %817, %813 : vector<8x8xi1>, vector<8x8xf32>
    %cst_231 = arith.constant 0.000000e+00 : f32
    %819 = vector.broadcast %cst_231 : f32 to vector<8x8xf32>
    %820 = arith.cmpf olt, %781, %819 : vector<8x8xf32>
    %cst_232 = arith.constant 0.000000e+00 : f32
    %821 = vector.broadcast %cst_232 : f32 to vector<8x8xf32>
    %822 = arith.subf %821, %818 : vector<8x8xf32>
    %823 = arith.select %820, %822, %818 : vector<8x8xi1>, vector<8x8xf32>
    %cst_233 = arith.constant 57.2957802 : f32
    %824 = vector.broadcast %cst_233 : f32 to vector<8x8xf32>
    %825 = arith.mulf %824, %823 : vector<8x8xf32>
    %cst_234 = arith.constant 0.00277777785 : f32
    %826 = vector.broadcast %cst_234 : f32 to vector<8x8xf32>
    %827 = arith.mulf %825, %826 : vector<8x8xf32>
    %828 = math.floor %827 : vector<8x8xf32>
    %cst_235 = arith.constant 3.600000e+02 : f32
    %829 = vector.broadcast %cst_235 : f32 to vector<8x8xf32>
    %830 = arith.mulf %829, %828 : vector<8x8xf32>
    %831 = arith.subf %825, %830 : vector<8x8xf32>
    %832 = vector.broadcast %771 : vector<8x1xf32> to vector<8x8xf32>
    %833 = arith.subf %831, %832 : vector<8x8xf32>
    %cst_236 = arith.constant 0.00277777785 : f32
    %834 = vector.broadcast %cst_236 : f32 to vector<8x8xf32>
    %835 = arith.mulf %833, %834 : vector<8x8xf32>
    %836 = math.floor %835 : vector<8x8xf32>
    %cst_237 = arith.constant 3.600000e+02 : f32
    %837 = vector.broadcast %cst_237 : f32 to vector<8x8xf32>
    %838 = arith.mulf %837, %836 : vector<8x8xf32>
    %839 = arith.subf %833, %838 : vector<8x8xf32>
    %840 = vector.broadcast %773 : vector<1x8xf32> to vector<8x8xf32>
    %841 = vector.broadcast %771 : vector<8x1xf32> to vector<8x8xf32>
    %842 = arith.subf %840, %841 : vector<8x8xf32>
    %cst_238 = arith.constant 0.00277777785 : f32
    %843 = vector.broadcast %cst_238 : f32 to vector<8x8xf32>
    %844 = arith.mulf %842, %843 : vector<8x8xf32>
    %845 = math.floor %844 : vector<8x8xf32>
    %cst_239 = arith.constant 3.600000e+02 : f32
    %846 = vector.broadcast %cst_239 : f32 to vector<8x8xf32>
    %847 = arith.mulf %846, %845 : vector<8x8xf32>
    %848 = arith.subf %842, %847 : vector<8x8xf32>
    %cst_240 = arith.constant 0.0333333351 : f32
    %849 = vector.broadcast %cst_240 : f32 to vector<8x8xf32>
    %850 = arith.mulf %848, %849 : vector<8x8xf32>
    %851 = math.floor %850 : vector<8x8xf32>
    %cst_241 = arith.constant 0.000000e+00 : f32
    %cst_242 = arith.constant 1.100000e+01 : f32
    %852 = vector.broadcast %cst_241 : f32 to vector<8x8xf32>
    %853 = arith.maximumf %852, %851 : vector<8x8xf32>
    %854 = vector.broadcast %cst_242 : f32 to vector<8x8xf32>
    %855 = arith.minimumf %854, %853 : vector<8x8xf32>
    %cst_243 = arith.constant 0.0333333351 : f32
    %856 = vector.broadcast %cst_243 : f32 to vector<8x8xf32>
    %857 = arith.mulf %839, %856 : vector<8x8xf32>
    %858 = math.floor %857 : vector<8x8xf32>
    %cst_244 = arith.constant 0.000000e+00 : f32
    %cst_245 = arith.constant 1.100000e+01 : f32
    %859 = vector.broadcast %cst_244 : f32 to vector<8x8xf32>
    %860 = arith.maximumf %859, %858 : vector<8x8xf32>
    %861 = vector.broadcast %cst_245 : f32 to vector<8x8xf32>
    %862 = arith.minimumf %861, %860 : vector<8x8xf32>
    %cst_246 = arith.constant 1.200000e+01 : f32
    %863 = vector.broadcast %cst_246 : f32 to vector<8x8xf32>
    %864 = arith.mulf %855, %863 : vector<8x8xf32>
    %865 = arith.addf %864, %862 : vector<8x8xf32>
    %866 = arith.fptosi %865 : vector<8x8xf32> to vector<8x8xi32>
    %867 = tpu.iota {dimensions = array<i32: 2>} : vector<8x8x144xi32>
    %868 = vector.shape_cast %866 : vector<8x8xi32> to vector<8x8x1xi32>
    %869 = vector.broadcast %868 : vector<8x8x1xi32> to vector<8x8x144xi32>
    %870 = arith.cmpi eq, %867, %869 : vector<8x8x144xi32>
    %cst_247 = arith.constant 0.000000e+00 : f32
    %871 = vector.shape_cast %280 : vector<1x1x144xf32> to vector<1x1x144xf32>
    %872 = vector.broadcast %871 : vector<1x1x144xf32> to vector<8x8x144xf32>
    %873 = vector.broadcast %cst_247 : f32 to vector<8x8x144xf32>
    %874 = arith.select %870, %872, %873 : vector<8x8x144xi1>, vector<8x8x144xf32>
    %cst_248 = arith.constant dense<0.000000e+00> : vector<8x8xf32>
    %875 = vector.multi_reduction <add>, %874, %cst_248 [2] : vector<8x8x144xf32> to vector<8x8xf32>
    %876 = arith.subf %875, %787 : vector<8x8xf32>
    %cst_249 = arith.constant 0.000000e+00 : f32
    %877 = vector.broadcast %cst_249 : f32 to vector<8x8xf32>
    %878 = arith.maximumf %876, %877 : vector<8x8xf32>
    %879 = arith.mulf %878, %281 : vector<8x8xf32>
    %cst_250 = arith.constant dense<0.000000e+00> : vector<8xf32>
    %880 = vector.multi_reduction <add>, %879, %cst_250 [1] : vector<8x8xf32> to vector<8xf32>
    %881 = vector.shape_cast %880 : vector<8xf32> to vector<8x1xf32>
    %cst_251 = arith.constant 9.99999971E-10 : f32
    %882 = vector.broadcast %cst_251 : f32 to vector<8x1xf32>
    %883 = arith.addf %881, %882 : vector<8x1xf32>
    %884 = vector.broadcast %883 : vector<8x1xf32> to vector<8x8xf32>
    %885 = arith.divf %879, %884 : vector<8x8xf32>
    %cst_252 = arith.constant dense<0.000000e+00> : vector<8x32xf32>
    %886 = tpu.matmul %885, %716, %cst_252 {dimension_numbers = #tpu.dot_dimension_numbers<[1], [0], [0], [1], [0, 0, 1, 1], [], []>} : vector<8x8xf32>, vector<8x32xf32>, vector<8x32xf32> -> vector<8x32xf32>
    %cst_253 = arith.constant dense<0.000000e+00> : vector<8x128xf32>
    %887 = tpu.matmul %720, %274, %cst_253 {dimension_numbers = #tpu.dot_dimension_numbers<[1], [0], [0], [1], [0, 0, 1, 1], [], []>} : vector<8x2xf32>, vector<2x128xf32>, vector<8x128xf32> -> vector<8x128xf32>
    %888 = vector.broadcast %275 : vector<1x128xf32> to vector<8x128xf32>
    %889 = arith.addf %887, %888 : vector<8x128xf32>
    %cst_254 = arith.constant dense<0.000000e+00> : vector<8x128xf32>
    %890 = tpu.matmul %886, %276, %cst_254 {dimension_numbers = #tpu.dot_dimension_numbers<[1], [0], [0], [1], [0, 0, 1, 1], [], []>} : vector<8x32xf32>, vector<32x128xf32>, vector<8x128xf32> -> vector<8x128xf32>
    %891 = arith.addf %889, %890 : vector<8x128xf32>
    %892 = vector.extract_strided_slice %891 {offsets = [0, 0], sizes = [8, 32], strides = [1, 1]} : vector<8x128xf32> to vector<8x32xf32>
    %893 = arith.negf %892 : vector<8x32xf32>
    %894 = math.exp %893 : vector<8x32xf32>
    %cst_255 = arith.constant 1.000000e+00 : f32
    %895 = vector.broadcast %cst_255 : f32 to vector<8x32xf32>
    %896 = arith.addf %895, %894 : vector<8x32xf32>
    %897 = arith.divf %895, %896 : vector<8x32xf32>
    %898 = vector.extract_strided_slice %891 {offsets = [0, 32], sizes = [8, 32], strides = [1, 1]} : vector<8x128xf32> to vector<8x32xf32>
    %899 = arith.negf %898 : vector<8x32xf32>
    %900 = math.exp %899 : vector<8x32xf32>
    %cst_256 = arith.constant 1.000000e+00 : f32
    %901 = vector.broadcast %cst_256 : f32 to vector<8x32xf32>
    %902 = arith.addf %901, %900 : vector<8x32xf32>
    %903 = arith.divf %901, %902 : vector<8x32xf32>
    %904 = vector.extract_strided_slice %891 {offsets = [0, 64], sizes = [8, 32], strides = [1, 1]} : vector<8x128xf32> to vector<8x32xf32>
    %905 = math.tanh %904 : vector<8x32xf32>
    %906 = vector.extract_strided_slice %891 {offsets = [0, 96], sizes = [8, 32], strides = [1, 1]} : vector<8x128xf32> to vector<8x32xf32>
    %907 = arith.negf %906 : vector<8x32xf32>
    %908 = math.exp %907 : vector<8x32xf32>
    %cst_257 = arith.constant 1.000000e+00 : f32
    %909 = vector.broadcast %cst_257 : f32 to vector<8x32xf32>
    %910 = arith.addf %909, %908 : vector<8x32xf32>
    %911 = arith.divf %909, %910 : vector<8x32xf32>
    %912 = arith.mulf %903, %714 : vector<8x32xf32>
    %913 = arith.mulf %897, %905 : vector<8x32xf32>
    %914 = arith.addf %912, %913 : vector<8x32xf32>
    %915 = math.tanh %914 : vector<8x32xf32>
    %916 = arith.mulf %911, %915 : vector<8x32xf32>
    %cst_258 = arith.constant dense<0.000000e+00> : vector<8x2xf32>
    %917 = tpu.matmul %916, %277, %cst_258 {dimension_numbers = #tpu.dot_dimension_numbers<[1], [0], [0], [1], [0, 0, 1, 1], [], []>} : vector<8x32xf32>, vector<32x2xf32>, vector<8x2xf32> -> vector<8x2xf32>
    %918 = vector.broadcast %278 : vector<1x2xf32> to vector<8x2xf32>
    %919 = arith.addf %917, %918 : vector<8x2xf32>
    %920 = math.tanh %919 : vector<8x2xf32>
    %c0_259 = arith.constant 0 : index
    %c6 = arith.constant 6 : index
    %921 = vector.load %arg12[%c0_259, %c6] : memref<8x8xf32, #tpu.memory_space<vmem>>, vector<8x2xf32>
    tpu.vector_store %arg12[%c0_259, %c6], %920 {strides = array<i32>} : memref<8x8xf32, #tpu.memory_space<vmem>>, vector<8x2xf32>,
    return
  }
  func.func @transform_0(%arg0: i32) -> (i32, i32, i32) {
    %c0_i32 = arith.constant 0 : i32
    %c0_i32_0 = arith.constant 0 : i32
    %c0_i32_1 = arith.constant 0 : i32
    %c0_i32_2 = arith.constant 0 : i32
    return %c0_i32, %c0_i32_0, %c0_i32_1 : i32, i32, i32
  }
  func.func @transform_1(%arg0: i32) -> (i32, i32, i32) {
    %c0_i32 = arith.constant 0 : i32
    %c0_i32_0 = arith.constant 0 : i32
    %c0_i32_1 = arith.constant 0 : i32
    %c0_i32_2 = arith.constant 0 : i32
    return %c0_i32, %c0_i32_0, %c0_i32_1 : i32, i32, i32
  }
  func.func @transform_2(%arg0: i32) -> (i32, i32) {
    %c0_i32 = arith.constant 0 : i32
    %c0_i32_0 = arith.constant 0 : i32
    %c0_i32_1 = arith.constant 0 : i32
    return %c0_i32, %c0_i32_0 : i32, i32
  }
  func.func @transform_3(%arg0: i32) -> (i32, i32) {
    %c0_i32 = arith.constant 0 : i32
    %c0_i32_0 = arith.constant 0 : i32
    %c0_i32_1 = arith.constant 0 : i32
    return %c0_i32, %c0_i32_0 : i32, i32
  }
  func.func @transform_4(%arg0: i32) -> (i32, i32) {
    %c0_i32 = arith.constant 0 : i32
    %c0_i32_0 = arith.constant 0 : i32
    %c0_i32_1 = arith.constant 0 : i32
    return %c0_i32, %c0_i32_0 : i32, i32
  }
  func.func @transform_5(%arg0: i32) -> (i32, i32) {
    %c0_i32 = arith.constant 0 : i32
    %c0_i32_0 = arith.constant 0 : i32
    %c0_i32_1 = arith.constant 0 : i32
    return %c0_i32, %c0_i32_0 : i32, i32
  }
  func.func @transform_6(%arg0: i32) -> (i32, i32) {
    %c0_i32 = arith.constant 0 : i32
    %c0_i32_0 = arith.constant 0 : i32
    %c0_i32_1 = arith.constant 0 : i32
    return %c0_i32, %c0_i32_0 : i32, i32
  }
  func.func @transform_7(%arg0: i32) -> (i32, i32) {
    %c0_i32 = arith.constant 0 : i32
    %c0_i32_0 = arith.constant 0 : i32
    %c0_i32_1 = arith.constant 0 : i32
    return %c0_i32, %c0_i32_0 : i32, i32
  }
  func.func @transform_8(%arg0: i32) -> (i32, i32) {
    %c0_i32 = arith.constant 0 : i32
    %c0_i32_0 = arith.constant 0 : i32
    %c0_i32_1 = arith.constant 0 : i32
    return %c0_i32, %c0_i32_0 : i32, i32
  }
  func.func @transform_9(%arg0: i32) -> (i32, i32) {
    %c0_i32 = arith.constant 0 : i32
    %c0_i32_0 = arith.constant 0 : i32
    %c0_i32_1 = arith.constant 0 : i32
    return %c0_i32, %c0_i32_0 : i32, i32
  }
  func.func @transform_10(%arg0: i32) -> (i32, i32) {
    %c0_i32 = arith.constant 0 : i32
    %c0_i32_0 = arith.constant 0 : i32
    %c0_i32_1 = arith.constant 0 : i32
    return %c0_i32, %c0_i32_0 : i32, i32
  }
  func.func @transform_11(%arg0: i32) -> (i32, i32) {
    %c0_i32 = arith.constant 0 : i32
    %c0_i32_0 = arith.constant 0 : i32
    %c0_i32_1 = arith.constant 0 : i32
    return %c0_i32, %c0_i32_0 : i32, i32
  }
}

</mosaic_0001>

<bundles_post_ra>
// kernel: mul.2
= control target key start
LH: loop header
LB: loop body
LE: loop exit
PB: predicated region body
PF: predicated region fallthrough
CT: control target
= control target key end

     0   :  { %s34_s0 = inlined_call_operand.vmem [shape: f32[8,8], index: 0, kind: input, shape index: {}]   ;;  %s35_s1 = inlined_call_operand.vmem [shape: f32[8,8], index: 1, kind: input, shape index: {}]   ;;  %s36_s2 = inlined_call_operand.vmem [shape: f32[8,8], index: 2, kind: output, shape index: {}]  }
   0x1   :  { %v3_v0 = vld [vmem:[%s34_s0] sm:$0xff] }
   0x2   :  { %v4_v1 = vld [vmem:[%s35_s1] sm:$0xff] }
   0x3   :  { %v7_v2 = vmul.f32 %v4_v1, %v3_v0 }
   0x5   :  { %9 = vst [vmem:[%s36_s2] sm:$0xff] %v7_v2 }

// kernel: spatial_model_forward.1
= control target key start
LH: loop header
LB: loop body
LE: loop exit
PB: predicated region body
PF: predicated region fallthrough
CT: control target
= control target key end

     0   :  { %vm5112_vm0 = vcmask 64512   ;;  %v3802_v0 = vmov 0.0   ;;  %vm5111_vm1 = vcmask 261120   ;;  %s3804_s29 = smov 32   ;;  %s3805_s23 = smov 1   ;;  %s5097_s1 = inlined_call_operand.vmem [shape: f32[8,8,8], index: 1, kind: input, shape index: {}]   ;;  %s5098_s2 = inlined_call_operand.vmem [shape: f32[32,128], index: 2, kind: input, shape index: {}]   ;;  %s5099_s0 = inlined_call_operand.vmem [shape: f32[8,8,128], index: 0, kind: input, shape index: {}]   ;;  %s5100_s4 = inlined_call_operand.vmem [shape: f32[2,128], index: 4, kind: input, shape index: {}]   ;;  %s5101_s3 = inlined_call_operand.vmem [shape: f32[8,2], index: 3, kind: input, shape index: {}]   ;;  %s5102_s6 = inlined_call_operand.vmem [shape: f32[32,128], index: 6, kind: input, shape index: {}]   ;;  %s5103_s5 = inlined_call_operand.vmem [shape: f32[1,128], index: 5, kind: input, shape index: {}]   ;;  %s5104_s8 = inlined_call_operand.vmem [shape: f32[1,2], index: 8, kind: input, shape index: {}]   ;;  %s5105_s7 = inlined_call_operand.vmem [shape: f32[32,2], index: 7, kind: input, shape index: {}]   ;;  %s5106_s11 = inlined_call_operand.vmem [shape: f32[8,8], index: 11, kind: output, shape index: {}]   ;;  %s5107_s10 = inlined_call_operand.vmem [shape: f32[8,8], index: 10, kind: input, shape index: {}]   ;;  %s5108_s9 = inlined_call_operand.vmem [shape: f32[1,144], index: 9, kind: input, shape index: {}]  }
   0x1   :  { %62 = vmatpush.msra.mxu0 %v3802_v0  ;;  %v42_v1 = vld [vmem:[%s5097_s1] sm:$0xff]  ;;  %v3878_v2 = vld [vmem:[%s5098_s2 + $0x18] sm:$0xff]  ;;  %v3883_v3 = vld [vmem:[%s5098_s2 + $0x10] sm:$0xff]  ;;  %s3806_s24 = smov 127  }
   0x2   :  { %3489 = vmatmul.msk.f32.vlgmr.msra.gmra.mxu0 %vm5112_vm0, %v42_v1  ;;  %84 = vmatpush.msra.mxu1 %v3878_v2  ;;  %v3890_v4 = vld [vmem:[%s5098_s2 + $0x8] sm:$0xff]  ;;  %v3900_v5 = vld [vmem:[%s5098_s2] sm:$0xff]  ;;  %s3803_s2 = smov 64   ;;  %v3497_v60 = vld [vmem:[%s5097_s1 + $0x10] sm:$0xff] }
   0x3   :  { %176 = vmatpush.msra.mxu3 %v3878_v2  ;;  %v67_v7 = vld [vmem:[%s5099_s0] sm:$0xff]  ;;  %v3492_v32 = vld [vmem:[%s5097_s1 + $0x8] sm:$0xff]  ;;  %v3499_v63 = vld [vmem:[%s5099_s0 + $0x10] sm:$0xff] }
   0x4   :  { %85 = vmatpush.msra.mxu1 %v3883_v3  ;;  %v3494_v35 = vld [vmem:[%s5099_s0 + $0x8] sm:$0xff] }
   0x5   :  { %177 = vmatpush.msra.mxu3 %v3883_v3 }
   0x6   :  { %86 = vmatpush.msra.mxu1 %v3890_v4 }
   0x7   :  { %178 = vmatpush.msra.mxu3 %v3890_v4 }
   0x8   :  { %87 = vmatpush.msra.mxu1 %v3900_v5 }
   0x9   :  { %179 = vmatpush.msra.mxu3 %v3900_v5 }
   0xb   :  { %360 = vmatpush.msrb.mxu3 %v3878_v2 }
   0xd   :  { %361 = vmatpush.msrb.mxu3 %v3883_v3 }
   0xf   :  { %362 = vmatpush.msrb.mxu3 %v3890_v4 }
  0x11   :  { %363 = vmatpush.msrb.mxu3 %v3900_v5 }
  0x7f   :  { %v64_v6 = vpop.f32.mrf.mxu0 }
  0x80   :  { %3490 = vmatmul.msk.f32.vlgmr.msra.gmra.mxu1 %vm5111_vm1, %v64_v6 }
  0xfd   :  { %v89_v8 = vpop.f32.mrf.mxu1 }
  0xfe   :  { %v92_v9 = vadd.f32 %v89_v8, %v67_v7 }
 0x100   :  { %3618 = vtanh.f32 %v92_v9  ;;  %v3491_v11 = vmul.f32 -1.442695, %v92_v9 }
 0x102   :  { %3620 = vpow2.f32 %v3491_v11 }
 0x106   :  { %v3619_v10 = vpop.eup %3618 }
 0x107   :  { %115 = vrot.lane.b32.xlu0 %v3619_v10, %s3803_s2 }
 0x108   :  { %v3621_v12 = vpop.eup %3620 }
 0x109   :  { %v96_v13 = vadd.f32 1.0, %v3621_v12 }
 0x10b   :  { %3622 = vrcp.f32 %v96_v13  ;;  %v108_v19 = vand.u32 2147483648, %v96_v13  ;;  %vm102_vm3 = vweird.f32 %v96_v13  ;;  %v106_v20 = vand.u32 2147483647, %v96_v13 }
 0x10d   :  { %v109_v22 = vor.u32 1.1754944e-38, %v108_v19  ;;  %vm107_vm5 = vcmp.eq.f32.partialorder %v106_v20, 8.507059e+37 }
 0x111   :  { %v3623_v14 = vpop.eup %3622 }
 0x112   :  { %v98_v15 = vmul.f32 %v3623_v14, %v96_v13  ;;  %vm103_vm2 = vweird.f32 %v3623_v14 }
 0x113   :  { %vm104_vm4 = vmor %vm102_vm3, %vm103_vm2 }
 0x114   :  { %v99_v16 = vsub.f32 1.0, %v98_v15 }
 0x116   :  { %v100_v17 = vmul.f32 %v3623_v14, %v99_v16 }
 0x118   :  { %v101_v18 = vadd.f32 %v3623_v14, %v100_v17 }
 0x11a   :  { %v105_v21 = vsel %vm104_vm4, %v3623_v14, %v101_v18 }
 0x11b   :  { %v110_v24 = vsel %vm107_vm5, %v109_v22, %v105_v21 }
 0x11c   :  { %v113_v26 = vmul.f32 0.0, %v110_v24 }
 0x179   :  { %v116_v23 = vpop.permute.xlu0 %115 }
 0x17a   :  { %v118_v25 = vmul.f32 %v116_v23, %v110_v24 }
 0x17c   :  { %120 = vrot.lane.b32.xlu0 %v118_v25, %s3804_s29 }
 0x1ee   :  { %v121_v27 = vpop.permute.xlu0 %120 }
 0x1ef   :  { %v123_v28 = vadd.f32 %v121_v27, %v113_v26 }
 0x1f1   :  { %3624 = vtanh.f32 %v123_v28 }
 0x1f7   :  { %v3625_v29 = vpop.eup %3624 }
 0x1f8   :  { %126 = vrot.lane.b32.xlu1 %v3625_v29, %s3803_s2 }
 0x26a   :  { %v127_v30 = vpop.permute.xlu1 %126 }
 0x26b   :  { %v129_v31 = vmul.f32 %v127_v30, %v110_v24 }
 0x26d   :  { %133 = vrot.lane.b32.xlu1 %v129_v31, %s3804_s29  ;;  %v3504_v31 = vld [vmem:[%s5099_s0 + $0x18] sm:$0xff] }
 0x2df   :  { %v134_v33 = vpop.permute.xlu1 %133 }
 0x2e0   :  { %154 = vmatpush.msra.mxu2 %v134_v33 }
 0x2e1   :  { %3493 = vmatmul.msk.f32.vlgmr.msra.gmra.mxu2 %vm5112_vm0, %v3492_v32 }
 0x2e2   :  { %268 = vmatpush.msrb.mxu2 %v3878_v2 }
 0x2e4   :  { %269 = vmatpush.msrb.mxu2 %v3883_v3 }
 0x2e6   :  { %270 = vmatpush.msrb.mxu2 %v3890_v4 }
 0x2e8   :  { %271 = vmatpush.msrb.mxu2 %v3900_v5 }
 0x2ea   :  { %452 = vmatpush.msra.mxu2 %v3878_v2 }
 0x2ec   :  { %453 = vmatpush.msra.mxu2 %v3883_v3 }
 0x2ee   :  { %454 = vmatpush.msra.mxu2 %v3890_v4 }
 0x2f0   :  { %455 = vmatpush.msra.mxu2 %v3900_v5 }
 0x364   :  { %v156_v34 = vpop.f32.mrf.mxu2 }
 0x365   :  { %3495 = vmatmul.msk.f32.vlgmr.msra.gmra.mxu3 %vm5111_vm1, %v156_v34 }
 0x366   :  { %544 = vmatpush.msra.mxu3 %v3878_v2 }
 0x368   :  { %545 = vmatpush.msra.mxu3 %v3883_v3 }
 0x36a   :  { %546 = vmatpush.msra.mxu3 %v3890_v4 }
 0x36c   :  { %547 = vmatpush.msra.mxu3 %v3900_v5 }
 0x3e8   :  { %v181_v36 = vpop.f32.mrf.mxu3 }
 0x3e9   :  { %v184_v37 = vadd.f32 %v3494_v35, %v181_v36 }
 0x3eb   :  { %3626 = vtanh.f32 %v184_v37  ;;  %v3496_v39 = vmul.f32 -1.442695, %v184_v37 }
 0x3ed   :  { %3628 = vpow2.f32 %v3496_v39 }
 0x3f1   :  { %v3627_v38 = vpop.eup %3626 }
 0x3f2   :  { %207 = vrot.lane.b32.xlu2 %v3627_v38, %s3803_s2 }
 0x3f3   :  { %v3629_v40 = vpop.eup %3628 }
 0x3f4   :  { %v188_v41 = vadd.f32 1.0, %v3629_v40 }
 0x3f6   :  { %3630 = vrcp.f32 %v188_v41  ;;  %v200_v47 = vand.u32 2147483648, %v188_v41  ;;  %vm194_vm7 = vweird.f32 %v188_v41  ;;  %v198_v48 = vand.u32 2147483647, %v188_v41 }
 0x3f8   :  { %v201_v50 = vor.u32 1.1754944e-38, %v200_v47  ;;  %vm199_vm9 = vcmp.eq.f32.partialorder %v198_v48, 8.507059e+37 }
 0x3fc   :  { %v3631_v42 = vpop.eup %3630 }
 0x3fd   :  { %v190_v43 = vmul.f32 %v3631_v42, %v188_v41  ;;  %vm195_vm6 = vweird.f32 %v3631_v42 }
 0x3fe   :  { %vm196_vm8 = vmor %vm194_vm7, %vm195_vm6 }
 0x3ff   :  { %v191_v44 = vsub.f32 1.0, %v190_v43 }
 0x401   :  { %v192_v45 = vmul.f32 %v3631_v42, %v191_v44 }
 0x403   :  { %v193_v46 = vadd.f32 %v3631_v42, %v192_v45 }
 0x405   :  { %v197_v49 = vsel %vm196_vm8, %v3631_v42, %v193_v46 }
 0x406   :  { %v202_v52 = vsel %vm199_vm9, %v201_v50, %v197_v49 }
 0x407   :  { %v205_v54 = vmul.f32 %v202_v52, %v123_v28  ;;  %v3502_v28 = vld [vmem:[%s5097_s1 + $0x18] sm:$0xff] }
 0x44c   :  { %v208_v51 = vpop.permute.xlu2 %207 }
 0x44d   :  { %v210_v53 = vmul.f32 %v208_v51, %v202_v52 }
 0x44f   :  { %212 = vrot.lane.b32.xlu2 %v210_v53, %s3804_s29 }
 0x4a9   :  { %v213_v55 = vpop.permute.xlu2 %212 }
 0x4aa   :  { %v215_v56 = vadd.f32 %v213_v55, %v205_v54  ;;  %v3509_v55 = vld [vmem:[%s5099_s0 + $0x20] sm:$0xff] }
 0x4ac   :  { %3632 = vtanh.f32 %v215_v56 }
 0x4b2   :  { %v3633_v57 = vpop.eup %3632 }
 0x4b3   :  { %218 = vrot.lane.b32.xlu0 %v3633_v57, %s3803_s2 }
 0x525   :  { %v219_v58 = vpop.permute.xlu0 %218 }
 0x526   :  { %v221_v59 = vmul.f32 %v219_v58, %v202_v52  ;;  %v3507_v52 = vld [vmem:[%s5097_s1 + $0x20] sm:$0xff] }
 0x528   :  { %225 = vrot.lane.b32.xlu1 %v221_v59, %s3804_s29 }
 0x59a   :  { %v226_v61 = vpop.permute.xlu1 %225 }
 0x59b   :  { %246 = vmatpush.msrb.mxu0 %v226_v61 }
 0x59c   :  { %3498 = vmatmul.msk.f32.vlgmr.msrb.gmra.mxu0 %vm5112_vm0, %v3497_v60 }
 0x619   :  { %v248_v62 = vpop.f32.mrf.mxu0 }
 0x61a   :  { %3500 = vmatmul.msk.f32.vlgmr.msrb.gmra.mxu2 %vm5111_vm1, %v248_v62 }
 0x61b   :  { %636 = vmatpush.msrb.mxu2 %v3878_v2 }
 0x61d   :  { %637 = vmatpush.msrb.mxu2 %v3883_v3 }
 0x61f   :  { %638 = vmatpush.msrb.mxu2 %v3890_v4 }
 0x621   :  { %639 = vmatpush.msrb.mxu2 %v3900_v5 }
 0x69d   :  { %v273_v0 = vpop.f32.mrf.mxu2 }
 0x69e   :  { %v276_v1 = vadd.f32 %v3499_v63, %v273_v0 }
 0x6a0   :  { %3634 = vtanh.f32 %v276_v1  ;;  %v3501_v7 = vmul.f32 -1.442695, %v276_v1 }
 0x6a2   :  { %3636 = vpow2.f32 %v3501_v7 }
 0x6a6   :  { %v3635_v6 = vpop.eup %3634 }
 0x6a7   :  { %299 = vrot.lane.b32.xlu2 %v3635_v6, %s3803_s2 }
 0x6a8   :  { %v3637_v8 = vpop.eup %3636 }
 0x6a9   :  { %v280_v9 = vadd.f32 1.0, %v3637_v8 }
 0x6ab   :  { %3638 = vrcp.f32 %v280_v9  ;;  %v292_v15 = vand.u32 2147483648, %v280_v9  ;;  %vm286_vm11 = vweird.f32 %v280_v9  ;;  %v290_v16 = vand.u32 2147483647, %v280_v9 }
 0x6ad   :  { %v293_v18 = vor.u32 1.1754944e-38, %v292_v15  ;;  %vm291_vm13 = vcmp.eq.f32.partialorder %v290_v16, 8.507059e+37 }
 0x6b1   :  { %v3639_v10 = vpop.eup %3638 }
 0x6b2   :  { %v282_v11 = vmul.f32 %v3639_v10, %v280_v9  ;;  %vm287_vm10 = vweird.f32 %v3639_v10 }
 0x6b3   :  { %vm288_vm12 = vmor %vm286_vm11, %vm287_vm10 }
 0x6b4   :  { %v283_v12 = vsub.f32 1.0, %v282_v11 }
 0x6b6   :  { %v284_v13 = vmul.f32 %v3639_v10, %v283_v12 }
 0x6b8   :  { %v285_v14 = vadd.f32 %v3639_v10, %v284_v13 }
 0x6ba   :  { %v289_v17 = vsel %vm288_vm12, %v3639_v10, %v285_v14 }
 0x6bb   :  { %v294_v20 = vsel %vm291_vm13, %v293_v18, %v289_v17 }
 0x6bc   :  { %v297_v22 = vmul.f32 %v294_v20, %v215_v56 }
 0x701   :  { %v300_v19 = vpop.permute.xlu2 %299 }
 0x702   :  { %v302_v21 = vmul.f32 %v300_v19, %v294_v20 }
 0x704   :  { %304 = vrot.lane.b32.xlu0 %v302_v21, %s3804_s29 }
 0x776   :  { %v305_v23 = vpop.permute.xlu0 %304 }
 0x777   :  { %v307_v24 = vadd.f32 %v305_v23, %v297_v22  ;;  %v3514_v23 = vld [vmem:[%s5099_s0 + $0x28] sm:$0xff] }
 0x779   :  { %3640 = vtanh.f32 %v307_v24 }
 0x77f   :  { %v3641_v25 = vpop.eup %3640 }
 0x780   :  { %310 = vrot.lane.b32.xlu1 %v3641_v25, %s3803_s2 }
 0x7f2   :  { %v311_v26 = vpop.permute.xlu1 %310 }
 0x7f3   :  { %v313_v27 = vmul.f32 %v311_v26, %v294_v20  ;;  %v3512_v20 = vld [vmem:[%s5097_s1 + $0x28] sm:$0xff] }
 0x7f5   :  { %317 = vrot.lane.b32.xlu2 %v313_v27, %s3804_s29 }
 0x84f   :  { %v318_v29 = vpop.permute.xlu2 %317 }
 0x850   :  { %338 = vmatpush.msrb.mxu1 %v318_v29 }
 0x851   :  { %3503 = vmatmul.msk.f32.vlgmr.msrb.gmra.mxu1 %vm5112_vm0, %v3502_v28 }
 0x8ce   :  { %v340_v30 = vpop.f32.mrf.mxu1 }
 0x8cf   :  { %3505 = vmatmul.msk.f32.vlgmr.msrb.gmra.mxu3 %vm5111_vm1, %v340_v30 }
 0x8d0   :  { %728 = vmatpush.msrb.mxu3 %v3878_v2 }
 0x8d2   :  { %729 = vmatpush.msrb.mxu3 %v3883_v3 }
 0x8d4   :  { %730 = vmatpush.msrb.mxu3 %v3890_v4 }
 0x8d6   :  { %731 = vmatpush.msrb.mxu3 %v3900_v5 }
 0x952   :  { %v365_v32 = vpop.f32.mrf.mxu3 }
 0x953   :  { %v368_v33 = vadd.f32 %v3504_v31, %v365_v32 }
 0x955   :  { %3642 = vtanh.f32 %v368_v33  ;;  %v3506_v35 = vmul.f32 -1.442695, %v368_v33 }
 0x957   :  { %3644 = vpow2.f32 %v3506_v35 }
 0x95b   :  { %v3643_v34 = vpop.eup %3642 }
 0x95c   :  { %391 = vrot.lane.b32.xlu0 %v3643_v34, %s3803_s2 }
 0x95d   :  { %v3645_v36 = vpop.eup %3644 }
 0x95e   :  { %v372_v2 = vadd.f32 1.0, %v3645_v36 }
 0x960   :  { %3646 = vrcp.f32 %v372_v2  ;;  %v384_v39 = vand.u32 2147483648, %v372_v2  ;;  %vm378_vm15 = vweird.f32 %v372_v2  ;;  %v382_v40 = vand.u32 2147483647, %v372_v2 }
 0x962   :  { %v385_v42 = vor.u32 1.1754944e-38, %v384_v39  ;;  %vm383_vm3 = vcmp.eq.f32.partialorder %v382_v40, 8.507059e+37 }
 0x966   :  { %v3647_v3 = vpop.eup %3646 }
 0x967   :  { %v374_v37 = vmul.f32 %v3647_v3, %v372_v2  ;;  %vm379_vm14 = vweird.f32 %v3647_v3 }
 0x968   :  { %vm380_vm2 = vmor %vm378_vm15, %vm379_vm14 }
 0x969   :  { %v375_v4 = vsub.f32 1.0, %v374_v37 }
 0x96b   :  { %v376_v38 = vmul.f32 %v3647_v3, %v375_v4 }
 0x96d   :  { %v377_v5 = vadd.f32 %v3647_v3, %v376_v38 }
 0x96f   :  { %v381_v41 = vsel %vm380_vm2, %v3647_v3, %v377_v5 }
 0x970   :  { %v386_v44 = vsel %vm383_vm3, %v385_v42, %v381_v41 }
 0x971   :  { %v389_v46 = vmul.f32 %v386_v44, %v307_v24 }
 0x9ce   :  { %v392_v43 = vpop.permute.xlu0 %391 }
 0x9cf   :  { %v394_v45 = vmul.f32 %v392_v43, %v386_v44 }
 0x9d1   :  { %396 = vrot.lane.b32.xlu1 %v394_v45, %s3804_s29 }
 0xa43   :  { %v397_v47 = vpop.permute.xlu1 %396 }
 0xa44   :  { %v399_v48 = vadd.f32 %v397_v47, %v389_v46  ;;  %v3519_v47 = vld [vmem:[%s5099_s0 + $0x30] sm:$0xff] }
 0xa46   :  { %3648 = vtanh.f32 %v399_v48 }
 0xa4c   :  { %v3649_v49 = vpop.eup %3648 }
 0xa4d   :  { %402 = vrot.lane.b32.xlu2 %v3649_v49, %s3803_s2 }
 0xaa7   :  { %v403_v50 = vpop.permute.xlu2 %402 }
 0xaa8   :  { %v405_v51 = vmul.f32 %v403_v50, %v386_v44  ;;  %v3517_v44 = vld [vmem:[%s5097_s1 + $0x30] sm:$0xff] }
 0xaaa   :  { %409 = vrot.lane.b32.xlu0 %v405_v51, %s3804_s29 }
 0xb1c   :  { %v410_v53 = vpop.permute.xlu0 %409 }
 0xb1d   :  { %430 = vmatpush.msra.mxu0 %v410_v53 }
 0xb1e   :  { %3508 = vmatmul.msk.f32.vlgmr.msra.gmra.mxu0 %vm5112_vm0, %v3507_v52 }
 0xb9b   :  { %v432_v54 = vpop.f32.mrf.mxu0 }
 0xb9c   :  { %3510 = vmatmul.msk.f32.vlgmr.msra.gmra.mxu2 %vm5111_vm1, %v432_v54 }
 0xc1f   :  { %v457_v56 = vpop.f32.mrf.mxu2 }
 0xc20   :  { %v460_v57 = vadd.f32 %v3509_v55, %v457_v56 }
 0xc22   :  { %3650 = vtanh.f32 %v460_v57  ;;  %v3511_v59 = vmul.f32 -1.442695, %v460_v57 }
 0xc24   :  { %3652 = vpow2.f32 %v3511_v59 }
 0xc28   :  { %v3651_v58 = vpop.eup %3650 }
 0xc29   :  { %483 = vrot.lane.b32.xlu1 %v3651_v58, %s3803_s2 }
 0xc2a   :  { %v3653_v60 = vpop.eup %3652 }
 0xc2b   :  { %v464_v61 = vadd.f32 1.0, %v3653_v60 }
 0xc2d   :  { %3654 = vrcp.f32 %v464_v61  ;;  %v476_v7 = vand.u32 2147483648, %v464_v61  ;;  %vm470_vm5 = vweird.f32 %v464_v61  ;;  %v474_v8 = vand.u32 2147483647, %v464_v61 }
 0xc2f   :  { %v477_v10 = vor.u32 1.1754944e-38, %v476_v7  ;;  %vm475_vm7 = vcmp.eq.f32.partialorder %v474_v8, 8.507059e+37 }
 0xc33   :  { %v3655_v62 = vpop.eup %3654 }
 0xc34   :  { %v466_v63 = vmul.f32 %v3655_v62, %v464_v61  ;;  %vm471_vm4 = vweird.f32 %v3655_v62 }
 0xc35   :  { %vm472_vm6 = vmor %vm470_vm5, %vm471_vm4 }
 0xc36   :  { %v467_v0 = vsub.f32 1.0, %v466_v63 }
 0xc38   :  { %v468_v1 = vmul.f32 %v3655_v62, %v467_v0 }
 0xc3a   :  { %v469_v6 = vadd.f32 %v3655_v62, %v468_v1 }
 0xc3c   :  { %v473_v9 = vsel %vm472_vm6, %v3655_v62, %v469_v6  ;;  %vm819_vm6 = vcmask 1041408  }
 0xc3d   :  { %v478_v12 = vsel %vm475_vm7, %v477_v10, %v473_v9  ;;  %vm5110_vm7 = vcmask 15360  }
 0xc3e   :  { %v481_v14 = vmul.f32 %v478_v12, %v399_v48 }
 0xc9b   :  { %v484_v11 = vpop.permute.xlu1 %483 }
 0xc9c   :  { %v486_v13 = vmul.f32 %v484_v11, %v478_v12 }
 0xc9e   :  { %488 = vrot.lane.b32.xlu2 %v486_v13, %s3804_s29 }
 0xcf8   :  { %v489_v15 = vpop.permute.xlu2 %488 }
 0xcf9   :  { %v491_v16 = vadd.f32 %v489_v15, %v481_v14  ;;  %v3524_v15 = vld [vmem:[%s5099_s0 + $0x38] sm:$0xff] }
 0xcfb   :  { %3656 = vtanh.f32 %v491_v16 }
 0xd01   :  { %v3657_v17 = vpop.eup %3656 }
 0xd02   :  { %494 = vrot.lane.b32.xlu0 %v3657_v17, %s3803_s2 }
 0xd74   :  { %v495_v18 = vpop.permute.xlu0 %494 }
 0xd75   :  { %v497_v19 = vmul.f32 %v495_v18, %v478_v12  ;;  %v4011_v12 = vld [vmem:[%s5097_s1 + $0x38] sm:$0xff] }
 0xd77   :  { %501 = vrot.lane.b32.xlu1 %v497_v19, %s3804_s29 }
 0xde9   :  { %v502_v21 = vpop.permute.xlu1 %501 }
 0xdea   :  { %522 = vmatpush.msra.mxu1 %v502_v21 }
 0xdeb   :  { %3513 = vmatmul.msk.f32.vlgmr.msra.gmra.mxu1 %vm5112_vm0, %v3512_v20 }
 0xe68   :  { %v524_v22 = vpop.f32.mrf.mxu1 }
 0xe69   :  { %3515 = vmatmul.msk.f32.vlgmr.msra.gmra.mxu3 %vm5111_vm1, %v524_v22 }
 0xeec   :  { %v549_v24 = vpop.f32.mrf.mxu3 }
 0xeed   :  { %v552_v25 = vadd.f32 %v3514_v23, %v549_v24 }
 0xeef   :  { %3658 = vtanh.f32 %v552_v25  ;;  %v3516_v27 = vmul.f32 -1.442695, %v552_v25 }
 0xef1   :  { %3660 = vpow2.f32 %v3516_v27 }
 0xef5   :  { %v3659_v26 = vpop.eup %3658 }
 0xef6   :  { %575 = vrot.lane.b32.xlu2 %v3659_v26, %s3803_s2 }
 0xef7   :  { %v3661_v28 = vpop.eup %3660 }
 0xef8   :  { %v556_v29 = vadd.f32 1.0, %v3661_v28 }
 0xefa   :  { %3662 = vrcp.f32 %v556_v29  ;;  %v568_v35 = vand.u32 2147483648, %v556_v29  ;;  %vm562_vm9 = vweird.f32 %v556_v29  ;;  %v566_v36 = vand.u32 2147483647, %v556_v29 }
 0xefc   :  { %v569_v3 = vor.u32 1.1754944e-38, %v568_v35  ;;  %vm567_vm11 = vcmp.eq.f32.partialorder %v566_v36, 8.507059e+37 }
 0xf00   :  { %v3663_v30 = vpop.eup %3662 }
 0xf01   :  { %v558_v31 = vmul.f32 %v3663_v30, %v556_v29  ;;  %vm563_vm8 = vweird.f32 %v3663_v30 }
 0xf02   :  { %vm564_vm10 = vmor %vm562_vm9, %vm563_vm8 }
 0xf03   :  { %v559_v32 = vsub.f32 1.0, %v558_v31 }
 0xf05   :  { %v560_v33 = vmul.f32 %v3663_v30, %v559_v32 }
 0xf07   :  { %v561_v34 = vadd.f32 %v3663_v30, %v560_v33 }
 0xf09   :  { %v565_v2 = vsel %vm564_vm10, %v3663_v30, %v561_v34 }
 0xf0a   :  { %v570_v4 = vsel %vm567_vm11, %v569_v3, %v565_v2 }
 0xf0b   :  { %v573_v5 = vmul.f32 %v570_v4, %v491_v16 }
 0xf50   :  { %v576_v37 = vpop.permute.xlu2 %575 }
 0xf51   :  { %v578_v38 = vmul.f32 %v576_v37, %v570_v4 }
 0xf53   :  { %580 = vrot.lane.b32.xlu0 %v578_v38, %s3804_s29  ;;  %v4031_v38 = vld [vmem:[%s5101_s3] sm:$0xff]  ;;  %s3810_s3 = smov 4  }
 0xfc5   :  { %v581_v39 = vpop.permute.xlu0 %580 }
 0xfc6   :  { %v583_v40 = vadd.f32 %v581_v39, %v573_v5  ;;  %v779_v5 = vld [vmem:[%s5102_s6 + $0x18] sm:$0xff]  ;;  %v778_v39 = vld [vmem:[%s5102_s6 + $0x10] sm:$0xff] }
 0xfc8   :  { %3664 = vtanh.f32 %v583_v40 }
 0xfce   :  { %v3665_v41 = vpop.eup %3664 }
 0xfcf   :  { %586 = vrot.lane.b32.xlu1 %v3665_v41, %s3803_s2 }
0x1041   :  { %v587_v42 = vpop.permute.xlu1 %586 }
0x1042   :  { %v589_v43 = vmul.f32 %v587_v42, %v570_v4  ;;  %v4026_v4 = vld [vmem:[%s5100_s4] sm:$0x3] }
0x1043   :  { %3528 = vmatpush.msk.msra.mxu2 %vm819_vm6, %v4026_v4  ;;  %v776_v42 = vld [vmem:[%s5102_s6] sm:$0xff] }
0x1044   :  { %593 = vrot.lane.b32.xlu2 %v589_v43, %s3804_s29 }
0x109e   :  { %v594_v45 = vpop.permute.xlu2 %593 }
0x109f   :  { %614 = vmatpush.msrb.mxu0 %v594_v45 }
0x10a0   :  { %3518 = vmatmul.msk.f32.vlgmr.msrb.gmra.mxu0 %vm5112_vm0, %v3517_v44  ;;  %v3616_v44 = vld [vmem:[%s5103_s5] ss:$0 sm:$0xff] }
0x111d   :  { %v616_v46 = vpop.f32.mrf.mxu0 }
0x111e   :  { %3520 = vmatmul.msk.f32.vlgmr.msrb.gmra.mxu2 %vm5111_vm1, %v616_v46 }
0x111f   :  { %3538 = vmatpush.msk.msrb.mxu2 %vm819_vm6, %v4026_v4 }
0x1126   :  { %3529 = vmatmul.msk.f32.vlgmr.msra.gmra.mxu2 %vm5110_vm7, %v4031_v38 }
0x1127   :  { %3548 = vmatpush.msk.msra.mxu2 %vm819_vm6, %v4026_v4 }
0x11a1   :  { %v641_v48 = vpop.f32.mrf.mxu2 }
0x11a2   :  { %v644_v49 = vadd.f32 %v3519_v47, %v641_v48 }
0x11a4   :  { %3666 = vtanh.f32 %v644_v49  ;;  %v3521_v51 = vmul.f32 -1.442695, %v644_v49 }
0x11a6   :  { %3668 = vpow2.f32 %v3521_v51 }
0x11a9   :  { %v840_v45 = vpop.f32.mrf.mxu2 }
0x11aa   :  { %v3667_v50 = vpop.eup %3666  ;;  %v841_v46 = vadd.f32 %v3616_v44, %v840_v45  ;;  %v3808_v45 = vmov 0  }
0x11ab   :  { %667 = vrot.lane.b32.xlu0 %v3667_v50, %s3803_s2  ;;  %3588 = vset.pattern.permute.xlu2 %v3808_v45 }
0x11ac   :  { %v3669_v52 = vpop.eup %3668 }
0x11ad   :  { %v648_v53 = vadd.f32 1.0, %v3669_v52 }
0x11af   :  { %3670 = vrcp.f32 %v648_v53  ;;  %v660_v59 = vand.u32 2147483648, %v648_v53  ;;  %vm654_vm13 = vweird.f32 %v648_v53  ;;  %v658_v60 = vand.u32 2147483647, %v648_v53 }
0x11b1   :  { %v661_v62 = vor.u32 1.1754944e-38, %v660_v59  ;;  %vm659_vm15 = vcmp.eq.f32.partialorder %v658_v60, 8.507059e+37 }
0x11b5   :  { %v3671_v54 = vpop.eup %3670 }
0x11b6   :  { %v650_v55 = vmul.f32 %v3671_v54, %v648_v53  ;;  %vm655_vm12 = vweird.f32 %v3671_v54 }
0x11b7   :  { %vm656_vm14 = vmor %vm654_vm13, %vm655_vm12 }
0x11b8   :  { %v651_v56 = vsub.f32 1.0, %v650_v55 }
0x11ba   :  { %v652_v57 = vmul.f32 %v3671_v54, %v651_v56 }
0x11bc   :  { %v653_v58 = vadd.f32 %v3671_v54, %v652_v57 }
0x11be   :  { %v657_v61 = vsel %vm656_vm14, %v3671_v54, %v653_v58 }
0x11bf   :  { %v662_v0 = vsel %vm659_vm15, %v661_v62, %v657_v61 }
0x11c0   :  { %v665_v6 = vmul.f32 %v662_v0, %v583_v40  ;;  %v777_v40 = vld [vmem:[%s5102_s6 + $0x8] sm:$0xff] }
0x121d   :  { %v668_v63 = vpop.permute.xlu0 %667 }
0x121e   :  { %v670_v1 = vmul.f32 %v668_v63, %v662_v0 }
0x1220   :  { %672 = vrot.lane.b32.xlu1 %v670_v1, %s3804_s29 }
0x1292   :  { %v673_v7 = vpop.permute.xlu1 %672 }
0x1293   :  { %v675_v8 = vadd.f32 %v673_v7, %v665_v6 }
0x1295   :  { %3672 = vtanh.f32 %v675_v8 }
0x129b   :  { %v3673_v9 = vpop.eup %3672 }
0x129c   :  { %678 = vrot.lane.b32.xlu2 %v3673_v9, %s3803_s2  ;;  %v783_v9 = vld [vmem:[%s5105_s7 + $0x18] sm:$0xff] }
0x129d   :  { %924 = vmatpush.msra.mxu3 %v783_v9 }
0x12f6   :  { %v679_v10 = vpop.permute.xlu2 %678 }
0x12f7   :  { %v681_v11 = vmul.f32 %v679_v10, %v662_v0  ;;  %v782_v10 = vld [vmem:[%s5105_s7 + $0x10] sm:$0xff] }
0x12f8   :  { %925 = vmatpush.msra.mxu3 %v782_v10 }
0x12f9   :  { %685 = vrot.lane.b32.xlu0 %v681_v11, %s3804_s29  ;;  %v781_v11 = vld [vmem:[%s5105_s7 + $0x8] sm:$0xff] }
0x12fa   :  { %926 = vmatpush.msra.mxu3 %v781_v11 }
0x136b   :  { %v686_v13 = vpop.permute.xlu0 %685 }
0x136c   :  { %706 = vmatpush.msrb.mxu1 %v686_v13 }
0x136d   :  { %3523 = vmatmul.msk.f32.vlgmr.msrb.gmra.mxu1 %vm5112_vm0, %v4011_v12 }
0x136e   :  { %858 = vmatpush.msra.mxu1 %v779_v5 }
0x1370   :  { %859 = vmatpush.msra.mxu1 %v778_v39 }
0x1372   :  { %860 = vmatpush.msra.mxu1 %v777_v40 }
0x1374   :  { %861 = vmatpush.msra.mxu1 %v776_v42 }
0x1376   :  { %1761 = vmatpush.msrb.mxu1 %v779_v5 }
0x1378   :  { %1762 = vmatpush.msrb.mxu1 %v778_v39 }
0x137a   :  { %1763 = vmatpush.msrb.mxu1 %v777_v40 }
0x137c   :  { %1764 = vmatpush.msrb.mxu1 %v776_v42 }
0x13ea   :  { %v708_v14 = vpop.f32.mrf.mxu1 }
0x13eb   :  { %3525 = vmatmul.msk.f32.vlgmr.msrb.gmra.mxu3 %vm5111_vm1, %v708_v14 }
0x146e   :  { %v733_v16 = vpop.f32.mrf.mxu3 }
0x146f   :  { %v736_v17 = vadd.f32 %v3524_v15, %v733_v16  ;;  %v3617_v16 = vld [vmem:[%s5104_s8] ss:$0 sm:$0xff] }
0x1471   :  { %3674 = vtanh.f32 %v736_v17  ;;  %v3526_v19 = vmul.f32 -1.442695, %v736_v17 }
0x1473   :  { %3676 = vpow2.f32 %v3526_v19 }
0x1477   :  { %v3675_v18 = vpop.eup %3674 }
0x1478   :  { %759 = vrot.lane.b32.xlu1 %v3675_v18, %s3803_s2 }
0x1479   :  { %v3677_v20 = vpop.eup %3676 }
0x147a   :  { %v740_v21 = vadd.f32 1.0, %v3677_v20 }
0x147c   :  { %3678 = vrcp.f32 %v740_v21  ;;  %v752_v27 = vand.u32 2147483648, %v740_v21  ;;  %vm746_vm3 = vweird.f32 %v740_v21  ;;  %v750_v28 = vand.u32 2147483647, %v740_v21 }
0x147e   :  { %v753_v30 = vor.u32 1.1754944e-38, %v752_v27  ;;  %vm751_vm5 = vcmp.eq.f32.partialorder %v750_v28, 8.507059e+37 }
0x1482   :  { %v3679_v22 = vpop.eup %3678 }
0x1483   :  { %v742_v23 = vmul.f32 %v3679_v22, %v740_v21  ;;  %vm747_vm2 = vweird.f32 %v3679_v22 }
0x1484   :  { %vm748_vm4 = vmor %vm746_vm3, %vm747_vm2 }
0x1485   :  { %v743_v24 = vsub.f32 1.0, %v742_v23 }
0x1487   :  { %v744_v25 = vmul.f32 %v3679_v22, %v743_v24 }
0x1489   :  { %v745_v26 = vadd.f32 %v3679_v22, %v744_v25 }
0x148b   :  { %v749_v29 = vsel %vm748_vm4, %v3679_v22, %v745_v26 }
0x148c   :  { %v754_v32 = vsel %vm751_vm5, %v753_v30, %v749_v29  ;;  %v3807_v29 = vmov 1  }
0x148d   :  { %v757_v34 = vmul.f32 %v754_v32, %v675_v8  ;;  %3589 = vset.pattern.permute.xlu0 %v3807_v29 }
0x14ea   :  { %v760_v31 = vpop.permute.xlu1 %759 }
0x14eb   :  { %v762_v33 = vmul.f32 %v760_v31, %v754_v32 }
0x14ed   :  { %764 = vrot.lane.b32.xlu2 %v762_v33, %s3804_s29 }
0x1547   :  { %v765_v35 = vpop.permute.xlu2 %764 }
0x1548   :  { %v767_v36 = vadd.f32 %v765_v35, %v757_v34 }
0x154a   :  { %3680 = vtanh.f32 %v767_v36 }
0x1550   :  { %v3681_v2 = vpop.eup %3680 }
0x1551   :  { %770 = vrot.lane.b32.xlu0 %v3681_v2, %s3803_s2 }
0x15c3   :  { %v771_v3 = vpop.permute.xlu0 %770 }
0x15c4   :  { %v773_v37 = vmul.f32 %v771_v3, %v754_v32 }
0x15c6   :  { %789 = vrot.lane.b32.xlu1 %v773_v37, %s3804_s29 }
0x1638   :  { %v790_v41 = vpop.permute.xlu1 %789 }
0x1639   :  { %807 = vmatpush.msra.mxu0 %v790_v41 }
0x163a   :  { %3527 = vmatmul.msk.f32.vlgmr.msra.gmra.mxu0 %vm5112_vm0, %v4011_v12  ;;  %v780_v12 = vld [vmem:[%s5105_s7] sm:$0xff] }
0x163b   :  { %927 = vmatpush.msra.mxu3 %v780_v12 }
0x163d   :  { %1824 = vmatpush.msrb.mxu3 %v783_v9 }
0x163f   :  { %1825 = vmatpush.msrb.mxu3 %v782_v10 }
0x1641   :  { %1826 = vmatpush.msrb.mxu3 %v781_v11 }
0x1643   :  { %1827 = vmatpush.msrb.mxu3 %v780_v12 }
0x16b7   :  { %v809_v43 = vpop.f32.mrf.mxu0 }
0x16b8   :  { %3530 = vmatmul.msk.f32.vlgmr.msra.gmra.mxu1 %vm5111_vm1, %v809_v43 }
0x16b9   :  { %2584 = vmatpush.msra.mxu1 %v779_v5 }
0x16bb   :  { %2585 = vmatpush.msra.mxu1 %v778_v39 }
0x16bd   :  { %2586 = vmatpush.msra.mxu1 %v777_v40 }
0x16bf   :  { %2587 = vmatpush.msra.mxu1 %v776_v42 }
0x1735   :  { %v863_v47 = vpop.f32.mrf.mxu1 }
0x1736   :  { %v866_v48 = vadd.f32 %v863_v47, %v841_v46 }
0x1738   :  { %3682 = vtanh.f32 %v866_v48  ;;  %v3531_v50 = vmul.f32 -1.442695, %v866_v48 }
0x173a   :  { %3684 = vpow2.f32 %v3531_v50 }
0x173e   :  { %v3683_v49 = vpop.eup %3682 }
0x173f   :  { %889 = vrot.lane.b32.xlu2 %v3683_v49, %s3803_s2 }
0x1740   :  { %v3685_v51 = vpop.eup %3684 }
0x1741   :  { %v870_v52 = vadd.f32 1.0, %v3685_v51 }
0x1743   :  { %3686 = vrcp.f32 %v870_v52  ;;  %v882_v58 = vand.u32 2147483648, %v870_v52  ;;  %vm876_vm9 = vweird.f32 %v870_v52  ;;  %v880_v59 = vand.u32 2147483647, %v870_v52 }
0x1745   :  { %v883_v61 = vor.u32 1.1754944e-38, %v882_v58  ;;  %vm881_vm11 = vcmp.eq.f32.partialorder %v880_v59, 8.507059e+37 }
0x1749   :  { %v3687_v53 = vpop.eup %3686 }
0x174a   :  { %v872_v54 = vmul.f32 %v3687_v53, %v870_v52  ;;  %vm877_vm8 = vweird.f32 %v3687_v53 }
0x174b   :  { %vm878_vm10 = vmor %vm876_vm9, %vm877_vm8 }
0x174c   :  { %v873_v55 = vsub.f32 1.0, %v872_v54 }
0x174e   :  { %v874_v56 = vmul.f32 %v3687_v53, %v873_v55 }
0x1750   :  { %v875_v57 = vadd.f32 %v3687_v53, %v874_v56 }
0x1752   :  { %v879_v60 = vsel %vm878_vm10, %v3687_v53, %v875_v57 }
0x1753   :  { %v884_v63 = vsel %vm881_vm11, %v883_v61, %v879_v60 }
0x1754   :  { %v887_v1 = vmul.f32 0.0, %v884_v63 }
0x1799   :  { %v890_v62 = vpop.permute.xlu2 %889 }
0x179a   :  { %v892_v0 = vmul.f32 %v890_v62, %v884_v63 }
0x179c   :  { %894 = vrot.lane.b32.xlu0 %v892_v0, %s3804_s29  ;;  %v1175_v0 = vlaneseq }
0x180e   :  { %v895_v6 = vpop.permute.xlu0 %894 }
0x180f   :  { %v4061_v7 = vadd.f32 %v895_v6, %v887_v1  ;;  %v4117_v1 = vshrl.u32 %v1175_v0, 7 }
0x1811   :  { %3688 = vtanh.f32 %v4061_v7 }
0x1817   :  { %v3689_v8 = vpop.eup %3688 }
0x1818   :  { %900 = vrot.lane.b32.xlu1 %v3689_v8, %s3803_s2 }
0x188a   :  { %v901_v13 = vpop.permute.xlu1 %900 }
0x188b   :  { %v903_v14 = vmul.f32 %v901_v13, %v884_v63 }
0x188d   :  { %908 = vrot.lane.b32.xlu2 %v903_v14, %s3804_s29 }
0x18e7   :  { %v909_v15 = vpop.permute.xlu2 %908 }
0x18e8   :  { %3532 = vmatmul.msk.f32.vlgmr.msra.gmra.mxu3 %vm5111_vm1, %v909_v15  ;;  %1719 = vmatpush.msrb.mxu0 %v909_v15 }
0x18e9   :  { %2647 = vmatpush.msra.mxu3 %v783_v9 }
0x18eb   :  { %2648 = vmatpush.msra.mxu3 %v782_v10 }
0x18ed   :  { %2649 = vmatpush.msra.mxu3 %v781_v11 }
0x18ef   :  { %2650 = vmatpush.msra.mxu3 %v780_v12 }
0x196b   :  { %v929_v17 = vpop.f32.mrf.mxu3 }
0x196c   :  { %v930_v18 = vadd.f32 %v3617_v16, %v929_v17 }
0x196e   :  { %3690 = vtanh.f32 %v930_v18 }
0x1974   :  { %v4082_v19 = vpop.eup %3690 }
0x1975   :  { %3539 = vmatmul.msk.f32.vlgmr.msrb.gmra.mxu2 %vm5110_vm7, %v4082_v19  ;;  %v4088_v20 = vsub.f32 %v4082_v19, %v4031_v38  ;;  %933 = vst.msk [vmem:[%s5106_s11] sm:$0xff] %vm5110_vm7, %v4082_v19 }
0x1976   :  { %3558 = vmatpush.msk.msrb.mxu2 %vm819_vm6, %v4026_v4 }
0x1977   :  { %v935_v21 = vand.u32 2147483647, %v4088_v20  ;;  %vm982_vm3 = vcmp.lt.f32.partialorder %v4088_v20, 0.0 }
0x1979   :  { %968 = vrot.lane.b32.xlu1 %v935_v21, %s3805_s23  ;;  %937 = vrot.lane.b32.xlu0 %v935_v21, %s3806_s24 }
0x19eb   :  { %v938_v22 = vpop.permute.xlu0 %937  ;;  %v969_v46 = vpop.permute.xlu1 %968 }
0x19ec   :  { %v940_v23 = vmax.f32 %v935_v21, %v938_v22  ;;  %v941_v34 = vmin.f32 %v935_v21, %v938_v22  ;;  %vm971_vm2 = vcmp.gt.f32.partialorder %v935_v21, %v969_v46 }
0x19ee   :  { %v942_v24 = vadd.f32 1e-30, %v940_v23 }
0x19f0   :  { %3692 = vrcp.f32 %v942_v24  ;;  %v954_v28 = vand.u32 2147483648, %v942_v24  ;;  %v952_v31 = vand.u32 2147483647, %v942_v24  ;;  %vm948_vm13 = vweird.f32 %v942_v24 }
0x19f2   :  { %v955_v33 = vor.u32 1.1754944e-38, %v954_v28  ;;  %vm953_vm15 = vcmp.eq.f32.partialorder %v952_v31, 8.507059e+37 }
0x19f6   :  { %v3693_v25 = vpop.eup %3692 }
0x19f7   :  { %v944_v26 = vmul.f32 %v3693_v25, %v942_v24  ;;  %vm949_vm12 = vweird.f32 %v3693_v25 }
0x19f8   :  { %vm950_vm14 = vmor %vm948_vm13, %vm949_vm12 }
0x19f9   :  { %v945_v27 = vsub.f32 1.0, %v944_v26 }
0x19fb   :  { %v946_v30 = vmul.f32 %v3693_v25, %v945_v27 }
0x19fd   :  { %v947_v32 = vadd.f32 %v3693_v25, %v946_v30 }
0x19ff   :  { %v951_v35 = vsel %vm950_vm14, %v3693_v25, %v947_v32 }
0x1a00   :  { %v956_v36 = vsel %vm953_vm15, %v955_v33, %v951_v35  ;;  %vm5109_vm15 = vcmask 130048  }
0x1a01   :  { %v957_v2 = vmul.f32 %v956_v36, %v941_v34 }
0x1a03   :  { %v958_v3 = vmul.f32 %v957_v2, %v957_v2 }
0x1a05   :  { %v959_v37 = vmul.f32 0.0208351, %v958_v3 }
0x1a07   :  { %v3533_v4 = vadd.f32 -0.085133, %v959_v37 }
0x1a09   :  { %v961_v38 = vmul.f32 %v3533_v4, %v958_v3 }
0x1a0b   :  { %v962_v5 = vadd.f32 0.180141, %v961_v38 }
0x1a0d   :  { %v963_v39 = vmul.f32 %v962_v5, %v958_v3 }
0x1a0f   :  { %v3534_v40 = vadd.f32 -0.3302995, %v963_v39 }
0x1a11   :  { %v965_v41 = vmul.f32 %v3534_v40, %v958_v3 }
0x1a13   :  { %v966_v42 = vadd.f32 0.999866, %v965_v41 }
0x1a15   :  { %v967_v43 = vmul.f32 %v966_v42, %v957_v2 }
0x1a17   :  { %978 = vrot.lane.b32.xlu0 %v967_v43, %s3805_s23  ;;  %v972_v44 = vsub.f32 1.5707964, %v967_v43 }
0x1a19   :  { %974 = vrot.lane.b32.xlu2 %v972_v44, %s3805_s23 }
0x1a1f   :  { %1085 = vperm.xlu0 %3589, %v4082_v19  }
0x1a27   :  { %3592 = vset.pattern.permute.xlu0 %v4117_v1 }
0x1a73   :  { %v975_v47 = vpop.permute.xlu2 %974 }
0x1a89   :  { %v979_v48 = vpop.permute.xlu0 %978 }
0x1a8a   :  { %v981_v49 = vsel %vm971_vm2, %v975_v47, %v979_v48  ;;  %v786_v47 = vld [vmem:[%s5107_s10] sm:$0xff] }
0x1a8b   :  { %989 = vrot.lane.b32.xlu2 %v981_v49, %s3806_s24  ;;  %v983_v50 = vsub.f32 3.1415927, %v981_v49 }
0x1a8d   :  { %985 = vrot.lane.b32.xlu1 %v983_v50, %s3806_s24  ;;  %v1386_v50 = vperm.slane %v786_v47, 0 }
0x1a91   :  { %v1086_v55 = vpop.permute.xlu0 %1085 }
0x1a93   :  { %1079 = vperm.xlu2 %3588, %v4082_v19  }
0x1a9b   :  { %3590 = vset.pattern.permute.xlu2 %v4117_v1 }
0x1ae5   :  { %v990_v51 = vpop.permute.xlu2 %989 }
0x1aed   :  { %v1080_v10 = vpop.permute.xlu2 %1079 }
0x1aff   :  { %v986_v52 = vpop.permute.xlu1 %985 }
0x1b00   :  { %v992_v53 = vsel %vm982_vm3, %v986_v52, %v990_v51 }
0x1b01   :  { %999 = vrot.lane.b32.xlu1 %v992_v53, %s3805_s23  ;;  %v993_v54 = vsub.f32 0.0, %v992_v53 }
0x1b03   :  { %995 = vrot.lane.b32.xlu0 %v993_v54, %s3805_s23 }
0x1b36   :  { %1008 = vxpose.xlu1.b32.start.end [1/1] (short) (narrow) %v4082_v19, 8 }
0x1b73   :  { %v1000_v56 = vpop.permute.xlu1 %999 }
0x1b75   :  { %v996_v57 = vpop.permute.xlu0 %995 }
0x1b76   :  { %v1002_v58 = vsel %vm982_vm3, %v996_v57, %v1000_v56 }
0x1b77   :  { %v1003_v59 = vmul.f32 57.29578, %v1002_v58 }
0x1b79   :  { %v1004_v60 = vmul.f32 0.0027777778, %v1003_v59 }
0x1b7b   :  { %v1005_v61 = vfloor.f32 %v1004_v60 }
0x1b7d   :  { %v1006_v62 = vmul.f32 360.0, %v1005_v61 }
0x1b7f   :  { %v4112_v63 = vsub.f32 %v1003_v59, %v1006_v62 }
0x1b81   :  { %1041 = vrot.lane.b32.xlu2 %v4112_v63, %s3806_s24 }
0x1b89   :  { %3591 = vset.pattern.permute.xlu1 %v4117_v1 }
0x1bda   :  { %v1024_v6 = vpop.trf.xlu1 }
0x1bdb   :  { %v1076_v8 = vperm.slane %v1024_v6, 0  ;;  %v1083_v9 = vperm.slane %v1024_v6, 1 }
0x1bdd   :  { %v4122_v11 = vsub.f32 %v1076_v8, %v1080_v10  ;;  %v4124_v12 = vsub.f32 %v1083_v9, %v1086_v55 }
0x1bdf   :  { %v1089_v13 = vmul.f32 %v4122_v11, %v4122_v11  ;;  %v1090_v14 = vmul.f32 %v4124_v12, %v4124_v12  ;;  %v4131_v15 = vand.u32 2147483647, %v4122_v11  ;;  %v4134_v16 = vand.u32 2147483647, %v4124_v12 }
0x1be0   :  { %vm1138_vm12 = vcmp.lt.f32.partialorder %v4122_v11, 0.0  ;;  %vm1141_vm13 = vcmp.lt.f32.partialorder %v4124_v12, 0.0 }
0x1be1   :  { %v1091_v17 = vadd.f32 %v1090_v14, %v1089_v13  ;;  %v1107_v18 = vmax.f32 %v4131_v15, %v4134_v16  ;;  %v1108_v20 = vmin.f32 %v4131_v15, %v4134_v16  ;;  %vm1135_vm4 = vcmp.gt.f32.partialorder %v4134_v16, %v4131_v15 }
0x1be2   :  { %v1414_v13 = vperm.slane %v786_v47, 4  ;;  %v1428_v14 = vperm.slane %v786_v47, 6  ;;  %v1400_v15 = vperm.slane %v786_v47, 2 }
0x1be3   :  { %v1092_v21 = vadd.f32 1e-12, %v1091_v17  ;;  %v1109_v22 = vadd.f32 1e-30, %v1107_v18  ;;  %v1042_v17 = vpop.permute.xlu2 %1041 }
0x1be5   :  { %3694 = vrsqrt.f32 %v1092_v21  ;;  %v1121_v30 = vand.u32 2147483648, %v1109_v22  ;;  %v1119_v33 = vand.u32 2147483647, %v1109_v22  ;;  %vm1115_vm6 = vweird.f32 %v1109_v22 }
0x1be6   :  { %3696 = vrcp.f32 %v1109_v22  ;;  %vm1100_vm10 = vcmp.eq.f32.partialorder %v1092_v21, inf  ;;  %v1103_v5 = vand.u32 2147483648, %v1092_v21  ;;  %vm1102_vm11 = vcmp.eq.f32.partialorder %v1092_v21, 0.0 }
0x1be7   :  { %v1122_v36 = vor.u32 1.1754944e-38, %v1121_v30  ;;  %vm1120_vm9 = vcmp.eq.f32.partialorder %v1119_v33, 8.507059e+37  ;;  %v1393_v30 = vperm.slane %v786_v47, 1 }
0x1beb   :  { %v3695_v23 = vpop.eup %3694 }
0x1bec   :  { %v3697_v24 = vpop.eup %3696  ;;  %v1094_v25 = vmul.f32 %v3695_v23, %v1092_v21 }
0x1bed   :  { %v1111_v26 = vmul.f32 %v3697_v24, %v1109_v22  ;;  %vm1116_vm5 = vweird.f32 %v3697_v24 }
0x1bee   :  { %v1095_v27 = vmul.f32 %v3695_v23, %v1094_v25  ;;  %vm1117_vm8 = vmor %vm1115_vm6, %vm1116_vm5 }
0x1bef   :  { %v1112_v28 = vsub.f32 1.0, %v1111_v26 }
0x1bf0   :  { %v1096_v31 = vmul.f32 0.5, %v1095_v27 }
0x1bf1   :  { %v1113_v32 = vmul.f32 %v3697_v24, %v1112_v28  ;;  %v1435_v28 = vperm.slane %v786_v47, 7 }
0x1bf2   :  { %v1097_v34 = vsub.f32 1.5, %v1096_v31 }
0x1bf3   :  { %v1114_v35 = vadd.f32 %v3697_v24, %v1113_v32 }
0x1bf4   :  { %v1098_v2 = vmul.f32 %v3695_v23, %v1097_v34  ;;  %v1421_v23 = vperm.slane %v786_v47, 5 }
0x1bf5   :  { %v1118_v3 = vsel %vm1117_vm8, %v3697_v24, %v1114_v35 }
0x1bf6   :  { %v1123_v37 = vsel %vm1120_vm9, %v1122_v36, %v1118_v3  ;;  %v1099_v4 = vmul.f32 %v1098_v2, %v1092_v21 }
0x1bf7   :  { %v1124_v38 = vmul.f32 %v1123_v37, %v1108_v20  ;;  %v1407_v20 = vperm.slane %v786_v47, 3 }
0x1bf8   :  { %v1101_v39 = vsel %vm1100_vm10, %v1092_v21, %v1099_v4 }
0x1bf9   :  { %v1125_v40 = vmul.f32 %v1124_v38, %v1124_v38  ;;  %v1104_v41 = vsel %vm1102_vm11, %v1103_v5, %v1101_v39 }
0x1bfa   :  { %v1312_v42 = vperm.slane %v1104_v41, 1  ;;  %v1326_v43 = vperm.slane %v1104_v41, 3  ;;  %v1305_v44 = vperm.slane %v1104_v41, 0  ;;  %v1319_v52 = vperm.slane %v1104_v41, 2 }
0x1bfb   :  { %v1126_v46 = vmul.f32 0.0208351, %v1125_v40  ;;  %v1340_v57 = vperm.slane %v1104_v41, 5  ;;  %v1347_v58 = vperm.slane %v1104_v41, 6  ;;  %v1354_v6 = vperm.slane %v1104_v41, 7 }
0x1bfc   :  { %1317 = vperm.xlu1 %3591, %v1312_v42   ;;  %1331 = vperm.xlu0 %3592, %v1326_v43   ;;  %v1333_v9 = vperm.slane %v1104_v41, 4 }
0x1bfd   :  { %1310 = vperm.xlu2 %3590, %v1305_v44   ;;  %v3535_v48 = vadd.f32 -0.085133, %v1126_v46 }
0x1bff   :  { %v1128_v49 = vmul.f32 %v3535_v48, %v1125_v40 }
0x1c01   :  { %v1129_v51 = vadd.f32 0.180141, %v1128_v49 }
0x1c03   :  { %v1130_v53 = vmul.f32 %v1129_v51, %v1125_v40 }
0x1c04   :  { %1324 = vperm.xlu1 %3591, %v1319_v52   ;;  %1391 = vperm.xlu0 %3592, %v1386_v50  }
0x1c05   :  { %3593 = vset.pattern.permute.xlu2 %v3807_v29  ;;  %v3536_v54 = vadd.f32 -0.3302995, %v1130_v53 }
0x1c06   :  { %1150 = vperm.xlu2 %3593, %v4112_v63  }
0x1c07   :  { %v1132_v55 = vmul.f32 %v3536_v54, %v1125_v40 }
0x1c09   :  { %v1133_v56 = vadd.f32 0.999866, %v1132_v55 }
0x1c0b   :  { %v1134_v59 = vmul.f32 %v1133_v56, %v1124_v38 }
0x1c0c   :  { %1345 = vperm.xlu1 %3591, %v1340_v57   ;;  %1352 = vperm.xlu0 %3592, %v1347_v58  }
0x1c0d   :  { %v1136_v60 = vsub.f32 1.5707964, %v1134_v59 }
0x1c0e   :  { %3594 = vset.pattern.permute.xlu2 %v4117_v1 }
0x1c0f   :  { %v1137_v61 = vsel %vm1135_vm4, %v1136_v60, %v1134_v59 }
0x1c10   :  { %v1139_v62 = vsub.f32 3.1415927, %v1137_v61 }
0x1c12   :  { %v1140_v8 = vsel %vm1138_vm12, %v1139_v62, %v1137_v61 }
0x1c13   :  { %v1142_v63 = vsub.f32 0.0, %v1140_v8 }
0x1c14   :  { %1359 = vperm.xlu0 %3592, %v1354_v6   ;;  %1405 = vperm.xlu1 %3591, %v1400_v15  }
0x1c15   :  { %v1143_v10 = vsel %vm1141_vm13, %v1142_v63, %v1140_v8 }
0x1c16   :  { %1338 = vperm.xlu2 %3594, %v1333_v9   ;;  %v1144_v21 = vmul.f32 57.29578, %v1143_v10 }
0x1c18   :  { %v1145_v22 = vmul.f32 0.0027777778, %v1144_v21 }
0x1c1a   :  { %v1146_v25 = vfloor.f32 %v1145_v22 }
0x1c1c   :  { %1419 = vperm.xlu0 %3592, %v1414_v13   ;;  %1412 = vperm.xlu1 %3591, %v1407_v20   ;;  %v1147_v27 = vmul.f32 360.0, %v1146_v25  ;;  %v785_v20 = vld [vmem:[%s5108_s9] sm:$0x3] }
0x1c1d   :  { %v4191_v22 = vperm.slane %v785_v20, 0 }
0x1c1e   :  { %1398 = vperm.xlu2 %3594, %v1393_v30   ;;  %v1148_v32 = vsub.f32 %v1144_v21, %v1147_v27 }
0x1c24   :  { %1433 = vperm.xlu0 %3592, %v1428_v14   ;;  %1426 = vperm.xlu1 %3591, %v1421_v23   ;;  %v4193_v23 = vperm.slane %v785_v20, 1 }
0x1c2c   :  { %1440 = vperm.xlu1 %3591, %v1435_v28  }
0x1c46   :  { %1044 = vxpose.xlu0.b32.start.end [1/1] (short) (narrow) %v1042_v17, 8  ;;  %v4181_v17 = vand.u32 127, %v1175_v0 }
0x1c48   :  { %v4189_v21 = vadd.s32 128, %v4181_v17 }
0x1c57   :  { %v4161_v24 = vpop.permute.xlu2 %1310 }
0x1c60   :  { %v1151_v31 = vpop.permute.xlu2 %1150 }
0x1c61   :  { %v1153_v33 = vsub.f32 %v1148_v32, %v1151_v31 }
0x1c63   :  { %v1154_v35 = vmul.f32 0.0027777778, %v1153_v33 }
0x1c65   :  { %v1155_v36 = vfloor.f32 %v1154_v35 }
0x1c67   :  { %v1156_v3 = vmul.f32 360.0, %v1155_v36 }
0x1c69   :  { %v1157_v38 = vsub.f32 %v1153_v33, %v1156_v3 }
0x1c6b   :  { %v1168_v40 = vmul.f32 0.033333335, %v1157_v38 }
0x1c6d   :  { %v1169_v43 = vfloor.f32 %v1168_v40 }
0x1c6e   :  { %v4153_v16 = vpop.permute.xlu0 %1331  ;;  %v4170_v63 = vpop.permute.xlu1 %1317 }
0x1c6f   :  { %v1170_v47 = vmax.f32 %v1169_v43, 0.0 }
0x1c70   :  { %v4174_v10 = vpop.permute.xlu2 %1338 }
0x1c71   :  { %v1171_v50 = vmin.f32 %v1170_v47, 11.0 }
0x1c76   :  { %v4155_v11 = vpop.permute.xlu0 %1391  ;;  %v4172_v9 = vpop.permute.xlu1 %1324 }
0x1c78   :  { %v4178_v14 = vpop.permute.xlu2 %1398 }
0x1c7e   :  { %v4157_v18 = vpop.permute.xlu0 %1352  ;;  %v4176_v13 = vpop.permute.xlu1 %1345 }
0x1c86   :  { %v4159_v12 = vpop.permute.xlu0 %1359  ;;  %v4183_v15 = vpop.permute.xlu1 %1405 }
0x1c8e   :  { %v4163_v26 = vpop.permute.xlu0 %1419  ;;  %v4200_v30 = vpop.permute.xlu1 %1412 }
0x1c96   :  { %v4165_v34 = vpop.permute.xlu0 %1433  ;;  %v4207_v3 = vpop.permute.xlu1 %1426 }
0x1cea   :  { %v1060_v2 = vpop.trf.xlu0 }
0x1ceb   :  { %v1158_v37 = vperm.slane %v1060_v2, 0 }
0x1ced   :  { %v1159_v4 = vsub.f32 %v1158_v37, %v1151_v31 }
0x1cef   :  { %v1160_v5 = vmul.f32 0.0027777778, %v1159_v4 }
0x1cf1   :  { %v1161_v39 = vfloor.f32 %v1160_v5 }
0x1cf3   :  { %v1162_v41 = vmul.f32 360.0, %v1161_v39 }
0x1cf5   :  { %v1163_v42 = vsub.f32 %v1159_v4, %v1162_v41  ;;  %v4214_v41 = vpop.permute.xlu1 %1440 }
0x1cf7   :  { %v1164_v44 = vmul.f32 0.033333335, %v1163_v42 }
0x1cf9   :  { %v1165_v46 = vfloor.f32 %v1164_v44 }
0x1cfb   :  { %v1166_v48 = vmax.f32 %v1165_v46, 0.0 }
0x1cfd   :  { %v1167_v49 = vmin.f32 %v1166_v48, 11.0 }
0x1cff   :  { %v1172_v51 = vmul.f32 12.0, %v1167_v49 }
0x1d01   :  { %v1173_v52 = vadd.f32 %v1172_v51, %v1171_v50 }
0x1d03   :  { %vm3563_vm14 = vcmp.lt.s32.totalorder %v1173_v52, 0  ;;  %v3564_v53 = vceil.f32 %v1173_v52  ;;  %v3565_v54 = vfloor.f32 %v1173_v52 }
0x1d05   :  { %v3566_v55 = vsel %vm3563_vm14, %v3564_v53, %v3565_v54 }
0x1d06   :  { %v3567_v56 = vcvt.f32.s32 %v3566_v55 }
0x1d08   :  { %v1220_v57 = vperm.slane %v3567_v56, 6  ;;  %v1213_v58 = vperm.slane %v3567_v56, 5  ;;  %v1178_v59 = vperm.slane %v3567_v56, 0  ;;  %v1185_v60 = vperm.slane %v3567_v56, 1 }
0x1d09   :  { %v1192_v61 = vperm.slane %v3567_v56, 2  ;;  %v1199_v62 = vperm.slane %v3567_v56, 3  ;;  %v1206_v6 = vperm.slane %v3567_v56, 4  ;;  %v1227_v8 = vperm.slane %v3567_v56, 7 }
0x1d0a   :  { %1225 = vperm.xlu1 %3591, %v1220_v57   ;;  %1218 = vperm.xlu0 %3592, %v1213_v58  }
0x1d0b   :  { %1183 = vperm.xlu2 %3594, %v1178_v59  }
0x1d12   :  { %3596 = vset.pattern.permute.xlu0 %v3808_v45  ;;  %3597 = vset.pattern.permute.xlu1 %v3808_v45 }
0x1d13   :  { %1190 = vperm.xlu2 %3594, %v1185_v60  }
0x1d1b   :  { %1197 = vperm.xlu2 %3594, %v1192_v61  }
0x1d23   :  { %1204 = vperm.xlu2 %3594, %v1199_v62  }
0x1d2b   :  { %1211 = vperm.xlu2 %3594, %v1206_v6  }
0x1d33   :  { %1232 = vperm.xlu2 %3594, %v1227_v8  }
0x1d3b   :  { %3595 = vset.pattern.permute.xlu2 %v3808_v45 }
0x1d65   :  { %v1184_v25 = vpop.permute.xlu2 %1183 }
0x1d66   :  { %vm1235_vm2 = vcmp.eq.s32.totalorder %v4189_v21, %v1184_v25  ;;  %vm1234_vm3 = vcmp.eq.s32.totalorder %v4181_v17, %v1184_v25 }
0x1d67   :  { %v1255_v0 = vsel %vm1234_vm3, %v4191_v22, 0.0  ;;  %v1256_v27 = vsel %vm1235_vm2, %v4193_v23, 0.0 }
0x1d68   :  { %v1272_v28 = vsel %vm5109_vm15, %v1256_v27, 0.0 }
0x1d69   :  { %v1273_v31 = vadd.f32 %v1272_v28, %v1255_v0 }
0x1d6b   :  { %1274 = vadd.xlane.f32.xlu2 %v1273_v31 }
0x1d6d   :  { %v1191_v32 = vpop.permute.xlu2 %1190 }
0x1d6e   :  { %vm1237_vm4 = vcmp.eq.s32.totalorder %v4189_v21, %v1191_v32  ;;  %vm1236_vm5 = vcmp.eq.s32.totalorder %v4181_v17, %v1191_v32 }
0x1d6f   :  { %v1257_v33 = vsel %vm1236_vm5, %v4191_v22, 0.0  ;;  %v1258_v35 = vsel %vm1237_vm4, %v4193_v23, 0.0 }
0x1d70   :  { %v1276_v36 = vsel %vm5109_vm15, %v1258_v35, 0.0 }
0x1d71   :  { %v1277_v2 = vadd.f32 %v1276_v36, %v1257_v33 }
0x1d73   :  { %1278 = vadd.xlane.f32.xlu2 %v1277_v2 }
0x1d75   :  { %v1198_v37 = vpop.permute.xlu2 %1197 }
0x1d76   :  { %vm1239_vm6 = vcmp.eq.s32.totalorder %v4189_v21, %v1198_v37  ;;  %vm1238_vm8 = vcmp.eq.s32.totalorder %v4181_v17, %v1198_v37 }
0x1d77   :  { %v1259_v4 = vsel %vm1238_vm8, %v4191_v22, 0.0  ;;  %v1260_v38 = vsel %vm1239_vm6, %v4193_v23, 0.0  ;;  %vm1498_vm6 = vcmask 1041409   ;;  %vm1500_vm8 = vcmask 1042434  }
0x1d78   :  { %v1280_v5 = vsel %vm5109_vm15, %v1260_v38, 0.0 }
0x1d79   :  { %v1281_v39 = vadd.f32 %v1280_v5, %v1259_v4 }
0x1d7b   :  { %1282 = vadd.xlane.f32.xlu2 %v1281_v39 }
0x1d7c   :  { %v1219_v40 = vpop.permute.xlu0 %1218  ;;  %v1226_v52 = vpop.permute.xlu1 %1225 }
0x1d7d   :  { %vm1244_vm9 = vcmp.eq.s32.totalorder %v4181_v17, %v1219_v40  ;;  %vm1245_vm10 = vcmp.eq.s32.totalorder %v4189_v21, %v1219_v40  ;;  %v1205_v42 = vpop.permute.xlu2 %1204  ;;  %vm1247_vm2 = vcmp.eq.s32.totalorder %v4189_v21, %v1226_v52  ;;  %vm1246_vm3 = vcmp.eq.s32.totalorder %v4181_v17, %v1226_v52 }
0x1d7e   :  { %v1266_v43 = vsel %vm1245_vm10, %v4193_v23, 0.0  ;;  %vm1241_vm11 = vcmp.eq.s32.totalorder %v4189_v21, %v1205_v42  ;;  %v1265_v44 = vsel %vm1244_vm9, %v4191_v22, 0.0  ;;  %vm1240_vm12 = vcmp.eq.s32.totalorder %v4181_v17, %v1205_v42 }
0x1d7f   :  { %v1292_v46 = vsel %vm5109_vm15, %v1266_v43, 0.0  ;;  %v1262_v47 = vsel %vm1241_vm11, %v4193_v23, 0.0  ;;  %v1261_v49 = vsel %vm1240_vm12, %v4191_v22, 0.0  ;;  %v1268_v58 = vsel %vm1247_vm2, %v4193_v23, 0.0 }
0x1d80   :  { %v1293_v48 = vadd.f32 %v1292_v46, %v1265_v44  ;;  %v1284_v50 = vsel %vm5109_vm15, %v1262_v47, 0.0  ;;  %v1267_v60 = vsel %vm1246_vm3, %v4191_v22, 0.0  ;;  %v1296_v61 = vsel %vm5109_vm15, %v1268_v58, 0.0 }
0x1d81   :  { %v1285_v51 = vadd.f32 %v1284_v50, %v1261_v49  ;;  %v1297_v20 = vadd.f32 %v1296_v61, %v1267_v60  ;;  %vm1502_vm9 = vcmask 1043459   ;;  %vm1504_vm10 = vcmask 1044484  }
0x1d82   :  { %1294 = vadd.xlane.f32.xlu0 %v1293_v48  ;;  %vm1506_vm11 = vcmask 1045509   ;;  %vm1508_vm12 = vcmask 1046534  }
0x1d83   :  { %1286 = vadd.xlane.f32.xlu2 %v1285_v51 }
0x1d85   :  { %v1212_v53 = vpop.permute.xlu2 %1211 }
0x1d86   :  { %vm1243_vm13 = vcmp.eq.s32.totalorder %v4189_v21, %v1212_v53  ;;  %vm1242_vm14 = vcmp.eq.s32.totalorder %v4181_v17, %v1212_v53 }
0x1d87   :  { %v1263_v54 = vsel %vm1242_vm14, %v4191_v22, 0.0  ;;  %v1264_v55 = vsel %vm1243_vm13, %v4193_v23, 0.0  ;;  %vm5113_vm13 = vcmask 1047559  }
0x1d88   :  { %v1288_v56 = vsel %vm5109_vm15, %v1264_v55, 0.0 }
0x1d89   :  { %v1289_v57 = vadd.f32 %v1288_v56, %v1263_v54 }
0x1d8b   :  { %1290 = vadd.xlane.f32.xlu1 %v1289_v57 }
0x1d8d   :  { %v1233_v59 = vpop.permute.xlu2 %1232 }
0x1d8e   :  { %vm1249_vm4 = vcmp.eq.s32.totalorder %v4189_v21, %v1233_v59  ;;  %vm1248_vm5 = vcmp.eq.s32.totalorder %v4181_v17, %v1233_v59 }
0x1d8f   :  { %v1269_v62 = vsel %vm1248_vm5, %v4191_v22, 0.0  ;;  %v1270_v6 = vsel %vm1249_vm4, %v4193_v23, 0.0 }
0x1d90   :  { %v1300_v8 = vsel %vm5109_vm15, %v1270_v6, 0.0 }
0x1d91   :  { %v1301_v25 = vadd.f32 %v1300_v8, %v1269_v62 }
0x1d93   :  { %1298 = vadd.xlane.f32.xlu1 %v1297_v20  ;;  %1302 = vadd.xlane.f32.xlu2 %v1301_v25 }
0x1dde   :  { %v1275_v0 = vpop.xlane.xlu2 %1274 }
0x1ddf   :  { %v1369_v27 = vsub.f32 %v1275_v0, %v4161_v24 }
0x1de1   :  { %v1377_v28 = vmax.f32 %v1369_v27, 0.0 }
0x1de3   :  { %v4243_v31 = vmul.f32 %v4155_v11, %v1377_v28 }
0x1de5   :  { %1467 = vperm.xlu2 %3595, %v4243_v31  }
0x1de6   :  { %v1279_v32 = vpop.xlane.xlu2 %1278 }
0x1de7   :  { %v1370_v33 = vsub.f32 %v1279_v32, %v4170_v63 }
0x1de9   :  { %v1378_v35 = vmax.f32 %v1370_v33, 0.0 }
0x1deb   :  { %v4248_v36 = vmul.f32 %v4178_v14, %v1378_v35 }
0x1ded   :  { %1470 = vperm.xlu0 %3596, %v4248_v36  }
0x1dee   :  { %v1283_v2 = vpop.xlane.xlu2 %1282 }
0x1def   :  { %v1371_v37 = vsub.f32 %v1283_v2, %v4172_v9 }
0x1df1   :  { %v1379_v4 = vmax.f32 %v1371_v37, 0.0 }
0x1df3   :  { %v4253_v24 = vmul.f32 %v4183_v15, %v1379_v4 }
0x1df5   :  { %1473 = vperm.xlu1 %3597, %v4253_v24   ;;  %v1295_v39 = vpop.xlane.xlu0 %1294 }
0x1df6   :  { %v1287_v38 = vpop.xlane.xlu2 %1286  ;;  %v1374_v40 = vsub.f32 %v1295_v39, %v4176_v13 }
0x1df7   :  { %v1372_v5 = vsub.f32 %v1287_v38, %v4153_v16 }
0x1df8   :  { %v1382_v9 = vmax.f32 %v1374_v40, 0.0 }
0x1df9   :  { %v1380_v63 = vmax.f32 %v1372_v5, 0.0 }
0x1dfa   :  { %v4264_v47 = vmul.f32 %v4207_v3, %v1382_v9 }
0x1dfb   :  { %v4259_v42 = vmul.f32 %v4200_v30, %v1380_v63 }
0x1dfd   :  { %1476 = vperm.xlu1 %3597, %v4259_v42  }
0x1dfe   :  { %v1291_v43 = vpop.xlane.xlu1 %1290 }
0x1dff   :  { %v1373_v44 = vsub.f32 %v1291_v43, %v4174_v10 }
0x1e01   :  { %v1381_v46 = vmax.f32 %v1373_v44, 0.0 }
0x1e03   :  { %v4267_v48 = vmul.f32 %v4163_v26, %v1381_v46 }
0x1e05   :  { %1479 = vperm.xlu0 %3596, %v4267_v48   ;;  %1482 = vperm.xlu1 %3597, %v4264_v47  }
0x1e06   :  { %v1299_v16 = vpop.xlane.xlu1 %1298  ;;  %v1303_v13 = vpop.xlane.xlu2 %1302 }
0x1e07   :  { %v1375_v49 = vsub.f32 %v1299_v16, %v4157_v18  ;;  %v1376_v50 = vsub.f32 %v1303_v13, %v4159_v12 }
0x1e09   :  { %v1383_v51 = vmax.f32 %v1375_v49, 0.0  ;;  %v1384_v52 = vmax.f32 %v1376_v50, 0.0 }
0x1e0b   :  { %v4274_v10 = vmul.f32 %v4165_v34, %v1383_v51  ;;  %v4277_v53 = vmul.f32 %v4214_v41, %v1384_v52 }
0x1e0d   :  { %1485 = vperm.xlu2 %3595, %v4274_v10   ;;  %1488 = vperm.xlu0 %3596, %v4277_v53  }
0x1e0e   :  { %3598 = vset.pattern.permute.xlu1 %v3807_v29 }
0x1e3f   :  { %v1468_v18 = vpop.permute.xlu2 %1467 }
0x1e40   :  { %v1490_v58 = vperm.slane %v1468_v18, %v4181_v17 }
0x1e5f   :  { %v1471_v55 = vpop.permute.xlu0 %1470 }
0x1e60   :  { %v1491_v12 = vperm.slane %v1471_v55, %v4181_v17 }
0x1e62   :  { %v1499_v62 = vsel %vm1498_vm6, %v1491_v12, %v1490_v58 }
0x1e67   :  { %v1474_v54 = vpop.permute.xlu1 %1473  ;;  %v1486_v27 = vpop.permute.xlu2 %1485 }
0x1e68   :  { %v1492_v57 = vperm.slane %v1474_v54, %v4181_v17  ;;  %v1496_v32 = vperm.slane %v1486_v27, %v4181_v17 }
0x1e6a   :  { %v1501_v8 = vsel %vm1500_vm8, %v1492_v57, %v1499_v62 }
0x1e6f   :  { %v1477_v56 = vpop.permute.xlu1 %1476 }
0x1e70   :  { %v1493_v59 = vperm.slane %v1477_v56, %v4181_v17 }
0x1e72   :  { %v1503_v20 = vsel %vm1502_vm9, %v1493_v59, %v1501_v8 }
0x1e77   :  { %v1480_v60 = vpop.permute.xlu0 %1479  ;;  %v1483_v61 = vpop.permute.xlu1 %1482 }
0x1e78   :  { %v1494_v6 = vperm.slane %v1480_v60, %v4181_v17  ;;  %v1495_v25 = vperm.slane %v1483_v61, %v4181_v17 }
0x1e7a   :  { %v1505_v0 = vsel %vm1504_vm10, %v1494_v6, %v1503_v20 }
0x1e7b   :  { %v1507_v28 = vsel %vm1506_vm11, %v1495_v25, %v1505_v0 }
0x1e7c   :  { %v1509_v2 = vsel %vm1508_vm12, %v1496_v32, %v1507_v28 }
0x1e7f   :  { %v1489_v33 = vpop.permute.xlu0 %1488 }
0x1e80   :  { %v1497_v35 = vperm.slane %v1489_v33, %v4181_v17 }
0x1e82   :  { %v1511_v37 = vsel %vm5113_vm13, %v1497_v35, %v1509_v2 }
0x1e83   :  { %v1513_v4 = vsel %vm5112_vm0, %v1511_v37, 0.0 }
0x1e84   :  { %1514 = vadd.xlane.f32.xlu1 %v1513_v4 }
0x1ef7   :  { %v1515_v38 = vpop.xlane.xlu1 %1514 }
0x1ef8   :  { %v4298_v5 = vadd.f32 1e-09, %v1515_v38 }
0x1efa   :  { %v1519_v39 = vperm.slane %v4298_v5, 1  ;;  %v1518_v63 = vperm.slane %v4298_v5, 0  ;;  %v4303_v40 = vperm.slane %v4298_v5, 3  ;;  %v4306_v43 = vperm.slane %v4298_v5, 2 }
0x1efb   :  { %v4309_v9 = vperm.slane %v4298_v5, 5  ;;  %v4313_v44 = vperm.slane %v4298_v5, 4  ;;  %v4318_v50 = vperm.slane %v4298_v5, 7 }
0x1efc   :  { %3698 = vrcp.f32 %v1519_v39  ;;  %v1558_v46 = vand.u32 2147483647, %v1519_v39  ;;  %v1560_v16 = vand.u32 2147483648, %v1519_v39  ;;  %v1543_v49 = vand.u32 2147483647, %v1518_v63 }
0x1efd   :  { %3700 = vrcp.f32 %v1518_v63  ;;  %vm1554_vm14 = vweird.f32 %v1519_v39  ;;  %vm1539_vm2 = vweird.f32 %v1518_v63  ;;  %v1545_v56 = vand.u32 2147483648, %v1518_v63 }
0x1efe   :  { %3702 = vrcp.f32 %v4303_v40  ;;  %vm4323_vm3 = vcmp.eq.f32.partialorder %v1558_v46, 8.507059e+37  ;;  %v1561_v57 = vor.u32 1.1754944e-38, %v1560_v16  ;;  %vm4329_vm4 = vcmp.eq.f32.partialorder %v1543_v49, 8.507059e+37 }
0x1eff   :  { %3704 = vrcp.f32 %v4306_v43  ;;  %vm1584_vm5 = vweird.f32 %v4303_v40  ;;  %v1546_v0 = vor.u32 1.1754944e-38, %v1545_v56  ;;  %v1588_v35 = vand.u32 2147483647, %v4303_v40 }
0x1f00   :  { %3706 = vrcp.f32 %v4309_v9  ;;  %v1590_v4 = vand.u32 2147483648, %v4303_v40 }
0x1f01   :  { %3708 = vrcp.f32 %v4313_v44 }
0x1f02   :  { %v3699_v13 = vpop.eup %3698  ;;  %3710 = vrcp.f32 %v4318_v50  ;;  %v1591_v61 = vor.u32 1.1754944e-38, %v1590_v4 }
0x1f03   :  { %v3701_v51 = vpop.eup %3700  ;;  %v1550_v52 = vmul.f32 %v3699_v13, %v1519_v39  ;;  %vm1555_vm15 = vweird.f32 %v3699_v13 }
0x1f04   :  { %v4321_v54 = vpop.eup %3702  ;;  %v1535_v55 = vmul.f32 %v3701_v51, %v1518_v63  ;;  %vm1540_vm7 = vweird.f32 %v3701_v51  ;;  %vm1556_vm1 = vmor %vm1554_vm14, %vm1555_vm15  ;;  %v1575_v63 = vand.u32 2147483648, %v4306_v43 }
0x1f05   :  { %v1551_v18 = vsub.f32 1.0, %v1550_v52  ;;  %v1580_v58 = vmul.f32 %v4321_v54, %v4303_v40  ;;  %v3705_v59 = vpop.eup %3704  ;;  %vm1585_vm0 = vweird.f32 %v4321_v54  ;;  %vm1541_vm13 = vmor %vm1539_vm2, %vm1540_vm7  ;;  %vm1569_vm7 = vweird.f32 %v4306_v43 }
0x1f06   :  { %v1536_v60 = vsub.f32 1.0, %v1535_v55  ;;  %v4335_v62 = vpop.eup %3706  ;;  %v1565_v20 = vmul.f32 %v3705_v59, %v4306_v43  ;;  %vm1570_vm15 = vweird.f32 %v3705_v59 }
0x1f07   :  { %v1552_v6 = vmul.f32 %v3699_v13, %v1551_v18  ;;  %v1581_v8 = vsub.f32 1.0, %v1580_v58  ;;  %v1610_v27 = vmul.f32 %v4335_v62, %v4309_v9  ;;  %v4340_v28 = vpop.eup %3708  ;;  %vm1615_vm2 = vweird.f32 %v4335_v62 }
0x1f08   :  { %v1537_v25 = vmul.f32 %v3701_v51, %v1536_v60  ;;  %v1566_v2 = vsub.f32 1.0, %v1565_v20  ;;  %v1595_v38 = vmul.f32 %v4340_v28, %v4313_v44  ;;  %v4351_v55 = vpop.eup %3710 }
0x1f09   :  { %v1553_v32 = vadd.f32 %v3699_v13, %v1552_v6  ;;  %v1582_v33 = vmul.f32 %v4321_v54, %v1581_v8  ;;  %v1611_v52 = vsub.f32 1.0, %v1610_v27  ;;  %v1640_v40 = vmul.f32 %v4351_v55, %v4318_v50 }
0x1f0a   :  { %v1538_v37 = vadd.f32 %v3701_v51, %v1537_v25  ;;  %v1567_v49 = vmul.f32 %v3705_v59, %v1566_v2  ;;  %v1596_v18 = vsub.f32 1.0, %v1595_v38  ;;  %v1620_v27 = vand.u32 2147483648, %v4309_v9 }
0x1f0b   :  { %v1557_v46 = vsel %vm1556_vm1, %v3699_v13, %v1553_v32  ;;  %v1583_v16 = vadd.f32 %v4321_v54, %v1582_v33  ;;  %vm4364_vm1 = vmor %vm1584_vm5, %vm1585_vm0  ;;  %vm1589_vm0 = vcmp.eq.f32.partialorder %v1588_v35, 8.507059e+37  ;;  %v1618_v33 = vand.u32 2147483647, %v4309_v9 }
0x1f0c   :  { %v1562_v39 = vsel %vm4323_vm3, %v1561_v57, %v1557_v46  ;;  %v1542_v56 = vsel %vm1541_vm13, %v3701_v51, %v1538_v37  ;;  %v1568_v13 = vadd.f32 %v3705_v59, %v1567_v49  ;;  %v4371_v51 = vperm.slane %v4298_v5, 6  ;;  %vm1571_vm13 = vmor %vm1569_vm7, %vm1570_vm15 }
0x1f0d   :  { %v1563_v58 = vmul.f32 %v1562_v39, %v4248_v36  ;;  %v1547_v60 = vsel %vm4329_vm4, %v1546_v0, %v1542_v56  ;;  %v1573_v36 = vand.u32 2147483647, %v4306_v43  ;;  %v1612_v57 = vmul.f32 %v4335_v62, %v1611_v52 }
0x1f0e   :  { %v1548_v6 = vmul.f32 %v1547_v60, %v4243_v31  ;;  %v1587_v31 = vsel %vm4364_vm1, %v4321_v54, %v1583_v16  ;;  %v1572_v8 = vsel %vm1571_vm13, %v3705_v59, %v1568_v13  ;;  %v1597_v20 = vmul.f32 %v4340_v28, %v1596_v18 }
0x1f0f   :  { %1666 = vperm.xlu0 %3596, %v1563_v58   ;;  %v1576_v43 = vor.u32 1.1754944e-38, %v1575_v63  ;;  %v1592_v5 = vsel %vm1589_vm0, %v1591_v61, %v1587_v31  ;;  %vm1574_vm14 = vcmp.eq.f32.partialorder %v1573_v36, 8.507059e+37  ;;  %3712 = vrcp.f32 %v4371_v51 }
0x1f10   :  { %1663 = vperm.xlu2 %3595, %v1548_v6   ;;  %v1613_v54 = vadd.f32 %v4335_v62, %v1612_v57  ;;  %v1641_v0 = vsub.f32 1.0, %v1640_v40  ;;  %v1598_v32 = vadd.f32 %v4340_v28, %v1597_v20  ;;  %vm1600_vm3 = vweird.f32 %v4340_v28 }
0x1f11   :  { %v1577_v25 = vsel %vm1574_vm14, %v1576_v43, %v1572_v8  ;;  %v1593_v59 = vmul.f32 %v1592_v5, %v4259_v42  ;;  %vm1614_vm4 = vweird.f32 %v4309_v9  ;;  %v1605_v35 = vand.u32 2147483648, %v4313_v44 }
0x1f12   :  { %v1578_v2 = vmul.f32 %v1577_v25, %v4253_v24  ;;  %vm1616_vm5 = vmor %vm1614_vm4, %vm1615_vm2  ;;  %vm1599_vm15 = vweird.f32 %v4313_v44  ;;  %v1603_v37 = vand.u32 2147483647, %v4313_v44  ;;  %v1642_v38 = vmul.f32 %v4351_v55, %v1641_v0 }
0x1f13   :  { %v1617_v4 = vsel %vm1616_vm5, %v4335_v62, %v1613_v54  ;;  %vm1601_vm1 = vmor %vm1599_vm15, %vm1600_vm3  ;;  %v1621_v46 = vor.u32 1.1754944e-38, %v1620_v27  ;;  %vm1619_vm7 = vcmp.eq.f32.partialorder %v1618_v33, 8.507059e+37  ;;  %v1606_v16 = vor.u32 1.1754944e-38, %v1605_v35 }
0x1f14   :  { %v1602_v9 = vsel %vm1601_vm1, %v4340_v28, %v1598_v32  ;;  %vm1604_vm13 = vcmp.eq.f32.partialorder %v1603_v37, 8.507059e+37  ;;  %v1643_v44 = vadd.f32 %v4351_v55, %v1642_v38  ;;  %vm1645_vm0 = vweird.f32 %v4351_v55 }
0x1f15   :  { %v3713_v42 = vpop.eup %3712  ;;  %v1622_v49 = vsel %vm1619_vm7, %v1621_v46, %v1617_v4  ;;  %v1607_v52 = vsel %vm1604_vm13, %v1606_v16, %v1602_v9  ;;  %vm1644_vm14 = vweird.f32 %v4318_v50  ;;  %v1648_v39 = vand.u32 2147483647, %v4318_v50  ;;  %v3788_v9 = vld [vmem:[%s5102_s6 + $0x18] sm:$0xff]  ;;  %v3789_v16 = vld [vmem:[%s5102_s6 + $0x10] sm:$0xff] }
0x1f16   :  { %v1625_v24 = vmul.f32 %v3713_v42, %v4371_v51  ;;  %v1650_v56 = vand.u32 2147483648, %v4318_v50  ;;  %v1623_v28 = vmul.f32 %v1622_v49, %v4264_v47  ;;  %vm1630_vm2 = vweird.f32 %v3713_v42  ;;  %vm1646_vm3 = vmor %vm1644_vm14, %vm1645_vm0  ;;  %v3791_v49 = vld [vmem:[%s5102_s6] sm:$0xff] }
0x1f17   :  { %1672 = vperm.xlu0 %3596, %v1593_v59   ;;  %v1635_v58 = vand.u32 2147483648, %v4371_v51  ;;  %v1608_v60 = vmul.f32 %v1607_v52, %v4267_v48  ;;  %v1633_v13 = vand.u32 2147483647, %v4371_v51  ;;  %v1647_v63 = vsel %vm1646_vm3, %v4351_v55, %v1643_v44  ;;  %v1743_v52 = vpop.f32.mrf.mxu2  ;;  %v3792_v44 = vld [vmem:[%s5103_s5] ss:$0 sm:$0xff] }
0x1f18   :  { %1669 = vperm.xlu2 %3595, %v1578_v2   ;;  %v1626_v62 = vsub.f32 1.0, %v1625_v24  ;;  %vm1629_vm4 = vweird.f32 %v4371_v51  ;;  %v1651_v12 = vor.u32 1.1754944e-38, %v1650_v56  ;;  %vm1649_vm15 = vcmp.eq.f32.partialorder %v1648_v39, 8.507059e+37  ;;  %v3790_v24 = vld [vmem:[%s5102_s6 + $0x8] sm:$0xff] }
0x1f19   :  { %vm1631_vm5 = vmor %vm1629_vm4, %vm1630_vm2  ;;  %v1636_v50 = vor.u32 1.1754944e-38, %v1635_v58  ;;  %vm1634_vm1 = vcmp.eq.f32.partialorder %v1633_v13, 8.507059e+37  ;;  %vm5120_vm7 = vcmask 1047559   ;;  %vm5121_vm13 = vcmask 64512  }
0x1f1a   :  { %v1627_v18 = vmul.f32 %v3713_v42, %v1626_v62  ;;  %v1652_v36 = vsel %vm1649_vm15, %v1651_v12, %v1647_v63  ;;  %vm5122_vm0 = vcmask 261120   ;;  %v1744_v62 = vadd.f32 %v3792_v44, %v1743_v52 }
0x1f1b   :  { %v1653_v48 = vmul.f32 %v1652_v36, %v4277_v53  ;;  %vm5124_vm15 = vcmask 15360  }
0x1f1c   :  { %v1628_v6 = vadd.f32 %v3713_v42, %v1627_v18 }
0x1f1e   :  { %v1632_v47 = vsel %vm1631_vm5, %v3713_v42, %v1628_v6  ;;  %vm5123_vm5 = vmmov %vm5122_vm0 }
0x1f1f   :  { %1678 = vperm.xlu0 %3596, %v1623_v28   ;;  %v1637_v31 = vsel %vm1634_vm1, %v1636_v50, %v1632_v47 }
0x1f20   :  { %1675 = vperm.xlu2 %3595, %v1608_v60   ;;  %v1638_v57 = vmul.f32 %v1637_v31, %v4274_v10 }
0x1f27   :  { %1684 = vperm.xlu0 %3596, %v1653_v48  }
0x1f28   :  { %1681 = vperm.xlu2 %3595, %v1638_v57  }
0x1f6a   :  { %v1664_v40 = vpop.permute.xlu2 %1663 }
0x1f6b   :  { %v1686_v43 = vperm.slane %v1664_v40, %v4181_v17 }
0x1f72   :  { %v1670_v61 = vpop.permute.xlu2 %1669 }
0x1f73   :  { %v1688_v54 = vperm.slane %v1670_v61, %v4181_v17 }
0x1f7a   :  { %v1676_v51 = vpop.permute.xlu2 %1675 }
0x1f7b   :  { %v1690_v32 = vperm.slane %v1676_v51, %v4181_v17 }
0x1f81   :  { %v1667_v55 = vpop.permute.xlu0 %1666 }
0x1f82   :  { %v1687_v20 = vperm.slane %v1667_v55, %v4181_v17  ;;  %v1682_v59 = vpop.permute.xlu2 %1681 }
0x1f83   :  { %v1692_v2 = vperm.slane %v1682_v59, %v4181_v17 }
0x1f84   :  { %v1694_v5 = vsel %vm1498_vm6, %v1687_v20, %v1686_v43 }
0x1f85   :  { %v1695_v10 = vsel %vm1500_vm8, %v1688_v54, %v1694_v5  ;;  %v3794_v54 = vld [vmem:[%s5105_s7 + $0x10] sm:$0xff] }
0x1f89   :  { %v1673_v8 = vpop.permute.xlu0 %1672 }
0x1f8a   :  { %v1689_v25 = vperm.slane %v1673_v8, %v4181_v17 }
0x1f8c   :  { %v1696_v0 = vsel %vm1502_vm9, %v1689_v25, %v1695_v10  ;;  %v3796_v10 = vld [vmem:[%s5105_s7] sm:$0xff] }
0x1f8d   :  { %v1697_v33 = vsel %vm1504_vm10, %v1690_v32, %v1696_v0 }
0x1f91   :  { %v1679_v53 = vpop.permute.xlu0 %1678 }
0x1f92   :  { %v1691_v27 = vperm.slane %v1679_v53, %v4181_v17  ;;  %v3795_v53 = vld [vmem:[%s5105_s7 + $0x8] sm:$0xff] }
0x1f94   :  { %v1698_v35 = vsel %vm1506_vm11, %v1691_v27, %v1697_v33  ;;  %v3797_v27 = vld [vmem:[%s5104_s8] ss:$0 sm:$0xff] }
0x1f95   :  { %v1699_v38 = vsel %vm1508_vm12, %v1692_v2, %v1698_v35 }
0x1f99   :  { %v1685_v37 = vpop.permute.xlu0 %1684 }
0x1f9a   :  { %v1693_v4 = vperm.slane %v1685_v37, %v4181_v17 }
0x1f9c   :  { %v1700_v42 = vsel %vm5120_vm7, %v1693_v4, %v1699_v38 }
0x1f9d   :  { %3537 = vmatmul.msk.f32.vlgmr.msrb.gmra.mxu0 %vm5121_vm13, %v1700_v42 }
0x201a   :  { %v1721_v46 = vpop.f32.mrf.mxu0 }
0x201b   :  { %3540 = vmatmul.msk.f32.vlgmr.msrb.gmra.mxu1 %vm5122_vm0, %v1721_v46 }
0x201c   :  { %3407 = vmatpush.msrb.mxu1 %v3788_v9 }
0x201e   :  { %3408 = vmatpush.msrb.mxu1 %v3789_v16 }
0x2020   :  { %3409 = vmatpush.msrb.mxu1 %v3790_v24 }
0x2022   :  { %3410 = vmatpush.msrb.mxu1 %v3791_v49 }
0x2098   :  { %v1766_v39 = vpop.f32.mrf.mxu1 }
0x2099   :  { %v1769_v56 = vadd.f32 %v1766_v39, %v1744_v62 }
0x209b   :  { %3714 = vtanh.f32 %v1769_v56  ;;  %v3541_v18 = vmul.f32 -1.442695, %v1769_v56 }
0x209d   :  { %3716 = vpow2.f32 %v3541_v18 }
0x20a1   :  { %v3715_v28 = vpop.eup %3714 }
0x20a2   :  { %1792 = vrot.lane.b32.xlu2 %v3715_v28, %s3803_s2 }
0x20a3   :  { %v3717_v58 = vpop.eup %3716 }
0x20a4   :  { %v1773_v60 = vadd.f32 1.0, %v3717_v58 }
0x20a6   :  { %3718 = vrcp.f32 %v1773_v60  ;;  %v1785_v50 = vand.u32 2147483648, %v1773_v60  ;;  %vm1779_vm2 = vweird.f32 %v1773_v60  ;;  %v1783_v36 = vand.u32 2147483647, %v1773_v60 }
0x20a8   :  { %v1786_v48 = vor.u32 1.1754944e-38, %v1785_v50  ;;  %vm1784_vm4 = vcmp.eq.f32.partialorder %v1783_v36, 8.507059e+37 }
0x20ac   :  { %v3719_v13 = vpop.eup %3718 }
0x20ad   :  { %v1775_v63 = vmul.f32 %v3719_v13, %v1773_v60  ;;  %vm1780_vm14 = vweird.f32 %v3719_v13 }
0x20ae   :  { %vm1781_vm3 = vmor %vm1779_vm2, %vm1780_vm14 }
0x20af   :  { %v1776_v6 = vsub.f32 1.0, %v1775_v63 }
0x20b1   :  { %v1777_v12 = vmul.f32 %v3719_v13, %v1776_v6 }
0x20b3   :  { %v1778_v47 = vadd.f32 %v3719_v13, %v1777_v12 }
0x20b5   :  { %v1782_v31 = vsel %vm1781_vm3, %v3719_v13, %v1778_v47 }
0x20b6   :  { %v1787_v40 = vsel %vm1784_vm4, %v1786_v48, %v1782_v31 }
0x20b7   :  { %v1790_v61 = vmul.f32 %v1787_v40, %v4061_v7  ;;  %v3793_v7 = vld [vmem:[%s5105_s7 + $0x18] sm:$0xff] }
0x20fc   :  { %v1793_v57 = vpop.permute.xlu2 %1792 }
0x20fd   :  { %v1795_v55 = vmul.f32 %v1793_v57, %v1787_v40 }
0x20ff   :  { %1797 = vrot.lane.b32.xlu0 %v1795_v55, %s3804_s29 }
0x2171   :  { %v1798_v8 = vpop.permute.xlu0 %1797 }
0x2172   :  { %v4445_v51 = vadd.f32 %v1798_v8, %v1790_v61 }
0x2174   :  { %3720 = vtanh.f32 %v4445_v51 }
0x217a   :  { %v3721_v20 = vpop.eup %3720 }
0x217b   :  { %1803 = vrot.lane.b32.xlu2 %v3721_v20, %s3803_s2 }
0x21d5   :  { %v1804_v43 = vpop.permute.xlu2 %1803 }
0x21d6   :  { %v1806_v5 = vmul.f32 %v1804_v43, %v1787_v40 }
0x21d8   :  { %1808 = vrot.lane.b32.xlu1 %v1806_v5, %s3804_s29 }
0x224a   :  { %v1809_v25 = vpop.permute.xlu1 %1808 }
0x224b   :  { %3542 = vmatmul.msk.f32.vlgmr.msrb.gmra.mxu3 %vm5123_vm5, %v1809_v25  ;;  %2542 = vmatpush.msra.mxu0 %v1809_v25 }
0x224c   :  { %3470 = vmatpush.msrb.mxu3 %v3793_v7 }
0x224e   :  { %3471 = vmatpush.msrb.mxu3 %v3794_v54 }
0x2250   :  { %3472 = vmatpush.msrb.mxu3 %v3795_v53 }
0x2252   :  { %3473 = vmatpush.msrb.mxu3 %v3796_v10 }
0x22ce   :  { %v1829_v0 = vpop.f32.mrf.mxu3 }
0x22cf   :  { %v1830_v32 = vadd.f32 %v3797_v27, %v1829_v0 }
0x22d1   :  { %3722 = vtanh.f32 %v1830_v32 }
0x22d7   :  { %v4466_v59 = vpop.eup %3722 }
0x22d8   :  { %3549 = vmatmul.msk.f32.vlgmr.msra.gmra.mxu2 %vm5124_vm15, %v4466_v59  ;;  %v1839_v33 = vsub.f32 %v4466_v59, %v4082_v19 }
0x22da   :  { %v1840_v35 = vand.u32 2147483647, %v1839_v33  ;;  %vm1887_vm2 = vcmp.lt.f32.partialorder %v1839_v33, 0.0 }
0x22dc   :  { %1873 = vrot.lane.b32.xlu2 %v1840_v35, %s3805_s23  ;;  %1842 = vrot.lane.b32.xlu0 %v1840_v35, %s3806_s24 }
0x2336   :  { %v1874_v36 = vpop.permute.xlu2 %1873 }
0x2337   :  { %vm1876_vm14 = vcmp.gt.f32.partialorder %v1840_v35, %v1874_v36 }
0x234e   :  { %v1843_v2 = vpop.permute.xlu0 %1842 }
0x234f   :  { %v1845_v37 = vmax.f32 %v1840_v35, %v1843_v2  ;;  %v1846_v52 = vmin.f32 %v1840_v35, %v1843_v2 }
0x2351   :  { %v1847_v4 = vadd.f32 1e-30, %v1845_v37 }
0x2353   :  { %3724 = vrcp.f32 %v1847_v4  ;;  %v1859_v9 = vand.u32 2147483648, %v1847_v4  ;;  %v1857_v24 = vand.u32 2147483647, %v1847_v4  ;;  %vm1853_vm7 = vweird.f32 %v1847_v4 }
0x2355   :  { %v1860_v19 = vor.u32 1.1754944e-38, %v1859_v9  ;;  %vm1858_vm0 = vcmp.eq.f32.partialorder %v1857_v24, 8.507059e+37 }
0x2359   :  { %v3725_v38 = vpop.eup %3724 }
0x235a   :  { %v1849_v42 = vmul.f32 %v3725_v38, %v1847_v4  ;;  %vm1854_vm1 = vweird.f32 %v3725_v38 }
0x235b   :  { %vm1855_vm13 = vmor %vm1853_vm7, %vm1854_vm1 }
0x235c   :  { %v1850_v46 = vsub.f32 1.0, %v1849_v42 }
0x235e   :  { %v1851_v16 = vmul.f32 %v3725_v38, %v1850_v46 }
0x2360   :  { %v1852_v49 = vadd.f32 %v3725_v38, %v1851_v16 }
0x2362   :  { %v1856_v44 = vsel %vm1855_vm13, %v3725_v38, %v1852_v49 }
0x2363   :  { %v1861_v62 = vsel %vm1858_vm0, %v1860_v19, %v1856_v44 }
0x2364   :  { %v1862_v39 = vmul.f32 %v1861_v62, %v1846_v52 }
0x2366   :  { %v1863_v56 = vmul.f32 %v1862_v39, %v1862_v39 }
0x2368   :  { %v1864_v28 = vmul.f32 0.0208351, %v1863_v56 }
0x236a   :  { %v3543_v18 = vadd.f32 -0.085133, %v1864_v28 }
0x236c   :  { %v1866_v58 = vmul.f32 %v3543_v18, %v1863_v56 }
0x236e   :  { %v1867_v60 = vadd.f32 0.180141, %v1866_v58 }
0x2370   :  { %v1868_v13 = vmul.f32 %v1867_v60, %v1863_v56 }
0x2372   :  { %v3544_v63 = vadd.f32 -0.3302995, %v1868_v13 }
0x2374   :  { %v1870_v6 = vmul.f32 %v3544_v63, %v1863_v56 }
0x2376   :  { %v1871_v12 = vadd.f32 0.999866, %v1870_v6 }
0x2378   :  { %v1872_v47 = vmul.f32 %v1871_v12, %v1862_v39 }
0x237a   :  { %1883 = vrot.lane.b32.xlu2 %v1872_v47, %s3805_s23  ;;  %v1877_v50 = vsub.f32 1.5707964, %v1872_v47 }
0x237c   :  { %1879 = vrot.lane.b32.xlu0 %v1877_v50, %s3805_s23 }
0x23d4   :  { %v1884_v31 = vpop.permute.xlu2 %1883 }
0x23ee   :  { %v1880_v48 = vpop.permute.xlu0 %1879 }
0x23ef   :  { %v1886_v57 = vsel %vm1876_vm14, %v1880_v48, %v1884_v31 }
0x23f0   :  { %1894 = vrot.lane.b32.xlu2 %v1886_v57, %s3806_s24  ;;  %v1888_v40 = vsub.f32 3.1415927, %v1886_v57 }
0x23f2   :  { %1890 = vrot.lane.b32.xlu0 %v1888_v40, %s3806_s24 }
0x23f8   :  { %1983 = vperm.xlu2 %3595, %v4466_v59  }
0x244a   :  { %v1895_v55 = vpop.permute.xlu2 %1894 }
0x2452   :  { %v1984_v35 = vpop.permute.xlu2 %1983 }
0x2464   :  { %v1891_v61 = vpop.permute.xlu0 %1890 }
0x2465   :  { %v1897_v8 = vsel %vm1887_vm2, %v1891_v61, %v1895_v55 }
0x2466   :  { %1904 = vrot.lane.b32.xlu0 %v1897_v8, %s3805_s23  ;;  %v1898_v20 = vsub.f32 0.0, %v1897_v8 }
0x2468   :  { %1900 = vrot.lane.b32.xlu1 %v1898_v20, %s3805_s23 }
0x2470   :  { %1989 = vperm.xlu1 %3598, %v4466_v59  }
0x2478   :  { %3599 = vset.pattern.permute.xlu1 %v4117_v1 }
0x2488   :  { %1913 = vxpose.xlu0.b32.start.end [1/1] (short) (narrow) %v4466_v59, 8 }
0x24d8   :  { %v1905_v43 = vpop.permute.xlu0 %1904 }
0x24da   :  { %v1901_v5 = vpop.permute.xlu1 %1900 }
0x24db   :  { %v1907_v25 = vsel %vm1887_vm2, %v1901_v5, %v1905_v43 }
0x24dc   :  { %v1908_v7 = vmul.f32 57.29578, %v1907_v25 }
0x24de   :  { %v1909_v54 = vmul.f32 0.0027777778, %v1908_v7 }
0x24e0   :  { %v1910_v53 = vfloor.f32 %v1909_v54 }
0x24e2   :  { %v1911_v10 = vmul.f32 360.0, %v1910_v53  ;;  %v1990_v2 = vpop.permute.xlu1 %1989 }
0x24e4   :  { %v4484_v0 = vsub.f32 %v1908_v7, %v1911_v10 }
0x24e6   :  { %1946 = vrot.lane.b32.xlu2 %v4484_v0, %s3806_s24 }
0x24ef   :  { %3600 = vset.pattern.permute.xlu0 %v4117_v1 }
0x252c   :  { %v1929_v27 = vpop.trf.xlu0 }
0x252d   :  { %v1981_v32 = vperm.slane %v1929_v27, 0  ;;  %v1987_v33 = vperm.slane %v1929_v27, 1 }
0x252f   :  { %v4489_v37 = vsub.f32 %v1981_v32, %v1984_v35  ;;  %v4491_v4 = vsub.f32 %v1987_v33, %v1990_v2 }
0x2531   :  { %v1993_v38 = vmul.f32 %v4489_v37, %v4489_v37  ;;  %v1994_v42 = vmul.f32 %v4491_v4, %v4491_v4  ;;  %v4498_v46 = vand.u32 2147483647, %v4489_v37  ;;  %v4501_v9 = vand.u32 2147483647, %v4491_v4 }
0x2532   :  { %vm2042_vm0 = vcmp.lt.f32.partialorder %v4489_v37, 0.0  ;;  %vm2045_vm14 = vcmp.lt.f32.partialorder %v4491_v4, 0.0 }
0x2533   :  { %v1995_v16 = vadd.f32 %v1994_v42, %v1993_v38  ;;  %v2011_v24 = vmax.f32 %v4498_v46, %v4501_v9  ;;  %v2012_v49 = vmin.f32 %v4498_v46, %v4501_v9  ;;  %vm2039_vm3 = vcmp.gt.f32.partialorder %v4501_v9, %v4498_v46 }
0x2535   :  { %v1996_v19 = vadd.f32 1e-12, %v1995_v16  ;;  %v2013_v52 = vadd.f32 1e-30, %v2011_v24 }
0x2537   :  { %3726 = vrsqrt.f32 %v1996_v19  ;;  %v2025_v60 = vand.u32 2147483648, %v2013_v52  ;;  %v2023_v6 = vand.u32 2147483647, %v2013_v52  ;;  %vm2019_vm5 = vweird.f32 %v2013_v52 }
0x2538   :  { %3728 = vrcp.f32 %v2013_v52  ;;  %vm2004_vm7 = vcmp.eq.f32.partialorder %v1996_v19, inf  ;;  %v2007_v55 = vand.u32 2147483648, %v1996_v19  ;;  %vm2006_vm13 = vcmp.eq.f32.partialorder %v1996_v19, 0.0 }
0x2539   :  { %v2026_v50 = vor.u32 1.1754944e-38, %v2025_v60  ;;  %vm2024_vm1 = vcmp.eq.f32.partialorder %v2023_v6, 8.507059e+37 }
0x253d   :  { %v3727_v44 = vpop.eup %3726 }
0x253e   :  { %v3729_v62 = vpop.eup %3728  ;;  %v1998_v39 = vmul.f32 %v3727_v44, %v1996_v19 }
0x253f   :  { %v2015_v56 = vmul.f32 %v3729_v62, %v2013_v52  ;;  %vm2020_vm4 = vweird.f32 %v3729_v62 }
0x2540   :  { %v1947_v28 = vpop.permute.xlu2 %1946  ;;  %v1999_v18 = vmul.f32 %v3727_v44, %v1998_v39  ;;  %vm2021_vm15 = vmor %vm2019_vm5, %vm2020_vm4  ;;  %vm5125_vm5 = vcmask 130048  }
0x2541   :  { %v2016_v58 = vsub.f32 1.0, %v2015_v56  ;;  %1949 = vxpose.xlu2.b32.start.end [1/1] (short) (narrow) %v1947_v28, 8 }
0x2542   :  { %v2000_v13 = vmul.f32 0.5, %v1999_v18 }
0x2543   :  { %v2017_v63 = vmul.f32 %v3729_v62, %v2016_v58 }
0x2544   :  { %v2001_v12 = vsub.f32 1.5, %v2000_v13 }
0x2545   :  { %v2018_v47 = vadd.f32 %v3729_v62, %v2017_v63 }
0x2546   :  { %v2002_v36 = vmul.f32 %v3727_v44, %v2001_v12 }
0x2547   :  { %v2022_v31 = vsel %vm2021_vm15, %v3729_v62, %v2018_v47 }
0x2548   :  { %v2027_v48 = vsel %vm2024_vm1, %v2026_v50, %v2022_v31  ;;  %v2003_v57 = vmul.f32 %v2002_v36, %v1996_v19 }
0x2549   :  { %v2028_v40 = vmul.f32 %v2027_v48, %v2012_v49 }
0x254a   :  { %v2005_v61 = vsel %vm2004_vm7, %v1996_v19, %v2003_v57  ;;  %vm5126_vm7 = vmmov %vm5125_vm5 }
0x254b   :  { %v2029_v8 = vmul.f32 %v2028_v40, %v2028_v40  ;;  %v4509_v20 = vsel %vm2006_vm13, %v2007_v55, %v2005_v61 }
0x254c   :  { %v2207_v43 = vperm.slane %v4509_v20, 1  ;;  %v2200_v5 = vperm.slane %v4509_v20, 0  ;;  %v2214_v10 = vperm.slane %v4509_v20, 2  ;;  %v2228_v27 = vperm.slane %v4509_v20, 4 }
0x254d   :  { %v2030_v25 = vmul.f32 0.0208351, %v2029_v8  ;;  %v2221_v38 = vperm.slane %v4509_v20, 3 }
0x254e   :  { %2212 = vperm.xlu0 %3600, %v2207_v43   ;;  %2205 = vperm.xlu1 %3599, %v2200_v5  }
0x254f   :  { %v3545_v7 = vadd.f32 -0.085133, %v2030_v25 }
0x2551   :  { %v2032_v54 = vmul.f32 %v3545_v7, %v2029_v8 }
0x2553   :  { %v2033_v53 = vadd.f32 0.180141, %v2032_v54 }
0x2555   :  { %v2034_v32 = vmul.f32 %v2033_v53, %v2029_v8 }
0x2556   :  { %2219 = vperm.xlu0 %3600, %v2214_v10   ;;  %2233 = vperm.xlu1 %3599, %v2228_v27  }
0x2557   :  { %v3546_v33 = vadd.f32 -0.3302995, %v2034_v32 }
0x2559   :  { %v2036_v35 = vmul.f32 %v3546_v33, %v2029_v8 }
0x255b   :  { %v2037_v2 = vadd.f32 0.999866, %v2036_v35 }
0x255d   :  { %v2038_v42 = vmul.f32 %v2037_v2, %v2028_v40  ;;  %v2235_v2 = vperm.slane %v4509_v20, 5 }
0x255e   :  { %2226 = vperm.xlu0 %3600, %v2221_v38   ;;  %3601 = vset.pattern.permute.xlu1 %v3807_v29 }
0x255f   :  { %2054 = vperm.xlu1 %3601, %v4484_v0   ;;  %v2040_v16 = vsub.f32 1.5707964, %v2038_v42 }
0x2561   :  { %v2041_v24 = vsel %vm2039_vm3, %v2040_v16, %v2038_v42 }
0x2562   :  { %v2043_v49 = vsub.f32 3.1415927, %v2041_v24 }
0x2564   :  { %v2044_v19 = vsel %vm2042_vm0, %v2043_v49, %v2041_v24  ;;  %v2242_v49 = vperm.slane %v4509_v20, 6 }
0x2565   :  { %v2046_v52 = vsub.f32 0.0, %v2044_v19 }
0x2567   :  { %v2047_v44 = vsel %vm2045_vm14, %v2046_v52, %v2044_v19  ;;  %3602 = vset.pattern.permute.xlu1 %v4117_v1 }
0x2568   :  { %v2048_v0 = vmul.f32 57.29578, %v2047_v44 }
0x256a   :  { %v2049_v39 = vmul.f32 0.0027777778, %v2048_v0 }
0x256c   :  { %v2050_v46 = vfloor.f32 %v2049_v39 }
0x256e   :  { %v2051_v9 = vmul.f32 360.0, %v2050_v46 }
0x2570   :  { %v2052_v28 = vsub.f32 %v2048_v0, %v2051_v9 }
0x25a3   :  { %3603 = vset.pattern.permute.xlu2 %v4117_v1 }
0x25c0   :  { %v4525_v62 = vpop.permute.xlu1 %2205  ;;  %v4533_v52 = vpop.permute.xlu0 %2212 }
0x25c8   :  { %v4527_v56 = vpop.permute.xlu1 %2233  ;;  %v4535_v44 = vpop.permute.xlu0 %2219 }
0x25d1   :  { %v2055_v18 = vpop.permute.xlu1 %2054 }
0x25d2   :  { %v2057_v37 = vsub.f32 %v2052_v28, %v2055_v18 }
0x25d4   :  { %v2058_v58 = vmul.f32 0.0027777778, %v2057_v37 }
0x25d6   :  { %v2059_v60 = vfloor.f32 %v2058_v58 }
0x25d8   :  { %v2060_v4 = vmul.f32 360.0, %v2059_v60 }
0x25da   :  { %v1965_v13 = vpop.trf.xlu2  ;;  %v2061_v12 = vsub.f32 %v2057_v37, %v2060_v4 }
0x25db   :  { %v2062_v63 = vperm.slane %v1965_v13, 0 }
0x25dc   :  { %v2072_v36 = vmul.f32 0.033333335, %v2061_v12 }
0x25dd   :  { %v2063_v6 = vsub.f32 %v2062_v63, %v2055_v18  ;;  %v4542_v18 = vpop.permute.xlu0 %2226 }
0x25de   :  { %v2073_v57 = vfloor.f32 %v2072_v36 }
0x25df   :  { %v2064_v47 = vmul.f32 0.0027777778, %v2063_v6 }
0x25e0   :  { %v2074_v61 = vmax.f32 %v2073_v57, 0.0 }
0x25e1   :  { %v2065_v50 = vfloor.f32 %v2064_v47 }
0x25e2   :  { %v2075_v5 = vmin.f32 %v2074_v61, 11.0 }
0x25e3   :  { %v2066_v31 = vmul.f32 360.0, %v2065_v50 }
0x25e5   :  { %v2067_v48 = vsub.f32 %v2063_v6, %v2066_v31 }
0x25e7   :  { %v2068_v40 = vmul.f32 0.033333335, %v2067_v48 }
0x25e9   :  { %v2069_v55 = vfloor.f32 %v2068_v40 }
0x25eb   :  { %v2070_v8 = vmax.f32 %v2069_v55, 0.0 }
0x25ed   :  { %v2071_v43 = vmin.f32 %v2070_v8, 11.0 }
0x25ef   :  { %v2076_v25 = vmul.f32 12.0, %v2071_v43 }
0x25f1   :  { %v2077_v7 = vadd.f32 %v2076_v25, %v2075_v5 }
0x25f3   :  { %vm3568_vm2 = vcmp.lt.s32.totalorder %v2077_v7, 0  ;;  %v3569_v54 = vceil.f32 %v2077_v7  ;;  %v3570_v53 = vfloor.f32 %v2077_v7 }
0x25f5   :  { %v3571_v10 = vsel %vm3568_vm2, %v3569_v54, %v3570_v53  ;;  %vm5127_vm2 = vmmov %vm5125_vm5 }
0x25f6   :  { %v3572_v27 = vcvt.f32.s32 %v3571_v10 }
0x25f8   :  { %v2121_v32 = vperm.slane %v3572_v27, 6  ;;  %v2100_v33 = vperm.slane %v3572_v27, 3  ;;  %v2079_v35 = vperm.slane %v3572_v27, 0  ;;  %v2086_v38 = vperm.slane %v3572_v27, 1 }
0x25f9   :  { %v2093_v42 = vperm.slane %v3572_v27, 2  ;;  %v2107_v16 = vperm.slane %v3572_v27, 4  ;;  %v2114_v24 = vperm.slane %v3572_v27, 5  ;;  %v2128_v19 = vperm.slane %v3572_v27, 7 }
0x25fa   :  { %2126 = vperm.xlu2 %3603, %v2121_v32   ;;  %2105 = vperm.xlu0 %3600, %v2100_v33  }
0x25fb   :  { %2084 = vperm.xlu1 %3602, %v2079_v35  }
0x2602   :  { %2240 = vperm.xlu2 %3603, %v2235_v2  }
0x2603   :  { %2091 = vperm.xlu1 %3602, %v2086_v38  }
0x260a   :  { %3605 = vset.pattern.permute.xlu2 %v3808_v45 }
0x260b   :  { %2098 = vperm.xlu1 %3602, %v2093_v42  }
0x2613   :  { %2112 = vperm.xlu1 %3602, %v2107_v16  }
0x261b   :  { %2119 = vperm.xlu1 %3602, %v2114_v24  }
0x2623   :  { %2247 = vperm.xlu1 %3602, %v2242_v49  }
0x262b   :  { %2133 = vperm.xlu1 %3602, %v2128_v19  }
0x2633   :  { %3604 = vset.pattern.permute.xlu1 %v3808_v45 }
0x2654   :  { %v2127_v48 = vpop.permute.xlu2 %2126 }
0x266c   :  { %v2106_v63 = vpop.permute.xlu0 %2105 }
0x266d   :  { %v2085_v0 = vpop.permute.xlu1 %2084  ;;  %vm2142_vm14 = vcmp.eq.s32.totalorder %v4189_v21, %v2106_v63 }
0x266e   :  { %vm2135_vm3 = vcmp.eq.s32.totalorder %v4181_v17, %v2085_v0  ;;  %vm2136_vm4 = vcmp.eq.s32.totalorder %v4189_v21, %v2085_v0  ;;  %v2158_v31 = vsel %vm2142_vm14, %v4193_v23, 0.0  ;;  %v2249_v0 = vperm.slane %v4509_v20, 7  ;;  %v2241_v20 = vpop.permute.xlu2 %2240 }
0x266f   :  { %v2152_v39 = vsel %vm2136_vm4, %v4193_v23, 0.0  ;;  %v2151_v46 = vsel %vm2135_vm3, %v4191_v22, 0.0  ;;  %vm2141_vm3 = vcmp.eq.s32.totalorder %v4181_v17, %v2106_v63 }
0x2670   :  { %v2167_v9 = vsel %vm5125_vm5, %v2152_v39, 0.0  ;;  %v2157_v40 = vsel %vm2141_vm3, %v4191_v22, 0.0  ;;  %vm5130_vm3 = vmmov %vm5127_vm2 }
0x2671   :  { %v2168_v28 = vadd.f32 %v2167_v9, %v2151_v46 }
0x2673   :  { %2169 = vadd.xlane.f32.xlu1 %v2168_v28 }
0x2675   :  { %v2092_v37 = vpop.permute.xlu1 %2091 }
0x2676   :  { %vm2137_vm15 = vcmp.eq.s32.totalorder %v4181_v17, %v2092_v37  ;;  %vm2138_vm1 = vcmp.eq.s32.totalorder %v4189_v21, %v2092_v37 }
0x2677   :  { %v2154_v58 = vsel %vm2138_vm1, %v4193_v23, 0.0  ;;  %v2153_v60 = vsel %vm2137_vm15, %v4191_v22, 0.0  ;;  %vm5128_vm15 = vmmov %vm5127_vm2  ;;  %vm2148_vm1 = vcmp.eq.s32.totalorder %v4189_v21, %v2127_v48 }
0x2678   :  { %v2171_v13 = vsel %vm5126_vm7, %v2154_v58, 0.0  ;;  %v2179_v55 = vsel %vm5128_vm15, %v2158_v31, 0.0  ;;  %vm5129_vm7 = vmmov %vm5127_vm2  ;;  %v2164_v7 = vsel %vm2148_vm1, %v4193_v23, 0.0  ;;  %vm5132_vm1 = vcmask 1047559  }
0x2679   :  { %v2172_v4 = vadd.f32 %v2171_v13, %v2153_v60  ;;  %v2180_v5 = vadd.f32 %v2179_v55, %v2157_v40  ;;  %v2191_v10 = vsel %vm5127_vm2, %v2164_v7, 0.0  ;;  %vm5131_vm15 = vmmov %vm5127_vm2 }
0x267b   :  { %2173 = vadd.xlane.f32.xlu1 %v2172_v4 }
0x267d   :  { %v2099_v6 = vpop.permute.xlu1 %2098 }
0x267e   :  { %vm2139_vm13 = vcmp.eq.s32.totalorder %v4181_v17, %v2099_v6  ;;  %vm2140_vm0 = vcmp.eq.s32.totalorder %v4189_v21, %v2099_v6 }
0x267f   :  { %v2156_v12 = vsel %vm2140_vm0, %v4193_v23, 0.0  ;;  %v2155_v47 = vsel %vm2139_vm13, %v4191_v22, 0.0  ;;  %vm2147_vm13 = vcmp.eq.s32.totalorder %v4181_v17, %v2127_v48 }
0x2680   :  { %v2175_v50 = vsel %vm5127_vm2, %v2156_v12, 0.0  ;;  %v2163_v53 = vsel %vm2147_vm13, %v4191_v22, 0.0 }
0x2681   :  { %v2176_v36 = vadd.f32 %v2175_v50, %v2155_v47  ;;  %v2192_v35 = vadd.f32 %v2191_v10, %v2163_v53 }
0x2683   :  { %2177 = vadd.xlane.f32.xlu1 %v2176_v36 }
0x2685   :  { %v2113_v57 = vpop.permute.xlu1 %2112 }
0x2686   :  { %vm2143_vm4 = vcmp.eq.s32.totalorder %v4181_v17, %v2113_v57  ;;  %vm2144_vm5 = vcmp.eq.s32.totalorder %v4189_v21, %v2113_v57 }
0x2687   :  { %v2160_v61 = vsel %vm2144_vm5, %v4193_v23, 0.0  ;;  %v2159_v8 = vsel %vm2143_vm4, %v4191_v22, 0.0 }
0x2688   :  { %v2183_v43 = vsel %vm5129_vm7, %v2160_v61, 0.0  ;;  %vm5133_vm7 = vcmask 64512  }
0x2689   :  { %v2184_v25 = vadd.f32 %v2183_v43, %v2159_v8 }
0x268b   :  { %2181 = vadd.xlane.f32.xlu1 %v2180_v5  ;;  %2185 = vadd.xlane.f32.xlu2 %v2184_v25 }
0x268d   :  { %v2120_v54 = vpop.permute.xlu1 %2119 }
0x268e   :  { %vm2145_vm0 = vcmp.eq.s32.totalorder %v4181_v17, %v2120_v54  ;;  %vm2146_vm14 = vcmp.eq.s32.totalorder %v4189_v21, %v2120_v54 }
0x268f   :  { %v2162_v27 = vsel %vm2146_vm14, %v4193_v23, 0.0  ;;  %v2161_v32 = vsel %vm2145_vm0, %v4191_v22, 0.0 }
0x2690   :  { %v2187_v33 = vsel %vm5130_vm3, %v2162_v27, 0.0 }
0x2691   :  { %v2188_v2 = vadd.f32 %v2187_v33, %v2161_v32 }
0x2693   :  { %2193 = vadd.xlane.f32.xlu2 %v2192_v35  ;;  %2189 = vadd.xlane.f32.xlu0 %v2188_v2 }
0x2695   :  { %v2248_v38 = vpop.permute.xlu1 %2247 }
0x269d   :  { %v2134_v42 = vpop.permute.xlu1 %2133 }
0x269e   :  { %vm2149_vm4 = vcmp.eq.s32.totalorder %v4181_v17, %v2134_v42  ;;  %vm2150_vm5 = vcmp.eq.s32.totalorder %v4189_v21, %v2134_v42 }
0x269f   :  { %v2166_v16 = vsel %vm2150_vm5, %v4193_v23, 0.0  ;;  %v2165_v24 = vsel %vm2149_vm4, %v4191_v22, 0.0 }
0x26a0   :  { %v2195_v49 = vsel %vm5131_vm15, %v2166_v16, 0.0 }
0x26a1   :  { %v2196_v19 = vadd.f32 %v2195_v49, %v2165_v24 }
0x26a3   :  { %2197 = vadd.xlane.f32.xlu0 %v2196_v19 }
0x26b7   :  { %2254 = vperm.xlu0 %3600, %v2249_v0  }
0x26bf   :  { %3606 = vset.pattern.permute.xlu0 %v3808_v45 }
0x26e6   :  { %v2170_v39 = vpop.xlane.xlu1 %2169 }
0x26e7   :  { %v2264_v46 = vsub.f32 %v2170_v39, %v4525_v62 }
0x26e9   :  { %v2272_v9 = vmax.f32 %v2264_v46, 0.0 }
0x26eb   :  { %v4583_v28 = vmul.f32 %v2272_v9, %v4155_v11 }
0x26ed   :  { %2297 = vperm.xlu1 %3604, %v4583_v28  }
0x26ee   :  { %v2174_v37 = vpop.xlane.xlu1 %2173 }
0x26ef   :  { %v2265_v58 = vsub.f32 %v2174_v37, %v4533_v52 }
0x26f1   :  { %v2273_v60 = vmax.f32 %v2265_v58, 0.0 }
0x26f3   :  { %v4588_v13 = vmul.f32 %v2273_v60, %v4178_v14 }
0x26f5   :  { %2300 = vperm.xlu1 %3604, %v4588_v13  }
0x26f6   :  { %v2178_v4 = vpop.xlane.xlu1 %2177 }
0x26f7   :  { %v2266_v63 = vsub.f32 %v2178_v4, %v4535_v44 }
0x26f9   :  { %v2274_v62 = vmax.f32 %v2266_v63, 0.0 }
0x26fb   :  { %v4593_v6 = vmul.f32 %v2274_v62, %v4183_v15 }
0x26fd   :  { %2303 = vperm.xlu2 %3605, %v4593_v6  }
0x26fe   :  { %v2186_v12 = vpop.xlane.xlu2 %2185  ;;  %v2182_v47 = vpop.xlane.xlu1 %2181 }
0x26ff   :  { %v2268_v52 = vsub.f32 %v2186_v12, %v4527_v56  ;;  %v2267_v50 = vsub.f32 %v2182_v47, %v4542_v18 }
0x2701   :  { %v2276_v36 = vmax.f32 %v2268_v52, 0.0  ;;  %v2275_v31 = vmax.f32 %v2267_v50, 0.0 }
0x2703   :  { %v4599_v48 = vmul.f32 %v2276_v36, %v4163_v26  ;;  %v4602_v57 = vmul.f32 %v2275_v31, %v4200_v30 }
0x2705   :  { %2309 = vperm.xlu2 %3605, %v4599_v48   ;;  %2306 = vperm.xlu1 %3604, %v4602_v57  }
0x2706   :  { %v2194_v44 = vpop.xlane.xlu2 %2193  ;;  %v2190_v40 = vpop.xlane.xlu0 %2189 }
0x2707   :  { %v2270_v55 = vsub.f32 %v2194_v44, %v2248_v38  ;;  %v2269_v61 = vsub.f32 %v2190_v40, %v2241_v20 }
0x2709   :  { %v2278_v8 = vmax.f32 %v2270_v55, 0.0  ;;  %v2277_v56 = vmax.f32 %v2269_v61, 0.0 }
0x270b   :  { %v4607_v18 = vmul.f32 %v2278_v8, %v4165_v34  ;;  %v4610_v43 = vmul.f32 %v2277_v56, %v4207_v3 }
0x270d   :  { %2312 = vperm.xlu0 %3606, %v4610_v43   ;;  %2315 = vperm.xlu1 %3604, %v4607_v18  }
0x2716   :  { %v2198_v5 = vpop.xlane.xlu0 %2197 }
0x2729   :  { %v2255_v25 = vpop.permute.xlu0 %2254 }
0x272a   :  { %v2271_v7 = vsub.f32 %v2198_v5, %v2255_v25 }
0x272c   :  { %v2279_v54 = vmax.f32 %v2271_v7, 0.0 }
0x272e   :  { %v4615_v53 = vmul.f32 %v2279_v54, %v4214_v41 }
0x2730   :  { %2318 = vperm.xlu2 %3605, %v4615_v53  }
0x2757   :  { %v2304_v32 = vpop.permute.xlu2 %2303 }
0x2758   :  { %v2322_v16 = vperm.slane %v2304_v32, %v4181_v17 }
0x275f   :  { %v2298_v10 = vpop.permute.xlu1 %2297  ;;  %v2310_v24 = vpop.permute.xlu2 %2309 }
0x2760   :  { %v2320_v2 = vperm.slane %v2298_v10, %v4181_v17  ;;  %v2324_v9 = vperm.slane %v2310_v24, %v4181_v17 }
0x2767   :  { %v2301_v27 = vpop.permute.xlu1 %2300 }
0x2768   :  { %v2321_v35 = vperm.slane %v2301_v27, %v4181_v17 }
0x276a   :  { %v2328_v38 = vsel %vm1498_vm6, %v2321_v35, %v2320_v2 }
0x276b   :  { %v2329_v19 = vsel %vm1500_vm8, %v2322_v16, %v2328_v38 }
0x2777   :  { %v2307_v33 = vpop.permute.xlu1 %2306 }
0x2778   :  { %v2323_v42 = vperm.slane %v2307_v33, %v4181_v17 }
0x277a   :  { %v2330_v0 = vsel %vm1502_vm9, %v2323_v42, %v2329_v19 }
0x277b   :  { %v2331_v37 = vsel %vm1504_vm10, %v2324_v9, %v2330_v0 }
0x277f   :  { %v2313_v49 = vpop.permute.xlu0 %2312  ;;  %v2316_v46 = vpop.permute.xlu1 %2315 }
0x2780   :  { %v2325_v39 = vperm.slane %v2313_v49, %v4181_v17  ;;  %v2326_v58 = vperm.slane %v2316_v46, %v4181_v17 }
0x2782   :  { %v2332_v60 = vsel %vm1506_vm11, %v2325_v39, %v2331_v37 }
0x2783   :  { %v2333_v63 = vsel %vm1508_vm12, %v2326_v58, %v2332_v60 }
0x278a   :  { %v2319_v20 = vpop.permute.xlu2 %2318 }
0x278b   :  { %v2327_v4 = vperm.slane %v2319_v20, %v4181_v17 }
0x278d   :  { %v2334_v62 = vsel %vm5132_vm1, %v2327_v4, %v2333_v63 }
0x278e   :  { %v2336_v12 = vsel %vm5133_vm7, %v2334_v62, 0.0 }
0x278f   :  { %2337 = vadd.xlane.f32.xlu1 %v2336_v12 }
0x2802   :  { %v2338_v47 = vpop.xlane.xlu1 %2337 }
0x2803   :  { %v4634_v52 = vadd.f32 1e-09, %v2338_v47 }
0x2805   :  { %v2342_v50 = vperm.slane %v4634_v52, 1  ;;  %v2341_v36 = vperm.slane %v4634_v52, 0  ;;  %v4639_v31 = vperm.slane %v4634_v52, 3  ;;  %v4642_v44 = vperm.slane %v4634_v52, 2 }
0x2806   :  { %v4645_v40 = vperm.slane %v4634_v52, 5  ;;  %v4649_v55 = vperm.slane %v4634_v52, 4  ;;  %v4654_v25 = vperm.slane %v4634_v52, 7 }
0x2807   :  { %3730 = vrcp.f32 %v2342_v50  ;;  %v2381_v61 = vand.u32 2147483647, %v2342_v50  ;;  %v2383_v8 = vand.u32 2147483648, %v2342_v50  ;;  %v2366_v5 = vand.u32 2147483647, %v2341_v36 }
0x2808   :  { %3732 = vrcp.f32 %v2341_v36  ;;  %vm2377_vm13 = vweird.f32 %v2342_v50  ;;  %vm2362_vm0 = vweird.f32 %v2341_v36  ;;  %v2368_v32 = vand.u32 2147483648, %v2341_v36 }
0x2809   :  { %3734 = vrcp.f32 %v4639_v31  ;;  %vm4659_vm14 = vcmp.eq.f32.partialorder %v2381_v61, 8.507059e+37  ;;  %v2384_v2 = vor.u32 1.1754944e-38, %v2383_v8  ;;  %vm4665_vm2 = vcmp.eq.f32.partialorder %v2366_v5, 8.507059e+37 }
0x280a   :  { %3736 = vrcp.f32 %v4642_v44  ;;  %vm2407_vm3 = vweird.f32 %v4639_v31  ;;  %v2369_v9 = vor.u32 1.1754944e-38, %v2368_v32  ;;  %v2411_v4 = vand.u32 2147483647, %v4639_v31 }
0x280b   :  { %3738 = vrcp.f32 %v4645_v40  ;;  %v2413_v12 = vand.u32 2147483648, %v4639_v31 }
0x280c   :  { %3740 = vrcp.f32 %v4649_v55 }
0x280d   :  { %v3731_v56 = vpop.eup %3730  ;;  %3742 = vrcp.f32 %v4654_v25  ;;  %v2414_v24 = vor.u32 1.1754944e-38, %v2413_v12 }
0x280e   :  { %v3733_v7 = vpop.eup %3732  ;;  %v2373_v54 = vmul.f32 %v3731_v56, %v2342_v50  ;;  %vm2378_vm4 = vweird.f32 %v3731_v56 }
0x280f   :  { %v4657_v10 = vpop.eup %3734  ;;  %v2358_v27 = vmul.f32 %v3733_v7, %v2341_v36  ;;  %vm2363_vm5 = vweird.f32 %v3733_v7  ;;  %vm2379_vm15 = vmor %vm2377_vm13, %vm2378_vm4  ;;  %v2398_v36 = vand.u32 2147483648, %v4642_v44 }
0x2810   :  { %v2374_v33 = vsub.f32 1.0, %v2373_v54  ;;  %v2403_v38 = vmul.f32 %v4657_v10, %v4639_v31  ;;  %v3737_v42 = vpop.eup %3736  ;;  %vm2408_vm1 = vweird.f32 %v4657_v10  ;;  %vm2364_vm7 = vmor %vm2362_vm0, %vm2363_vm5 }
0x2811   :  { %v2359_v16 = vsub.f32 1.0, %v2358_v27  ;;  %v4671_v49 = vpop.eup %3738  ;;  %v2388_v39 = vmul.f32 %v3737_v42, %v4642_v44  ;;  %vm2393_vm13 = vweird.f32 %v3737_v42  ;;  %vm4700_vm0 = vmor %vm2407_vm3, %vm2408_vm1  ;;  %vm2412_vm3 = vcmp.eq.f32.partialorder %v2411_v4, 8.507059e+37 }
0x2812   :  { %v2375_v19 = vmul.f32 %v3731_v56, %v2374_v33  ;;  %v2404_v0 = vsub.f32 1.0, %v2403_v38  ;;  %v2433_v37 = vmul.f32 %v4671_v49, %v4645_v40  ;;  %v4676_v58 = vpop.eup %3740  ;;  %vm2438_vm5 = vweird.f32 %v4671_v49 }
0x2813   :  { %v2360_v46 = vmul.f32 %v3733_v7, %v2359_v16  ;;  %v2389_v63 = vsub.f32 1.0, %v2388_v39  ;;  %v2418_v47 = vmul.f32 %v4676_v58, %v4649_v55  ;;  %v4687_v27 = vpop.eup %3742  ;;  %vm2437_vm1 = vweird.f32 %v4645_v40 }
0x2814   :  { %v2376_v60 = vadd.f32 %v3731_v56, %v2375_v19  ;;  %v2405_v20 = vmul.f32 %v4657_v10, %v2404_v0  ;;  %v2434_v54 = vsub.f32 1.0, %v2433_v37  ;;  %v2463_v31 = vmul.f32 %v4687_v27, %v4654_v25 }
0x2815   :  { %v2361_v62 = vadd.f32 %v3733_v7, %v2360_v46  ;;  %v2390_v5 = vmul.f32 %v3737_v42, %v2389_v63  ;;  %v2419_v33 = vsub.f32 1.0, %v2418_v47  ;;  %v2443_v37 = vand.u32 2147483648, %v4645_v40 }
0x2816   :  { %v2380_v61 = vsel %vm2379_vm15, %v3731_v56, %v2376_v60  ;;  %v2406_v8 = vadd.f32 %v4657_v10, %v2405_v20  ;;  %vm2423_vm15 = vweird.f32 %v4676_v58  ;;  %v2441_v20 = vand.u32 2147483647, %v4645_v40 }
0x2817   :  { %v2385_v50 = vsel %vm4659_vm14, %v2384_v2, %v2380_v61  ;;  %v2365_v32 = vsel %vm2364_vm7, %v3733_v7, %v2361_v62  ;;  %v2391_v56 = vadd.f32 %v3737_v42, %v2390_v5  ;;  %vm2392_vm14 = vweird.f32 %v4642_v44  ;;  %vm2439_vm7 = vmor %vm2437_vm1, %vm2438_vm5 }
0x2818   :  { %v2386_v38 = vmul.f32 %v2385_v50, %v4588_v13  ;;  %v2370_v16 = vsel %vm4665_vm2, %v2369_v9, %v2365_v32  ;;  %v2396_v13 = vand.u32 2147483647, %v4642_v44  ;;  %v4707_v7 = vperm.slane %v4634_v52, 6  ;;  %vm2394_vm2 = vmor %vm2392_vm14, %vm2393_vm13 }
0x2819   :  { %v2371_v19 = vmul.f32 %v2370_v16, %v4583_v28  ;;  %v2410_v28 = vsel %vm4700_vm0, %v4657_v10, %v2406_v8  ;;  %v2435_v2 = vmul.f32 %v4671_v49, %v2434_v54  ;;  %v2395_v0 = vsel %vm2394_vm2, %v3737_v42, %v2391_v56 }
0x281a   :  { %2489 = vperm.xlu0 %3606, %v2386_v38   ;;  %v2420_v39 = vmul.f32 %v4676_v58, %v2419_v33  ;;  %v2399_v44 = vor.u32 1.1754944e-38, %v2398_v36  ;;  %v2415_v52 = vsel %vm2412_vm3, %v2414_v24, %v2410_v28  ;;  %vm2397_vm4 = vcmp.eq.f32.partialorder %v2396_v13, 8.507059e+37 }
0x281b   :  { %2486 = vperm.xlu2 %3605, %v2371_v19   ;;  %3744 = vrcp.f32 %v4707_v7  ;;  %v2436_v10 = vadd.f32 %v4671_v49, %v2435_v2  ;;  %v2464_v9 = vsub.f32 1.0, %v2463_v31  ;;  %v2416_v42 = vmul.f32 %v2415_v52, %v4602_v57 }
0x281c   :  { %v2400_v46 = vsel %vm2397_vm4, %v2399_v44, %v2395_v0  ;;  %v2421_v60 = vadd.f32 %v4676_v58, %v2420_v39  ;;  %v2428_v4 = vand.u32 2147483648, %v4649_v55  ;;  %vm2422_vm13 = vweird.f32 %v4649_v55 }
0x281d   :  { %v2401_v63 = vmul.f32 %v2400_v46, %v4593_v6  ;;  %v2426_v62 = vand.u32 2147483647, %v4649_v55  ;;  %v2440_v12 = vsel %vm2439_vm7, %v4671_v49, %v2436_v10  ;;  %vm2424_vm0 = vmor %vm2422_vm13, %vm2423_vm15  ;;  %v2465_v47 = vmul.f32 %v4687_v27, %v2464_v9 }
0x281e   :  { %v2444_v61 = vor.u32 1.1754944e-38, %v2443_v37  ;;  %v2425_v40 = vsel %vm2424_vm0, %v4676_v58, %v2421_v60  ;;  %vm2442_vm14 = vcmp.eq.f32.partialorder %v2441_v20, 8.507059e+37  ;;  %v2429_v8 = vor.u32 1.1754944e-38, %v2428_v4 }
0x281f   :  { %vm2427_vm2 = vcmp.eq.f32.partialorder %v2426_v62, 8.507059e+37  ;;  %v2466_v55 = vadd.f32 %v4687_v27, %v2465_v47  ;;  %vm2468_vm3 = vweird.f32 %v4687_v27  ;;  %vm2467_vm4 = vweird.f32 %v4654_v25 }
0x2820   :  { %v2445_v5 = vsel %vm2442_vm14, %v2444_v61, %v2440_v12  ;;  %v2430_v54 = vsel %vm2427_vm2, %v2429_v8, %v2425_v40  ;;  %v2471_v50 = vand.u32 2147483647, %v4654_v25  ;;  %v2473_v32 = vand.u32 2147483648, %v4654_v25  ;;  %vm2469_vm15 = vmor %vm2467_vm4, %vm2468_vm3  ;;  %v2566_v40 = vpop.f32.mrf.mxu2  ;;  %v3798_v8 = vld [vmem:[%s5103_s5] ss:$0 sm:$0xff] }
0x2821   :  { %v3745_v57 = vpop.eup %3744  ;;  %v2446_v58 = vmul.f32 %v2445_v5, %v4610_v43  ;;  %v2458_v38 = vand.u32 2147483648, %v4707_v7  ;;  %v2431_v16 = vmul.f32 %v2430_v54, %v4599_v48  ;;  %v2456_v56 = vand.u32 2147483647, %v4707_v7 }
0x2822   :  { %2495 = vperm.xlu0 %3606, %v2416_v42   ;;  %v2448_v6 = vmul.f32 %v3745_v57, %v4707_v7  ;;  %vm2453_vm5 = vweird.f32 %v3745_v57  ;;  %v2470_v36 = vsel %vm2469_vm15, %v4687_v27, %v2466_v55  ;;  %vm2452_vm1 = vweird.f32 %v4707_v7 }
0x2823   :  { %2492 = vperm.xlu2 %3605, %v2401_v63   ;;  %v2474_v35 = vor.u32 1.1754944e-38, %v2473_v32  ;;  %vm2454_vm7 = vmor %vm2452_vm1, %vm2453_vm5  ;;  %vm2472_vm13 = vcmp.eq.f32.partialorder %v2471_v50, 8.507059e+37  ;;  %v2459_v25 = vor.u32 1.1754944e-38, %v2458_v38  ;;  %vm2457_vm0 = vcmp.eq.f32.partialorder %v2456_v56, 8.507059e+37 }
0x2824   :  { %v2449_v49 = vsub.f32 1.0, %v2448_v6  ;;  %vm5140_vm14 = vcmask 1047559   ;;  %vm5141_vm2 = vcmask 64512   ;;  %vm5142_vm3 = vcmask 261120  }
0x2825   :  { %v2475_v13 = vsel %vm2472_vm13, %v2474_v35, %v2470_v36  ;;  %v2567_v6 = vadd.f32 %v3798_v8, %v2566_v40  ;;  %vm5144_vm13 = vcmask 15360  }
0x2826   :  { %v2450_v33 = vmul.f32 %v3745_v57, %v2449_v49  ;;  %v2476_v48 = vmul.f32 %v2475_v13, %v4615_v53 }
0x2828   :  { %v2451_v19 = vadd.f32 %v3745_v57, %v2450_v33 }
0x282a   :  { %2501 = vperm.xlu0 %3606, %v2446_v58   ;;  %v2455_v43 = vsel %vm2454_vm7, %v3745_v57, %v2451_v19  ;;  %vm5143_vm7 = vmmov %vm5142_vm3 }
0x282b   :  { %2498 = vperm.xlu2 %3605, %v2431_v16   ;;  %v2460_v28 = vsel %vm2457_vm0, %v2459_v25, %v2455_v43 }
0x282c   :  { %v2461_v2 = vmul.f32 %v2460_v28, %v4607_v18 }
0x2832   :  { %2507 = vperm.xlu0 %3606, %v2476_v48  }
0x2833   :  { %2504 = vperm.xlu2 %3605, %v2461_v2  }
0x283a   :  { %3607 = vset.pattern.permute.xlu0 %v3807_v29 }
0x2875   :  { %v2487_v27 = vpop.permute.xlu2 %2486 }
0x2876   :  { %v2509_v44 = vperm.slane %v2487_v27, %v4181_v17 }
0x287d   :  { %v2493_v7 = vpop.permute.xlu2 %2492 }
0x287e   :  { %v2511_v53 = vperm.slane %v2493_v7, %v4181_v17 }
0x2885   :  { %v2499_v0 = vpop.permute.xlu2 %2498 }
0x2886   :  { %v2513_v60 = vperm.slane %v2499_v0, %v4181_v17 }
0x288c   :  { %v2490_v31 = vpop.permute.xlu0 %2489 }
0x288d   :  { %v2510_v39 = vperm.slane %v2490_v31, %v4181_v17  ;;  %v2505_v42 = vpop.permute.xlu2 %2504 }
0x288e   :  { %v2515_v63 = vperm.slane %v2505_v42, %v4181_v17 }
0x288f   :  { %v2517_v52 = vsel %vm1498_vm6, %v2510_v39, %v2509_v44 }
0x2890   :  { %v2518_v10 = vsel %vm1500_vm8, %v2511_v53, %v2517_v52 }
0x2894   :  { %v2496_v24 = vpop.permute.xlu0 %2495 }
0x2895   :  { %v2512_v46 = vperm.slane %v2496_v24, %v4181_v17 }
0x2897   :  { %v2519_v9 = vsel %vm1502_vm9, %v2512_v46, %v2518_v10 }
0x2898   :  { %v2520_v20 = vsel %vm1504_vm10, %v2513_v60, %v2519_v9 }
0x289c   :  { %v2502_v18 = vpop.permute.xlu0 %2501 }
0x289d   :  { %v2514_v37 = vperm.slane %v2502_v18, %v4181_v17 }
0x289f   :  { %v2521_v4 = vsel %vm1506_vm11, %v2514_v37, %v2520_v20 }
0x28a0   :  { %v2522_v47 = vsel %vm1508_vm12, %v2515_v63, %v2521_v4 }
0x28a4   :  { %v2508_v62 = vpop.permute.xlu0 %2507 }
0x28a5   :  { %v2516_v12 = vperm.slane %v2508_v62, %v4181_v17 }
0x28a7   :  { %v2523_v57 = vsel %vm5140_vm14, %v2516_v12, %v2522_v47 }
0x28a8   :  { %3547 = vmatmul.msk.f32.vlgmr.msra.gmra.mxu0 %vm5141_vm2, %v2523_v57 }
0x2925   :  { %v2544_v61 = vpop.f32.mrf.mxu0 }
0x2926   :  { %3550 = vmatmul.msk.f32.vlgmr.msra.gmra.mxu1 %vm5142_vm3, %v2544_v61 }
0x29a3   :  { %v2589_v5 = vpop.f32.mrf.mxu1 }
0x29a4   :  { %v2592_v54 = vadd.f32 %v2589_v5, %v2567_v6 }
0x29a6   :  { %3746 = vtanh.f32 %v2592_v54  ;;  %v3551_v49 = vmul.f32 -1.442695, %v2592_v54 }
0x29a8   :  { %3748 = vpow2.f32 %v3551_v49 }
0x29ac   :  { %v3747_v55 = vpop.eup %3746 }
0x29ad   :  { %2615 = vrot.lane.b32.xlu2 %v3747_v55, %s3803_s2 }
0x29ae   :  { %v3749_v50 = vpop.eup %3748 }
0x29af   :  { %v2596_v32 = vadd.f32 1.0, %v3749_v50 }
0x29b1   :  { %3750 = vrcp.f32 %v2596_v32  ;;  %v2608_v36 = vand.u32 2147483648, %v2596_v32  ;;  %vm2602_vm5 = vweird.f32 %v2596_v32  ;;  %v2606_v19 = vand.u32 2147483647, %v2596_v32 }
0x29b3   :  { %v2609_v43 = vor.u32 1.1754944e-38, %v2608_v36  ;;  %vm2607_vm1 = vcmp.eq.f32.partialorder %v2606_v19, 8.507059e+37 }
0x29b7   :  { %v3751_v58 = vpop.eup %3750 }
0x29b8   :  { %v2598_v33 = vmul.f32 %v3751_v58, %v2596_v32  ;;  %vm2603_vm4 = vweird.f32 %v3751_v58 }
0x29b9   :  { %vm2604_vm15 = vmor %vm2602_vm5, %vm2603_vm4 }
0x29ba   :  { %v2599_v38 = vsub.f32 1.0, %v2598_v33 }
0x29bc   :  { %v2600_v16 = vmul.f32 %v3751_v58, %v2599_v38 }
0x29be   :  { %v2601_v56 = vadd.f32 %v3751_v58, %v2600_v16 }
0x29c0   :  { %v2605_v35 = vsel %vm2604_vm15, %v3751_v58, %v2601_v56 }
0x29c1   :  { %v2610_v13 = vsel %vm2607_vm1, %v2609_v43, %v2605_v35 }
0x29c2   :  { %v2613_v48 = vmul.f32 %v2610_v13, %v4445_v51  ;;  %v3799_v51 = vld [vmem:[%s5104_s8] ss:$0 sm:$0xff] }
0x2a07   :  { %v2616_v25 = vpop.permute.xlu2 %2615 }
0x2a08   :  { %v2618_v28 = vmul.f32 %v2616_v25, %v2610_v13 }
0x2a0a   :  { %2620 = vrot.lane.b32.xlu0 %v2618_v28, %s3804_s29 }
0x2a7c   :  { %v2621_v2 = vpop.permute.xlu0 %2620 }
0x2a7d   :  { %v4770_v27 = vadd.f32 %v2621_v2, %v2613_v48 }
0x2a7f   :  { %3752 = vtanh.f32 %v4770_v27 }
0x2a85   :  { %v3753_v31 = vpop.eup %3752 }
0x2a86   :  { %2626 = vrot.lane.b32.xlu2 %v3753_v31, %s3803_s2 }
0x2ae0   :  { %v2627_v7 = vpop.permute.xlu2 %2626 }
0x2ae1   :  { %v2629_v24 = vmul.f32 %v2627_v7, %v2610_v13 }
0x2ae3   :  { %2631 = vrot.lane.b32.xlu0 %v2629_v24, %s3804_s29 }
0x2b55   :  { %v2632_v0 = vpop.permute.xlu0 %2631 }
0x2b56   :  { %3552 = vmatmul.msk.f32.vlgmr.msra.gmra.mxu3 %vm5143_vm7, %v2632_v0  ;;  %3365 = vmatpush.msrb.mxu0 %v2632_v0 }
0x2bd9   :  { %v2652_v39 = vpop.f32.mrf.mxu3 }
0x2bda   :  { %v2653_v44 = vadd.f32 %v3799_v51, %v2652_v39 }
0x2bdc   :  { %3754 = vtanh.f32 %v2653_v44 }
0x2be2   :  { %v4779_v52 = vpop.eup %3754 }
0x2be3   :  { %3559 = vmatmul.msk.f32.vlgmr.msrb.gmra.mxu2 %vm5144_vm13, %v4779_v52  ;;  %v4785_v46 = vsub.f32 %v4779_v52, %v4466_v59 }
0x2be5   :  { %v2663_v53 = vand.u32 2147483647, %v4785_v46  ;;  %vm2710_vm5 = vcmp.lt.f32.partialorder %v4785_v46, 0.0 }
0x2be7   :  { %2696 = vrot.lane.b32.xlu2 %v2663_v53, %s3805_s23  ;;  %2665 = vrot.lane.b32.xlu1 %v2663_v53, %s3806_s24 }
0x2c41   :  { %v2697_v16 = vpop.permute.xlu2 %2696 }
0x2c42   :  { %vm2699_vm4 = vcmp.gt.f32.partialorder %v2663_v53, %v2697_v16 }
0x2c59   :  { %v2666_v18 = vpop.permute.xlu1 %2665 }
0x2c5a   :  { %v2668_v10 = vmax.f32 %v2663_v53, %v2666_v18  ;;  %v2669_v47 = vmin.f32 %v2663_v53, %v2666_v18 }
0x2c5c   :  { %v2670_v9 = vadd.f32 1e-30, %v2668_v10 }
0x2c5e   :  { %3756 = vrcp.f32 %v2670_v9  ;;  %v2682_v20 = vand.u32 2147483648, %v2670_v9  ;;  %v2680_v63 = vand.u32 2147483647, %v2670_v9  ;;  %vm2676_vm14 = vweird.f32 %v2670_v9 }
0x2c60   :  { %v2683_v12 = vor.u32 1.1754944e-38, %v2682_v20  ;;  %vm2681_vm3 = vcmp.eq.f32.partialorder %v2680_v63, 8.507059e+37 }
0x2c64   :  { %v3757_v37 = vpop.eup %3756 }
0x2c65   :  { %v2672_v60 = vmul.f32 %v3757_v37, %v2670_v9  ;;  %vm2677_vm0 = vweird.f32 %v3757_v37 }
0x2c66   :  { %vm2678_vm2 = vmor %vm2676_vm14, %vm2677_vm0 }
0x2c67   :  { %v2673_v42 = vsub.f32 1.0, %v2672_v60 }
0x2c69   :  { %v2674_v4 = vmul.f32 %v3757_v37, %v2673_v42 }
0x2c6b   :  { %v2675_v62 = vadd.f32 %v3757_v37, %v2674_v4 }
0x2c6d   :  { %v2679_v57 = vsel %vm2678_vm2, %v3757_v37, %v2675_v62 }
0x2c6e   :  { %v2684_v61 = vsel %vm2681_vm3, %v2683_v12, %v2679_v57 }
0x2c6f   :  { %v2685_v40 = vmul.f32 %v2684_v61, %v2669_v47 }
0x2c71   :  { %v2686_v8 = vmul.f32 %v2685_v40, %v2685_v40 }
0x2c73   :  { %v2687_v6 = vmul.f32 0.0208351, %v2686_v8 }
0x2c75   :  { %v3553_v5 = vadd.f32 -0.085133, %v2687_v6 }
0x2c77   :  { %v2689_v54 = vmul.f32 %v3553_v5, %v2686_v8 }
0x2c79   :  { %v2690_v55 = vadd.f32 0.180141, %v2689_v54 }
0x2c7b   :  { %v2691_v49 = vmul.f32 %v2690_v55, %v2686_v8 }
0x2c7d   :  { %v3554_v50 = vadd.f32 -0.3302995, %v2691_v49 }
0x2c7f   :  { %v2693_v32 = vmul.f32 %v3554_v50, %v2686_v8 }
0x2c81   :  { %v2694_v58 = vadd.f32 0.999866, %v2693_v32 }
0x2c83   :  { %v2695_v33 = vmul.f32 %v2694_v58, %v2685_v40 }
0x2c85   :  { %2706 = vrot.lane.b32.xlu2 %v2695_v33, %s3805_s23  ;;  %v2700_v38 = vsub.f32 1.5707964, %v2695_v33 }
0x2c87   :  { %2702 = vrot.lane.b32.xlu0 %v2700_v38, %s3805_s23 }
0x2cdf   :  { %v2707_v56 = vpop.permute.xlu2 %2706 }
0x2cf9   :  { %v2703_v36 = vpop.permute.xlu0 %2702 }
0x2cfa   :  { %v2709_v19 = vsel %vm2699_vm4, %v2703_v36, %v2707_v56 }
0x2cfb   :  { %v2711_v35 = vsub.f32 3.1415927, %v2709_v19  ;;  %2717 = vrot.lane.b32.xlu2 %v2709_v19, %s3806_s24 }
0x2cfd   :  { %2713 = vrot.lane.b32.xlu0 %v2711_v35, %s3806_s24 }
0x2d03   :  { %2806 = vperm.xlu2 %3605, %v4779_v52  }
0x2d05   :  { %2812 = vperm.xlu0 %3607, %v4779_v52  }
0x2d0b   :  { %3608 = vset.pattern.permute.xlu2 %v4117_v1 }
0x2d55   :  { %v2718_v43 = vpop.permute.xlu2 %2717 }
0x2d5d   :  { %v2807_v24 = vpop.permute.xlu2 %2806 }
0x2d6f   :  { %v2714_v25 = vpop.permute.xlu0 %2713 }
0x2d70   :  { %v2720_v13 = vsel %vm2710_vm5, %v2714_v25, %v2718_v43 }
0x2d71   :  { %v2721_v28 = vsub.f32 0.0, %v2720_v13  ;;  %2727 = vrot.lane.b32.xlu1 %v2720_v13, %s3805_s23 }
0x2d73   :  { %2723 = vrot.lane.b32.xlu0 %v2721_v28, %s3805_s23 }
0x2d77   :  { %v2813_v0 = vpop.permute.xlu0 %2812 }
0x2da6   :  { %2736 = vxpose.xlu1.b32.start.end [1/1] (short) (narrow) %v4779_v52, 8 }
0x2de3   :  { %v2728_v48 = vpop.permute.xlu1 %2727 }
0x2de5   :  { %v2724_v62 = vpop.permute.xlu0 %2723 }
0x2de6   :  { %v2730_v61 = vsel %vm2710_vm5, %v2724_v62, %v2728_v48 }
0x2de7   :  { %v2731_v55 = vmul.f32 57.29578, %v2730_v61 }
0x2de9   :  { %v2732_v38 = vmul.f32 0.0027777778, %v2731_v55 }
0x2deb   :  { %v2733_v25 = vfloor.f32 %v2732_v38 }
0x2df9   :  { %3609 = vset.pattern.permute.xlu1 %v4117_v1 }
0x2e4a   :  { %v2752_v2 = vpop.trf.xlu1 }
0x2e4b   :  { %v2804_v31 = vperm.slane %v2752_v2, 0  ;;  %v2810_v7 = vperm.slane %v2752_v2, 1 }
0x2e4d   :  { %v4804_v39 = vsub.f32 %v2804_v31, %v2807_v24  ;;  %v4806_v51 = vsub.f32 %v2810_v7, %v2813_v0  ;;  %v2734_v31 = vmul.f32 360.0, %v2733_v25 }
0x2e4f   :  { %v2816_v44 = vmul.f32 %v4804_v39, %v4804_v39  ;;  %v2817_v53 = vmul.f32 %v4806_v51, %v4806_v51  ;;  %v4813_v18 = vand.u32 2147483647, %v4804_v39  ;;  %v4816_v10 = vand.u32 2147483647, %v4806_v51 }
0x2e50   :  { %v2735_v0 = vsub.f32 %v2731_v55, %v2734_v31  ;;  %vm2865_vm3 = vcmp.lt.f32.partialorder %v4804_v39, 0.0  ;;  %vm2868_vm4 = vcmp.lt.f32.partialorder %v4806_v51, 0.0 }
0x2e51   :  { %v2818_v9 = vadd.f32 %v2817_v53, %v2816_v44  ;;  %v2834_v37 = vmax.f32 %v4813_v18, %v4816_v10  ;;  %v2835_v60 = vmin.f32 %v4813_v18, %v4816_v10  ;;  %vm2862_vm15 = vcmp.gt.f32.partialorder %v4816_v10, %v4813_v18 }
0x2e53   :  { %v2819_v42 = vadd.f32 1e-12, %v2818_v9  ;;  %v2836_v20 = vadd.f32 1e-30, %v2834_v37 }
0x2e55   :  { %3758 = vrsqrt.f32 %v2819_v42  ;;  %v2848_v8 = vand.u32 2147483648, %v2836_v20  ;;  %v2846_v54 = vand.u32 2147483647, %v2836_v20  ;;  %vm2842_vm7 = vweird.f32 %v2836_v20 }
0x2e56   :  { %3760 = vrcp.f32 %v2836_v20  ;;  %vm2827_vm14 = vcmp.eq.f32.partialorder %v2819_v42, inf  ;;  %v2830_v36 = vand.u32 2147483648, %v2819_v42  ;;  %vm2829_vm2 = vcmp.eq.f32.partialorder %v2819_v42, 0.0 }
0x2e57   :  { %v2849_v32 = vor.u32 1.1754944e-38, %v2848_v8  ;;  %vm2847_vm0 = vcmp.eq.f32.partialorder %v2846_v54, 8.507059e+37 }
0x2e5b   :  { %v3759_v4 = vpop.eup %3758 }
0x2e5c   :  { %v3761_v63 = vpop.eup %3760  ;;  %v2821_v12 = vmul.f32 %v3759_v4, %v2819_v42 }
0x2e5d   :  { %v2838_v47 = vmul.f32 %v3761_v63, %v2836_v20  ;;  %vm2843_vm1 = vweird.f32 %v3761_v63 }
0x2e5e   :  { %v2822_v57 = vmul.f32 %v3759_v4, %v2821_v12  ;;  %vm2844_vm13 = vmor %vm2842_vm7, %vm2843_vm1  ;;  %vm5145_vm7 = vcmask 130048  }
0x2e5f   :  { %v2839_v40 = vsub.f32 1.0, %v2838_v47 }
0x2e60   :  { %v2823_v6 = vmul.f32 0.5, %v2822_v57 }
0x2e61   :  { %v2840_v5 = vmul.f32 %v3761_v63, %v2839_v40 }
0x2e62   :  { %v2824_v49 = vsub.f32 1.5, %v2823_v6 }
0x2e63   :  { %v2841_v50 = vadd.f32 %v3761_v63, %v2840_v5 }
0x2e64   :  { %v2825_v58 = vmul.f32 %v3759_v4, %v2824_v49 }
0x2e65   :  { %v2845_v33 = vsel %vm2844_vm13, %v3761_v63, %v2841_v50 }
0x2e66   :  { %v2850_v16 = vsel %vm2847_vm0, %v2849_v32, %v2845_v33  ;;  %v2826_v56 = vmul.f32 %v2825_v58, %v2819_v42 }
0x2e67   :  { %v2851_v46 = vmul.f32 %v2850_v16, %v2835_v60 }
0x2e68   :  { %v2828_v19 = vsel %vm2827_vm14, %v2819_v42, %v2826_v56  ;;  %vm5146_vm14 = vmmov %vm5145_vm7 }
0x2e69   :  { %v2852_v35 = vmul.f32 %v2851_v46, %v2851_v46  ;;  %v4826_v43 = vsel %vm2829_vm2, %v2830_v36, %v2828_v19 }
0x2e6a   :  { %v3030_v13 = vperm.slane %v4826_v43, 1  ;;  %v3023_v28 = vperm.slane %v4826_v43, 0  ;;  %v3037_v44 = vperm.slane %v4826_v43, 2 }
0x2e6b   :  { %v2853_v48 = vmul.f32 0.0208351, %v2852_v35 }
0x2e6c   :  { %3035 = vperm.xlu1 %3609, %v3030_v13   ;;  %3028 = vperm.xlu2 %3608, %v3023_v28  }
0x2e6d   :  { %v3555_v2 = vadd.f32 -0.085133, %v2853_v48 }
0x2e6f   :  { %v2855_v7 = vmul.f32 %v3555_v2, %v2852_v35 }
0x2e71   :  { %v2856_v24 = vadd.f32 0.180141, %v2855_v7 }
0x2e73   :  { %v2857_v53 = vmul.f32 %v2856_v24, %v2852_v35 }
0x2e74   :  { %3042 = vperm.xlu1 %3609, %v3037_v44   ;;  %2769 = vrot.lane.b32.xlu2 %v2735_v0, %s3806_s24 }
0x2e75   :  { %3610 = vset.pattern.permute.xlu2 %v3807_v29  ;;  %v3556_v9 = vadd.f32 -0.3302995, %v2857_v53 }
0x2e77   :  { %v2859_v37 = vmul.f32 %v3556_v9, %v2852_v35  ;;  %v3044_v9 = vperm.slane %v4826_v43, 3 }
0x2e79   :  { %v2860_v60 = vadd.f32 0.999866, %v2859_v37  ;;  %v3058_v37 = vperm.slane %v4826_v43, 5 }
0x2e7b   :  { %v2861_v42 = vmul.f32 %v2860_v60, %v2851_v46 }
0x2e7c   :  { %2877 = vperm.xlu2 %3610, %v2735_v0  }
0x2e7d   :  { %v2863_v20 = vsub.f32 1.5707964, %v2861_v42 }
0x2e7f   :  { %v2864_v4 = vsel %vm2862_vm15, %v2863_v20, %v2861_v42  ;;  %v3072_v42 = vperm.slane %v4826_v43, 7 }
0x2e80   :  { %v2866_v63 = vsub.f32 3.1415927, %v2864_v4 }
0x2e82   :  { %v2867_v62 = vsel %vm2865_vm3, %v2866_v63, %v2864_v4  ;;  %v3051_v63 = vperm.slane %v4826_v43, 4 }
0x2e83   :  { %v2869_v12 = vsub.f32 0.0, %v2867_v62 }
0x2e84   :  { %3611 = vset.pattern.permute.xlu2 %v4117_v1 }
0x2e85   :  { %v2870_v29 = vsel %vm2868_vm4, %v2869_v12, %v2867_v62  ;;  %v3065_v62 = vperm.slane %v4826_v43, 6  ;;  %vm5147_vm4 = vmmov %vm5145_vm7 }
0x2e86   :  { %v2871_v61 = vmul.f32 57.29578, %v2870_v29 }
0x2e88   :  { %v2872_v40 = vmul.f32 0.0027777778, %v2871_v61 }
0x2e8a   :  { %v2873_v18 = vfloor.f32 %v2872_v40 }
0x2e8c   :  { %v2874_v10 = vmul.f32 360.0, %v2873_v18 }
0x2e8e   :  { %v2875_v6 = vsub.f32 %v2871_v61, %v2874_v10 }
0x2ec6   :  { %v4839_v47 = vpop.permute.xlu2 %3028 }
0x2ece   :  { %v2770_v57 = vpop.permute.xlu2 %2769 }
0x2ecf   :  { %2772 = vxpose.xlu0.b32.start.end [1/1] (short) (narrow) %v2770_v57, 8 }
0x2ed6   :  { %v2878_v8 = vpop.permute.xlu2 %2877 }
0x2ed7   :  { %v2880_v39 = vsub.f32 %v2875_v6, %v2878_v8 }
0x2ed9   :  { %v2881_v5 = vmul.f32 0.0027777778, %v2880_v39 }
0x2edb   :  { %v2882_v54 = vfloor.f32 %v2881_v5 }
0x2edd   :  { %v2883_v51 = vmul.f32 360.0, %v2882_v54 }
0x2ede   :  { %v4855_v43 = vpop.permute.xlu1 %3035 }
0x2edf   :  { %v2884_v32 = vsub.f32 %v2880_v39, %v2883_v51 }
0x2ee1   :  { %v2895_v38 = vmul.f32 0.033333335, %v2884_v32 }
0x2ee6   :  { %v4862_v54 = vpop.permute.xlu1 %3042 }
0x2f36   :  { %3612 = vset.pattern.permute.xlu0 %v4117_v1  ;;  %v2896_v1 = vfloor.f32 %v2895_v38 }
0x2f38   :  { %v2897_v19 = vmax.f32 %v2896_v1, 0.0 }
0x2f3a   :  { %v2898_v13 = vmin.f32 %v2897_v19, 11.0 }
0x2f73   :  { %v2788_v55 = vpop.trf.xlu0 }
0x2f74   :  { %v2885_v49 = vperm.slane %v2788_v55, 0 }
0x2f76   :  { %v2886_v50 = vsub.f32 %v2885_v49, %v2878_v8 }
0x2f78   :  { %v2887_v58 = vmul.f32 0.0027777778, %v2886_v50 }
0x2f7a   :  { %v2888_v33 = vfloor.f32 %v2887_v58 }
0x2f7c   :  { %v2889_v16 = vmul.f32 360.0, %v2888_v33 }
0x2f7e   :  { %v2890_v56 = vsub.f32 %v2886_v50, %v2889_v16 }
0x2f80   :  { %v2891_v46 = vmul.f32 0.033333335, %v2890_v56 }
0x2f82   :  { %v2892_v36 = vfloor.f32 %v2891_v46 }
0x2f84   :  { %v2893_v35 = vmax.f32 %v2892_v36, 0.0 }
0x2f86   :  { %v2894_v25 = vmin.f32 %v2893_v35, 11.0 }
0x2f88   :  { %v2899_v28 = vmul.f32 12.0, %v2894_v25 }
0x2f8a   :  { %v2900_v48 = vadd.f32 %v2899_v28, %v2898_v13 }
0x2f8c   :  { %vm3573_vm5 = vcmp.lt.s32.totalorder %v2900_v48, 0  ;;  %v3574_v2 = vceil.f32 %v2900_v48  ;;  %v3575_v31 = vfloor.f32 %v2900_v48 }
0x2f8e   :  { %v3576_v7 = vsel %vm3573_vm5, %v3574_v2, %v3575_v31 }
0x2f8f   :  { %v3577_v24 = vcvt.f32.s32 %v3576_v7 }
0x2f91   :  { %v2937_v0 = vperm.slane %v3577_v24, 5  ;;  %v2930_v44 = vperm.slane %v3577_v24, 4  ;;  %v2902_v53 = vperm.slane %v3577_v24, 0  ;;  %v2909_v60 = vperm.slane %v3577_v24, 1 }
0x2f92   :  { %v2916_v20 = vperm.slane %v3577_v24, 2  ;;  %v2923_v4 = vperm.slane %v3577_v24, 3  ;;  %v2944_v12 = vperm.slane %v3577_v24, 6  ;;  %v2951_v29 = vperm.slane %v3577_v24, 7 }
0x2f93   :  { %2942 = vperm.xlu1 %3609, %v2937_v0   ;;  %2935 = vperm.xlu0 %3612, %v2930_v44  }
0x2f94   :  { %2907 = vperm.xlu2 %3611, %v2902_v53  }
0x2f9b   :  { %3049 = vperm.xlu1 %3609, %v3044_v9   ;;  %3063 = vperm.xlu0 %3612, %v3058_v37  }
0x2f9c   :  { %2914 = vperm.xlu2 %3611, %v2909_v60  }
0x2fa3   :  { %3077 = vperm.xlu1 %3609, %v3072_v42   ;;  %3614 = vset.pattern.permute.xlu0 %v3808_v45 }
0x2fa4   :  { %2921 = vperm.xlu2 %3611, %v2916_v20  }
0x2fab   :  { %3615 = vset.pattern.permute.xlu1 %v3808_v45 }
0x2fac   :  { %2928 = vperm.xlu2 %3611, %v2923_v4  }
0x2fb4   :  { %3056 = vperm.xlu2 %3611, %v3051_v63  }
0x2fbc   :  { %3070 = vperm.xlu2 %3611, %v3065_v62  }
0x2fc4   :  { %2949 = vperm.xlu2 %3611, %v2944_v12  }
0x2fcc   :  { %2956 = vperm.xlu2 %3611, %v2951_v29  }
0x2fd4   :  { %3613 = vset.pattern.permute.xlu2 %v3808_v45 }
0x2fee   :  { %v2908_v57 = vpop.permute.xlu2 %2907 }
0x2fef   :  { %vm2958_vm15 = vcmp.eq.s32.totalorder %v4181_v17, %v2908_v57  ;;  %vm2959_vm1 = vcmp.eq.s32.totalorder %v4189_v21, %v2908_v57 }
0x2ff0   :  { %v2974_v61 = vsel %vm2958_vm15, %v4191_v22, 0.0  ;;  %v2975_v40 = vsel %vm2959_vm1, %v4193_v23, 0.0 }
0x2ff1   :  { %v2990_v18 = vsel %vm5145_vm7, %v2975_v40, 0.0 }
0x2ff2   :  { %v2991_v10 = vadd.f32 %v2990_v18, %v2974_v61 }
0x2ff5   :  { %2992 = vadd.xlane.f32.xlu2 %v2991_v10 }
0x2ff6   :  { %v2915_v8 = vpop.permute.xlu2 %2914 }
0x2ff7   :  { %vm2960_vm13 = vcmp.eq.s32.totalorder %v4181_v17, %v2915_v8  ;;  %vm2961_vm0 = vcmp.eq.s32.totalorder %v4189_v21, %v2915_v8 }
0x2ff8   :  { %v2976_v45 = vsel %vm2960_vm13, %v4191_v22, 0.0  ;;  %v2977_v6 = vsel %vm2961_vm0, %v4193_v23, 0.0  ;;  %vm5148_vm13 = vmmov %vm5147_vm4 }
0x2ff9   :  { %v2994_v39 = vsel %vm5146_vm14, %v2977_v6, 0.0  ;;  %vm5149_vm0 = vmmov %vm5147_vm4 }
0x2ffa   :  { %v2995_v5 = vadd.f32 %v2994_v39, %v2976_v45 }
0x2ffd   :  { %2996 = vadd.xlane.f32.xlu2 %v2995_v5 }
0x2ffe   :  { %v2922_v55 = vpop.permute.xlu2 %2921 }
0x2fff   :  { %vm2962_vm2 = vcmp.eq.s32.totalorder %v4181_v17, %v2922_v55  ;;  %vm2963_vm3 = vcmp.eq.s32.totalorder %v4189_v21, %v2922_v55 }
0x3000   :  { %v2978_v51 = vsel %vm2962_vm2, %v4191_v22, 0.0  ;;  %v2979_v49 = vsel %vm2963_vm3, %v4193_v23, 0.0  ;;  %vm5150_vm3 = vmmov %vm5149_vm0 }
0x3001   :  { %v2998_v50 = vsel %vm5147_vm4, %v2979_v49, 0.0 }
0x3002   :  { %v2999_v32 = vadd.f32 %v2998_v50, %v2978_v51 }
0x3005   :  { %3000 = vadd.xlane.f32.xlu2 %v2999_v32  ;;  %v2943_v58 = vpop.permute.xlu1 %2942  ;;  %v2936_v33 = vpop.permute.xlu0 %2935 }
0x3006   :  { %vm2968_vm5 = vcmp.eq.s32.totalorder %v4181_v17, %v2943_v58  ;;  %vm2969_vm15 = vcmp.eq.s32.totalorder %v4189_v21, %v2943_v58  ;;  %vm2966_vm1 = vcmp.eq.s32.totalorder %v4181_v17, %v2936_v33  ;;  %vm2967_vm7 = vcmp.eq.s32.totalorder %v4189_v21, %v2936_v33  ;;  %v2929_v38 = vpop.permute.xlu2 %2928 }
0x3007   :  { %v2984_v16 = vsel %vm2968_vm5, %v4191_v22, 0.0  ;;  %v2985_v56 = vsel %vm2969_vm15, %v4193_v23, 0.0  ;;  %v2982_v1 = vsel %vm2966_vm1, %v4191_v22, 0.0  ;;  %v2983_v46 = vsel %vm2967_vm7, %v4193_v23, 0.0  ;;  %vm5151_vm15 = vmmov %vm5149_vm0 }
0x3008   :  { %v3010_v36 = vsel %vm5148_vm13, %v2985_v56, 0.0  ;;  %v3006_v19 = vsel %vm5149_vm0, %v2983_v46, 0.0  ;;  %vm2964_vm14 = vcmp.eq.s32.totalorder %v4181_v17, %v2929_v38  ;;  %vm2965_vm2 = vcmp.eq.s32.totalorder %v4189_v21, %v2929_v38  ;;  %vm5152_vm13 = vmmov %vm5149_vm0 }
0x3009   :  { %v3011_v35 = vadd.f32 %v3010_v36, %v2984_v16  ;;  %v3007_v25 = vadd.f32 %v3006_v19, %v2982_v1  ;;  %v2980_v13 = vsel %vm2964_vm14, %v4191_v22, 0.0  ;;  %v2981_v28 = vsel %vm2965_vm2, %v4193_v23, 0.0 }
0x300a   :  { %v3002_v48 = vsel %vm5150_vm3, %v2981_v28, 0.0  ;;  %vm5153_vm0 = vcmask 1047559   ;;  %vm5154_vm14 = vcmask 64512  }
0x300b   :  { %v3003_v2 = vadd.f32 %v3002_v48, %v2980_v13  ;;  %3012 = vadd.xlane.f32.xlu1 %v3011_v35  ;;  %3008 = vadd.xlane.f32.xlu0 %v3007_v25 }
0x300d   :  { %3004 = vadd.xlane.f32.xlu2 %v3003_v2  ;;  %v3050_v29 = vpop.permute.xlu1 %3049  ;;  %v3064_v40 = vpop.permute.xlu0 %3063 }
0x300e   :  { %v3057_v31 = vpop.permute.xlu2 %3056 }
0x3015   :  { %v3078_v18 = vpop.permute.xlu1 %3077 }
0x3016   :  { %v3071_v7 = vpop.permute.xlu2 %3070 }
0x301e   :  { %v2950_v24 = vpop.permute.xlu2 %2949 }
0x301f   :  { %vm2970_vm4 = vcmp.eq.s32.totalorder %v4181_v17, %v2950_v24  ;;  %vm2971_vm5 = vcmp.eq.s32.totalorder %v4189_v21, %v2950_v24 }
0x3020   :  { %v2986_v0 = vsel %vm2970_vm4, %v4191_v22, 0.0  ;;  %v2987_v44 = vsel %vm2971_vm5, %v4193_v23, 0.0 }
0x3021   :  { %v3014_v53 = vsel %vm5151_vm15, %v2987_v44, 0.0 }
0x3022   :  { %v3015_v9 = vadd.f32 %v3014_v53, %v2986_v0 }
0x3024   :  { %3016 = vadd.xlane.f32.xlu0 %v3015_v9 }
0x3026   :  { %v2957_v37 = vpop.permute.xlu2 %2956 }
0x3027   :  { %vm2972_vm1 = vcmp.eq.s32.totalorder %v4181_v17, %v2957_v37  ;;  %vm2973_vm7 = vcmp.eq.s32.totalorder %v4189_v21, %v2957_v37 }
0x3028   :  { %v2988_v60 = vsel %vm2972_vm1, %v4191_v22, 0.0  ;;  %v2989_v42 = vsel %vm2973_vm7, %v4193_v23, 0.0 }
0x3029   :  { %v3018_v20 = vsel %vm5152_vm13, %v2989_v42, 0.0 }
0x302a   :  { %v3019_v4 = vadd.f32 %v3018_v20, %v2988_v60 }
0x302c   :  { %3020 = vadd.xlane.f32.xlu1 %v3019_v4 }
0x3068   :  { %v2993_v63 = vpop.xlane.xlu2 %2992 }
0x3069   :  { %v3087_v62 = vsub.f32 %v2993_v63, %v4839_v47 }
0x306b   :  { %v3095_v12 = vmax.f32 %v3087_v62, 0.0 }
0x306d   :  { %v4896_v57 = vmul.f32 %v3095_v12, %v4155_v11 }
0x306f   :  { %3120 = vperm.xlu2 %3613, %v4896_v57  }
0x3070   :  { %v2997_v61 = vpop.xlane.xlu2 %2996 }
0x3071   :  { %v3088_v21 = vsub.f32 %v2997_v61, %v4855_v43 }
0x3073   :  { %v3096_v22 = vmax.f32 %v3088_v21, 0.0 }
0x3075   :  { %v4901_v23 = vmul.f32 %v3096_v22, %v4178_v14 }
0x3077   :  { %3123 = vperm.xlu0 %3614, %v4901_v23  }
0x3078   :  { %v3001_v10 = vpop.xlane.xlu2 %3000 }
0x3079   :  { %v3089_v47 = vsub.f32 %v3001_v10, %v4862_v54 }
0x307b   :  { %v3097_v8 = vmax.f32 %v3089_v47, 0.0 }
0x307d   :  { %v4906_v11 = vmul.f32 %v3097_v8, %v4183_v15 }
0x307e   :  { %v3013_v45 = vpop.xlane.xlu1 %3012  ;;  %v3009_v6 = vpop.xlane.xlu0 %3008 }
0x307f   :  { %v3092_v39 = vsub.f32 %v3013_v45, %v3064_v40  ;;  %v3091_v5 = vsub.f32 %v3009_v6, %v3057_v31  ;;  %3126 = vperm.xlu2 %3613, %v4906_v11  }
0x3080   :  { %v3005_v43 = vpop.xlane.xlu2 %3004 }
0x3081   :  { %v3100_v14 = vmax.f32 %v3092_v39, 0.0  ;;  %v3099_v55 = vmax.f32 %v3091_v5, 0.0  ;;  %v3090_v51 = vsub.f32 %v3005_v43, %v3050_v29 }
0x3083   :  { %v4910_v49 = vmul.f32 %v3100_v14, %v4207_v3  ;;  %v4913_v50 = vmul.f32 %v3099_v55, %v4163_v26  ;;  %v3098_v54 = vmax.f32 %v3090_v51, 0.0 }
0x3085   :  { %v4916_v15 = vmul.f32 %v3098_v54, %v4200_v30  ;;  %3132 = vperm.xlu1 %3615, %v4913_v50   ;;  %3135 = vperm.xlu0 %3614, %v4910_v49  }
0x3087   :  { %3129 = vperm.xlu2 %3613, %v4916_v15  }
0x3097   :  { %v3017_v32 = vpop.xlane.xlu0 %3016 }
0x3098   :  { %v3093_v58 = vsub.f32 %v3017_v32, %v3071_v7 }
0x309a   :  { %v3101_v33 = vmax.f32 %v3093_v58, 0.0 }
0x309c   :  { %v4922_v38 = vmul.f32 %v3101_v33, %v4165_v34 }
0x309e   :  { %3138 = vperm.xlu2 %3613, %v4922_v38  }
0x309f   :  { %v3021_v26 = vpop.xlane.xlu1 %3020 }
0x30a0   :  { %v3094_v3 = vsub.f32 %v3021_v26, %v3078_v18 }
0x30a2   :  { %v3102_v16 = vmax.f32 %v3094_v3, 0.0 }
0x30a4   :  { %v4926_v30 = vmul.f32 %v3102_v16, %v4214_v41 }
0x30a6   :  { %3141 = vperm.xlu1 %3615, %v4926_v30  }
0x30c9   :  { %v3121_v56 = vpop.permute.xlu2 %3120 }
0x30ca   :  { %v3143_v19 = vperm.slane %v3121_v56, %v4181_v17 }
0x30d9   :  { %v3127_v1 = vpop.permute.xlu2 %3126 }
0x30da   :  { %v3145_v13 = vperm.slane %v3127_v1, %v4181_v17 }
0x30e1   :  { %v3130_v35 = vpop.permute.xlu2 %3129 }
0x30e2   :  { %v3146_v2 = vperm.slane %v3130_v35, %v4181_v17 }
0x30e9   :  { %v3124_v46 = vpop.permute.xlu0 %3123 }
0x30ea   :  { %v3144_v36 = vperm.slane %v3124_v46, %v4181_v17 }
0x30ec   :  { %v3151_v34 = vsel %vm1498_vm6, %v3144_v36, %v3143_v19 }
0x30ed   :  { %v3152_v28 = vsel %vm1500_vm8, %v3145_v13, %v3151_v34 }
0x30ee   :  { %v3153_v31 = vsel %vm1502_vm9, %v3146_v2, %v3152_v28 }
0x30f7   :  { %v3133_v25 = vpop.permute.xlu1 %3132  ;;  %v3136_v48 = vpop.permute.xlu0 %3135 }
0x30f8   :  { %v3147_v41 = vperm.slane %v3133_v25, %v4181_v17  ;;  %v3148_v7 = vperm.slane %v3136_v48, %v4181_v17  ;;  %v3139_v0 = vpop.permute.xlu2 %3138 }
0x30f9   :  { %v3149_v53 = vperm.slane %v3139_v0, %v4181_v17 }
0x30fa   :  { %v3154_v24 = vsel %vm1504_vm10, %v3147_v41, %v3153_v31 }
0x30fb   :  { %v3155_v44 = vsel %vm1506_vm11, %v3148_v7, %v3154_v24 }
0x30fc   :  { %v3156_v60 = vsel %vm1508_vm12, %v3149_v53, %v3155_v44 }
0x3118   :  { %v3142_v9 = vpop.permute.xlu1 %3141 }
0x3119   :  { %v3150_v37 = vperm.slane %v3142_v9, %v4181_v17 }
0x311b   :  { %v3157_v42 = vsel %vm5153_vm0, %v3150_v37, %v3156_v60 }
0x311c   :  { %v3159_v20 = vsel %vm5154_vm14, %v3157_v42, 0.0 }
0x311d   :  { %3160 = vadd.xlane.f32.xlu0 %v3159_v20 }
0x3190   :  { %v3161_v4 = vpop.xlane.xlu0 %3160 }
0x3191   :  { %v4945_v63 = vadd.f32 1e-09, %v3161_v4 }
0x3193   :  { %v3165_v62 = vperm.slane %v4945_v63, 1  ;;  %v3164_v12 = vperm.slane %v4945_v63, 0  ;;  %v4950_v29 = vperm.slane %v4945_v63, 3  ;;  %v4953_v61 = vperm.slane %v4945_v63, 2 }
0x3194   :  { %v4956_v21 = vperm.slane %v4945_v63, 5  ;;  %v4960_v22 = vperm.slane %v4945_v63, 4  ;;  %v4965_v8 = vperm.slane %v4945_v63, 7 }
0x3195   :  { %3762 = vrcp.f32 %v3165_v62  ;;  %v3204_v40 = vand.u32 2147483647, %v3165_v62  ;;  %v3206_v18 = vand.u32 2147483648, %v3165_v62  ;;  %v3189_v47 = vand.u32 2147483647, %v3164_v12 }
0x3196   :  { %3764 = vrcp.f32 %v3164_v12  ;;  %vm3200_vm2 = vweird.f32 %v3165_v62  ;;  %vm3185_vm3 = vweird.f32 %v3164_v12  ;;  %v3191_v43 = vand.u32 2147483648, %v3164_v12 }
0x3197   :  { %3766 = vrcp.f32 %v4950_v29  ;;  %vm4970_vm4 = vcmp.eq.f32.partialorder %v3204_v40, 8.507059e+37  ;;  %v3207_v51 = vor.u32 1.1754944e-38, %v3206_v18  ;;  %vm4976_vm5 = vcmp.eq.f32.partialorder %v3189_v47, 8.507059e+37 }
0x3198   :  { %3768 = vrcp.f32 %v4953_v61  ;;  %vm3230_vm15 = vweird.f32 %v4950_v29  ;;  %v3192_v46 = vor.u32 1.1754944e-38, %v3191_v43  ;;  %v3234_v25 = vand.u32 2147483647, %v4950_v29 }
0x3199   :  { %3770 = vrcp.f32 %v4956_v21  ;;  %v3236_v41 = vand.u32 2147483648, %v4950_v29  ;;  %v3221_v20 = vand.u32 2147483648, %v4953_v61  ;;  %v3264_v55 = vand.u32 2147483647, %v4956_v21 }
0x319a   :  { %3772 = vrcp.f32 %v4960_v22 }
0x319b   :  { %v3763_v10 = vpop.eup %3762  ;;  %3774 = vrcp.f32 %v4965_v8  ;;  %v3237_v18 = vor.u32 1.1754944e-38, %v3236_v41 }
0x319c   :  { %v3765_v45 = vpop.eup %3764  ;;  %v3196_v6 = vmul.f32 %v3763_v10, %v3165_v62  ;;  %vm3201_vm1 = vweird.f32 %v3763_v10 }
0x319d   :  { %v4968_v39 = vpop.eup %3766  ;;  %v3181_v5 = vmul.f32 %v3765_v45, %v3164_v12  ;;  %vm3186_vm7 = vweird.f32 %v3765_v45  ;;  %vm3202_vm13 = vmor %vm3200_vm2, %vm3201_vm1  ;;  %v5018_v12 = vperm.slane %v4945_v63, 6 }
0x319e   :  { %v3197_v14 = vsub.f32 1.0, %v3196_v6  ;;  %v3226_v54 = vmul.f32 %v4968_v39, %v4950_v29  ;;  %v3769_v32 = vpop.eup %3768  ;;  %vm3231_vm0 = vweird.f32 %v4968_v39  ;;  %vm3187_vm14 = vmor %vm3185_vm3, %vm3186_vm7 }
0x319f   :  { %v3182_v58 = vsub.f32 1.0, %v3181_v5  ;;  %v4982_v26 = vpop.eup %3770  ;;  %v3211_v56 = vmul.f32 %v3769_v32, %v4953_v61  ;;  %vm3216_vm2 = vweird.f32 %v3769_v32  ;;  %vm5011_vm3 = vmor %vm3230_vm15, %vm3231_vm0  ;;  %vm3235_vm15 = vcmp.eq.f32.partialorder %v3234_v25, 8.507059e+37 }
0x31a0   :  { %v3198_v3 = vmul.f32 %v3763_v10, %v3197_v14  ;;  %v3227_v16 = vsub.f32 1.0, %v3226_v54  ;;  %v3256_v36 = vmul.f32 %v4982_v26, %v4956_v21  ;;  %v4987_v19 = vpop.eup %3772  ;;  %3776 = vrcp.f32 %v5018_v12 }
0x31a1   :  { %v3183_v1 = vmul.f32 %v3765_v45, %v3182_v58  ;;  %v3212_v13 = vsub.f32 1.0, %v3211_v56  ;;  %v3241_v48 = vmul.f32 %v4987_v19, %v4960_v22  ;;  %v4998_v0 = vpop.eup %3774  ;;  %vm3261_vm7 = vweird.f32 %v4982_v26 }
0x31a2   :  { %v3199_v35 = vadd.f32 %v3763_v10, %v3198_v3  ;;  %v3228_v34 = vmul.f32 %v4968_v39, %v3227_v16  ;;  %v3257_v24 = vsub.f32 1.0, %v3256_v36  ;;  %v3286_v29 = vmul.f32 %v4998_v0, %v4965_v8 }
0x31a3   :  { %v3184_v28 = vadd.f32 %v3765_v45, %v3183_v1  ;;  %v3213_v7 = vmul.f32 %v3769_v32, %v3212_v13  ;;  %v3242_v9 = vsub.f32 1.0, %v3241_v48  ;;  %v3266_v5 = vand.u32 2147483648, %v4956_v21 }
0x31a4   :  { %v3203_v2 = vsel %vm3202_vm13, %v3763_v10, %v3199_v35  ;;  %v3229_v31 = vadd.f32 %v4968_v39, %v3228_v34  ;;  %v3258_v40 = vmul.f32 %v4982_v26, %v3257_v24  ;;  %vm3246_vm13 = vweird.f32 %v4987_v19 }
0x31a5   :  { %v3208_v44 = vsel %vm4970_vm4, %v3207_v51, %v3203_v2  ;;  %v3188_v53 = vsel %vm3187_vm14, %v3765_v45, %v3184_v28  ;;  %v3214_v42 = vadd.f32 %v3769_v32, %v3213_v7  ;;  %vm3215_vm4 = vweird.f32 %v4953_v61 }
0x31a6   :  { %v3209_v37 = vmul.f32 %v3208_v44, %v4901_v23  ;;  %v3193_v60 = vsel %vm4976_vm5, %v3192_v46, %v3188_v53  ;;  %v3219_v23 = vand.u32 2147483647, %v4953_v61  ;;  %vm3217_vm5 = vmor %vm3215_vm4, %vm3216_vm2  ;;  %v3243_v47 = vmul.f32 %v4987_v19, %v3242_v9 }
0x31a7   :  { %v3194_v4 = vmul.f32 %v3193_v60, %v4896_v57  ;;  %v3233_v57 = vsel %vm5011_vm3, %v4968_v39, %v3229_v31  ;;  %v3218_v10 = vsel %vm3217_vm5, %v3769_v32, %v3214_v42  ;;  %v3222_v61 = vor.u32 1.1754944e-38, %v3221_v20 }
0x31a8   :  { %3312 = vperm.xlu1 %3615, %v3209_v37   ;;  %v3238_v63 = vsel %vm3235_vm15, %v3237_v18, %v3233_v57  ;;  %vm3220_vm1 = vcmp.eq.f32.partialorder %v3219_v23, 8.507059e+37  ;;  %v3259_v6 = vadd.f32 %v4982_v26, %v3258_v40  ;;  %v3287_v39 = vsub.f32 1.0, %v3286_v29 }
0x31a9   :  { %3309 = vperm.xlu2 %3613, %v3194_v4   ;;  %v3223_v45 = vsel %vm3220_vm1, %v3222_v61, %v3218_v10  ;;  %v3244_v43 = vadd.f32 %v4987_v19, %v3243_v47  ;;  %v3239_v14 = vmul.f32 %v3238_v63, %v4916_v15  ;;  %vm3260_vm0 = vweird.f32 %v4956_v21  ;;  %v3777_v15 = vpop.eup %3776 }
0x31aa   :  { %v3251_v51 = vand.u32 2147483648, %v4960_v22  ;;  %v3224_v54 = vmul.f32 %v3223_v45, %v4906_v11  ;;  %vm3262_vm14 = vmor %vm3260_vm0, %vm3261_vm7  ;;  %vm3245_vm2 = vweird.f32 %v4960_v22  ;;  %v3249_v32 = vand.u32 2147483647, %v4960_v22 }
0x31ab   :  { %v3263_v58 = vsel %vm3262_vm14, %v4982_v26, %v3259_v6  ;;  %vm3247_vm3 = vmor %vm3245_vm2, %vm3246_vm13  ;;  %v3288_v33 = vmul.f32 %v4998_v0, %v3287_v39  ;;  %v3267_v3 = vor.u32 1.1754944e-38, %v3266_v5  ;;  %vm3265_vm4 = vcmp.eq.f32.partialorder %v3264_v55, 8.507059e+37  ;;  %v3389_v6 = vpop.f32.mrf.mxu2  ;;  %v3800_v39 = vld [vmem:[%s5103_s5] ss:$0 sm:$0xff]  ;;  %s3809_s5 = smov 2  }
0x31ac   :  { %v3248_v21 = vsel %vm3247_vm3, %v4987_v19, %v3244_v43  ;;  %v3252_v16 = vor.u32 1.1754944e-38, %v3251_v51  ;;  %v3271_v11 = vmul.f32 %v3777_v15, %v5018_v12  ;;  %vm3250_vm5 = vcmp.eq.f32.partialorder %v3249_v32, 8.507059e+37 }
0x31ad   :  { %v3268_v56 = vsel %vm3265_vm4, %v3267_v3, %v3263_v58  ;;  %v3289_v22 = vadd.f32 %v4998_v0, %v3288_v33  ;;  %vm3291_vm15 = vweird.f32 %v4998_v0  ;;  %vm3290_vm1 = vweird.f32 %v4965_v8 }
0x31ae   :  { %v3253_v1 = vsel %vm3250_vm5, %v3252_v16, %v3248_v21  ;;  %v3272_v26 = vsub.f32 1.0, %v3271_v11  ;;  %v3294_v46 = vand.u32 2147483647, %v4965_v8  ;;  %v3296_v36 = vand.u32 2147483648, %v4965_v8  ;;  %vm3292_vm13 = vmor %vm3290_vm1, %vm3291_vm15 }
0x31af   :  { %v3269_v19 = vmul.f32 %v3268_v56, %v4910_v49  ;;  %vm3276_vm7 = vweird.f32 %v3777_v15  ;;  %v3281_v34 = vand.u32 2147483648, %v5018_v12  ;;  %v3254_v25 = vmul.f32 %v3253_v1, %v4913_v50 }
0x31b0   :  { %3318 = vperm.xlu1 %3615, %v3239_v14   ;;  %v3273_v35 = vmul.f32 %v3777_v15, %v3272_v26  ;;  %v3279_v13 = vand.u32 2147483647, %v5018_v12  ;;  %v3293_v28 = vsel %vm3292_vm13, %v4998_v0, %v3289_v22  ;;  %vm3275_vm0 = vweird.f32 %v5018_v12 }
0x31b1   :  { %3315 = vperm.xlu2 %3613, %v3224_v54   ;;  %v3297_v48 = vor.u32 1.1754944e-38, %v3296_v36  ;;  %vm3277_vm14 = vmor %vm3275_vm0, %vm3276_vm7  ;;  %vm3295_vm2 = vcmp.eq.f32.partialorder %v3294_v46, 8.507059e+37  ;;  %v3282_v8 = vor.u32 1.1754944e-38, %v3281_v34  ;;  %v3390_v5 = vadd.f32 %v3800_v39, %v3389_v6 }
0x31b2   :  { %v3274_v41 = vadd.f32 %v3777_v15, %v3273_v35  ;;  %vm3280_vm3 = vcmp.eq.f32.partialorder %v3279_v13, 8.507059e+37  ;;  %vm1837_vm5 = vcmask 31760   ;;  %vm2660_vm1 = vcmask 48160  }
0x31b3   :  { %v3298_v2 = vsel %vm3295_vm2, %v3297_v48, %v3293_v28  ;;  %vm3483_vm7 = vcmask 64560  }
0x31b4   :  { %v3278_v49 = vsel %vm3277_vm14, %v3777_v15, %v3274_v41  ;;  %v3299_v50 = vmul.f32 %v3298_v2, %v4926_v30  ;;  %v3801_v41 = vld [vmem:[%s5104_s8] ss:$0 sm:$0xff] }
0x31b5   :  { %v3283_v31 = vsel %vm3280_vm3, %v3282_v8, %v3278_v49 }
0x31b6   :  { %v3284_v7 = vmul.f32 %v3283_v31, %v4922_v38 }
0x31b8   :  { %3324 = vperm.xlu1 %3615, %v3269_v19  }
0x31b9   :  { %3321 = vperm.xlu2 %3613, %v3254_v25  }
0x31c0   :  { %3330 = vperm.xlu1 %3615, %v3299_v50  }
0x31c1   :  { %3327 = vperm.xlu2 %3613, %v3284_v7  }
0x3203   :  { %v3310_v24 = vpop.permute.xlu2 %3309 }
0x3204   :  { %v3332_v60 = vperm.slane %v3310_v24, %v4181_v17 }
0x320b   :  { %v3316_v44 = vpop.permute.xlu2 %3315 }
0x320c   :  { %v3334_v4 = vperm.slane %v3316_v44, %v4181_v17 }
0x3213   :  { %v3322_v9 = vpop.permute.xlu2 %3321 }
0x3214   :  { %v3336_v12 = vperm.slane %v3322_v9, %v4181_v17 }
0x321a   :  { %v3313_v0 = vpop.permute.xlu1 %3312 }
0x321b   :  { %v3333_v37 = vperm.slane %v3313_v0, %v4181_v17  ;;  %v3328_v57 = vpop.permute.xlu2 %3327 }
0x321c   :  { %v3338_v18 = vperm.slane %v3328_v57, %v4181_v17 }
0x321d   :  { %v3340_v42 = vsel %vm1498_vm6, %v3333_v37, %v3332_v60  ;;  %vm5161_vm6 = vcmask 1047559  }
0x321e   :  { %v3341_v38 = vsel %vm1500_vm8, %v3334_v4, %v3340_v42  ;;  %vm5162_vm8 = vcmask 64512  }
0x3222   :  { %v3319_v53 = vpop.permute.xlu1 %3318 }
0x3223   :  { %v3335_v20 = vperm.slane %v3319_v53, %v4181_v17 }
0x3225   :  { %v3342_v62 = vsel %vm1502_vm9, %v3335_v20, %v3341_v38  ;;  %vm5163_vm9 = vcmask 261120  }
0x3226   :  { %v3343_v40 = vsel %vm1504_vm10, %v3336_v12, %v3342_v62  ;;  %vm5164_vm15 = vmmov %vm5163_vm9 }
0x322a   :  { %v3325_v30 = vpop.permute.xlu1 %3324 }
0x322b   :  { %v3337_v23 = vperm.slane %v3325_v30, %v4181_v17 }
0x322d   :  { %v3344_v29 = vsel %vm1506_vm11, %v3337_v23, %v3343_v40 }
0x322e   :  { %v3345_v61 = vsel %vm1508_vm12, %v3338_v18, %v3344_v29 }
0x3232   :  { %v3331_v10 = vpop.permute.xlu1 %3330 }
0x3233   :  { %v3339_v47 = vperm.slane %v3331_v10, %v4181_v17 }
0x3235   :  { %v3346_v63 = vsel %vm5161_vm6, %v3339_v47, %v3345_v61 }
0x3236   :  { %3557 = vmatmul.msk.f32.vlgmr.msrb.gmra.mxu0 %vm5162_vm8, %v3346_v63 }
0x32b3   :  { %v3367_v45 = vpop.f32.mrf.mxu0 }
0x32b4   :  { %3560 = vmatmul.msk.f32.vlgmr.msrb.gmra.mxu1 %vm5163_vm9, %v3367_v45 }
0x3331   :  { %v3412_v43 = vpop.f32.mrf.mxu1 }
0x3332   :  { %v3415_v14 = vadd.f32 %v3412_v43, %v3390_v5 }
0x3334   :  { %3778 = vtanh.f32 %v3415_v14  ;;  %v3561_v17 = vmul.f32 -1.442695, %v3415_v14 }
0x3336   :  { %3780 = vpow2.f32 %v3561_v17 }
0x333a   :  { %v3779_v55 = vpop.eup %3778 }
0x333b   :  { %3438 = vrot.lane.b32.xlu2 %v3779_v55, %s3803_s2 }
0x333c   :  { %v3781_v51 = vpop.eup %3780 }
0x333d   :  { %v3419_v54 = vadd.f32 1.0, %v3781_v51 }
0x333f   :  { %3782 = vrcp.f32 %v3419_v54  ;;  %v3431_v21 = vand.u32 2147483648, %v3419_v54  ;;  %vm3425_vm11 = vweird.f32 %v3419_v54  ;;  %v3429_v16 = vand.u32 2147483647, %v3419_v54 }
0x3341   :  { %v3432_v56 = vor.u32 1.1754944e-38, %v3431_v21  ;;  %vm3430_vm4 = vcmp.eq.f32.partialorder %v3429_v16, 8.507059e+37 }
0x3345   :  { %v3783_v32 = vpop.eup %3782 }
0x3346   :  { %v3421_v58 = vmul.f32 %v3783_v32, %v3419_v54  ;;  %vm3426_vm10 = vweird.f32 %v3783_v32 }
0x3347   :  { %vm3427_vm12 = vmor %vm3425_vm11, %vm3426_vm10 }
0x3348   :  { %v3422_v33 = vsub.f32 1.0, %v3421_v58 }
0x334a   :  { %v3423_v15 = vmul.f32 %v3783_v32, %v3422_v33 }
0x334c   :  { %v3424_v3 = vadd.f32 %v3783_v32, %v3423_v15 }
0x334e   :  { %v3428_v11 = vsel %vm3427_vm12, %v3783_v32, %v3424_v3 }
0x334f   :  { %v3433_v22 = vsel %vm3430_vm4, %v3432_v56, %v3428_v11 }
0x3350   :  { %v3436_v46 = vmul.f32 %v3433_v22, %v4770_v27 }
0x3395   :  { %v3439_v1 = vpop.permute.xlu2 %3438 }
0x3396   :  { %v3441_v26 = vmul.f32 %v3439_v1, %v3433_v22 }
0x3398   :  { %3443 = vrot.lane.b32.xlu1 %v3441_v26, %s3804_s29 }
0x33a0   :  { %1834 = vrot.lane.b32.xlu1 %v4466_v59, %s3809_s5 }
0x340a   :  { %v3444_v36 = vpop.permute.xlu1 %3443 }
0x340b   :  { %v3446_v19 = vadd.f32 %v3444_v36, %v3436_v46 }
0x340d   :  { %3784 = vtanh.f32 %v3446_v19 }
0x3412   :  { %v1835_v35 = vpop.permute.xlu1 %1834 }
0x3413   :  { %v3785_v34 = vpop.eup %3784  ;;  %1838 = vst.msk [vmem:[%s5106_s11] sm:$0xff] %vm1837_vm5, %v1835_v35 }
0x3414   :  { %3449 = vrot.lane.b32.xlu0 %v3785_v34, %s3803_s2  ;;  %s3811_s2 = smov 6  }
0x3486   :  { %v3450_v25 = vpop.permute.xlu0 %3449 }
0x3487   :  { %v3452_v13 = vmul.f32 %v3450_v25, %v3433_v22 }
0x3489   :  { %3454 = vrot.lane.b32.xlu2 %v3452_v13, %s3804_s29 }
0x3491   :  { %2657 = vrot.lane.b32.xlu2 %v4779_v52, %s3810_s3 }
0x34e3   :  { %v3455_v59 = vpop.permute.xlu2 %3454 }
0x34e4   :  { %3562 = vmatmul.msk.f32.vlgmr.msrb.gmra.mxu3 %vm5164_vm15, %v3455_v59 }
0x34eb   :  { %v2658_v27 = vpop.permute.xlu2 %2657 }
0x34ec   :  { %2661 = vst.msk [vmem:[%s5106_s11] sm:$0xff] %vm2660_vm1, %v2658_v27 }
0x3567   :  { %v3475_v28 = vpop.f32.mrf.mxu3 }
0x3568   :  { %v3476_v48 = vadd.f32 %v3801_v41, %v3475_v28 }
0x356a   :  { %3786 = vtanh.f32 %v3476_v48 }
0x3570   :  { %v3787_v49 = vpop.eup %3786 }
0x3571   :  { %3480 = vrot.lane.b32.xlu1 %v3787_v49, %s3811_s2 }
0x35e3   :  { %v3481_v52 = vpop.permute.xlu1 %3480 }
0x35e4   :  { %3484 = vst.msk [vmem:[%s5106_s11] sm:$0xff] %vm3483_vm7, %v3481_v52 }

</bundles_post_ra>
